<compile_context>
chip_gen: v7x
topology: tpu7x:2x2x1
jax: 0.10.0
libtpu: 0.0.40
codegen_flags: <defaults>
</compile_context>

<pallas_src>
import functools

import jax
import jax.numpy as jnp
from jax.experimental import pallas as pl
from jax.experimental.pallas import tpu as pltpu

NUM_LABELS = 11
FEAT_C = 2048   # fc expects 2048 input channels (EfficientNet-b5/b6/b7 head width)


# ----------------------------- kernel body --------------------------------- #

def _head_kernel(*refs, use_mxu, with_loss, inv_hw, num_labels, nblk, chunk_c):
    # Static unpack: inputs (x[, ones], w, bias[, targets]), outputs (y[, bce]),
    # scratch (acc).
    if use_mxu:
        x_ref, ones_ref = refs[0], refs[1]
        rest = refs[2:]
    else:
        x_ref, ones_ref = refs[0], None
        rest = refs[1:]
    w_ref, bias_ref = rest[0], rest[1]
    if with_loss:
        t_ref, y_ref, bce_ref, acc_ref = rest[2:6]
    else:
        t_ref, bce_ref = None, None
        y_ref, acc_ref = rest[2:4]

    k = pl.program_id(1)

    @pl.when(k == 0)
    def _():
        acc_ref[...] = jnp.zeros_like(acc_ref)

    if use_mxu:
        # Pooling on the (otherwise idle) MXU.  The RHS has ones only in lane 0,
        # so the once-per-batch lane reduce below works for both accumulate paths.
        acc_ref[...] += jnp.dot(x_ref[0], ones_ref[...],
                                preferred_element_type=jnp.float32)
    else:
        # Lane-dense VPU accumulate: 128-channel chunks keep the running partial
        # inside the vreg file; acc_ref is read/written once per chunk per tile.
        c_total = acc_ref.shape[0]
        for c0 in range(0, c_total, chunk_c):
            c1 = min(c0 + chunk_c, c_total)
            part = x_ref[0, c0:c1, 0:128].astype(jnp.float32)
            for j in range(1, nblk):
                part = part + x_ref[0, c0:c1,
                                    j * 128:(j + 1) * 128].astype(jnp.float32)
            acc_ref[c0:c1, :] += part

    @pl.when(k == pl.num_programs(1) - 1)
    def _():
        # Single cross-lane (XLU) reduce per batch element, then avgpool finalize.
        pooled = jnp.sum(acc_ref[...], axis=-1, keepdims=True) * inv_hw     # (C, 1)
        # TODO(synk): Dropout(p=0.5) is identity in eval mode; a training-mode
        #             kernel would use pltpu.prng_seed / pltpu.prng_random_bits.
        logits = (jnp.sum(pooled * w_ref[...], axis=0, keepdims=True)
                  + bias_ref[...])                                          # (1, NLP)
        y_ref[0] = 1.0 / (1.0 + jnp.exp(-logits))
        if with_loss:
            # BCEWithLogitsLoss, numerically stable per-element form:
            #   max(z,0) - z*t + log(1 + exp(-|z|)); padded lanes masked to 0.
            t = t_ref[0].astype(jnp.float32)
            bce = (jnp.maximum(logits, 0.0) - logits * t
                   + jnp.log(1.0 + jnp.exp(-jnp.abs(logits))))
            lane = jax.lax.broadcasted_iota(jnp.int32, bce.shape, 1)
            bce_ref[0] = jnp.where(lane < num_labels, bce, 0.0)


# ------------------------------- wrapper ----------------------------------- #

def _choose_tiling(hw, c, itemsize, max_tile_hw=None, target_bytes=8 * 1024 * 1024):
    """Pick (tile_hw, hw_pad): tile_hw is a multiple of 128 that divides hw_pad,
    targeting ~8 MiB per tile (double-buffered tiles + weights + accumulator stay
    well inside the scoped-VMEM limit on v5e/v6e/v7x)."""
    cap = max(128, ((target_bytes // (c * itemsize)) // 128) * 128)
    if max_tile_hw is not None:
        cap = min(cap, max(128, (max_tile_hw // 128) * 128))
    hw_pad = 128 * pl.cdiv(hw, 128)      # zero-pad; inv_hw uses the true HW
    if hw_pad <= cap:
        return hw_pad, hw_pad            # single full-extent tile per batch
    for t in range(cap, 511, -128):      # largest decent 128-multiple divisor
        if hw_pad % t == 0:
            return t, hw_pad
    # No decent divisor: pad HW further so full-size tiles still stream.
    return cap, cap * pl.cdiv(hw, cap)


def efficientnet_head(feats_nchw, fc_w, fc_b, targets=None, *, max_tile_hw=None):
    """feats_nchw: [B, 2048, H, W] backbone feature map (native NCHW layout/dtype).
    fc_w: [num_labels, 2048] (PyTorch Linear layout), fc_b: [num_labels].
    targets: optional [B, num_labels]. Returns (y_pred [B, num_labels], loss|None)."""
    B, C, H, W = feats_nchw.shape
    nl, c_in = fc_w.shape
    assert c_in == C, f"fc expects {c_in} channels, backbone produced {C}"
    hw = H * W
    nlp = 128 * pl.cdiv(nl, 128)                 # lane-dense padded fc width

    # Free reshape only — no transpose, no dtype upcast of the big feature map.
    x = feats_nchw.reshape(B, C, hw)
    itemsize = jnp.dtype(x.dtype).itemsize
    tile_hw, hw_pad = _choose_tiling(hw, C, itemsize, max_tile_hw)
    if hw_pad != hw:
        x = jnp.pad(x, ((0, 0), (0, 0), (0, hw_pad - hw)))   # zeros: numerically free

    # Sub-32-bit features -> MXU pooling (no cast, no per-tile XLU work);
    # f32 features -> lane-dense VPU accumulate (safe for v5e's 197 TF/s MXU).
    use_mxu = itemsize < 4
    nblk = tile_hw // 128
    grid = (B, hw_pad // tile_hw)
    inv_hw = 1.0 / float(hw)

    # Tiny fc params, zero-padded to 128 lanes.  Kept in f32 (precision of the
    # Linear layer; VMEM headroom is ample even with 8 MiB feature tiles).
    w_t = jnp.pad(fc_w.astype(jnp.float32).T, ((0, 0), (0, nlp - nl)))   # (C, NLP)
    bias = jnp.pad(fc_b.astype(jnp.float32), (0, nlp - nl)).reshape(1, nlp)

    feat_spec = pl.BlockSpec((1, C, tile_hw), lambda bb, kk: (bb, 0, kk))
    ones_spec = pl.BlockSpec((tile_hw, 128), lambda bb, kk: (0, 0))
    w_spec = pl.BlockSpec((C, nlp), lambda bb, kk: (0, 0))
    bias_spec = pl.BlockSpec((1, nlp), lambda bb, kk: (0, 0))
    row_spec = pl.BlockSpec((1, 1, nlp), lambda bb, kk: (bb, 0, 0))

    inputs, in_specs = [x], [feat_spec]
    if use_mxu:
        ones_col = (jax.lax.broadcasted_iota(jnp.int32, (tile_hw, 128), 1) == 0
                    ).astype(x.dtype)            # ones only in lane 0
        inputs.append(ones_col)
        in_specs.append(ones_spec)
    inputs += [w_t, bias]
    in_specs += [w_spec, bias_spec]

    # Mirror the PyTorch module: loss only if targets given AND width matches.
    has_targets = targets is not None and targets.shape[1] == nl
    if has_targets:
        tgt = jnp.pad(targets.astype(jnp.float32),
                      ((0, 0), (0, nlp - nl))).reshape(B, 1, nlp)
        inputs.append(tgt)
        in_specs.append(row_spec)

    compiler_params = pltpu.CompilerParams(
        dimension_semantics=("parallel", "arbitrary"),   # batch parallel (megacore)
        vmem_limit_bytes=48 * 1024 * 1024,               # headroom for 8 MiB tiles
    )
    cost = pl.CostEstimate(
        flops=2 * B * C * hw_pad * (128 if use_mxu else 1) + 2 * B * C * nlp,
        transcendentals=(3 if has_targets else 1) * B * nlp,
        bytes_accessed=(x.size * itemsize + w_t.size * 4 + bias.size * 4
                        + (3 if has_targets else 2) * B * nlp * 4),
    )
    kernel = functools.partial(
        _head_kernel, use_mxu=use_mxu, with_loss=has_targets, inv_hw=inv_hw,
        num_labels=nl, nblk=nblk, chunk_c=min(128, C))
    scratch = [pltpu.VMEM((C, 128), jnp.float32)]    # lane-dense per-batch acc

    if has_targets:
        y_pad, bce_pad = pl.pallas_call(
            kernel, grid=grid,
            in_specs=in_specs,
            out_specs=[row_spec, row_spec],
            out_shape=[jax.ShapeDtypeStruct((B, 1, nlp), jnp.float32),
                       jax.ShapeDtypeStruct((B, 1, nlp), jnp.float32)],
            scratch_shapes=scratch,
            compiler_params=compiler_params,
            cost_estimate=cost,
        )(*inputs)
        y_pred = y_pad.reshape(B, nlp)[:, :nl]
        loss = jnp.sum(bce_pad) / (B * nl)           # padded lanes zeroed in-kernel
        return y_pred, loss

    y_pad = pl.pallas_call(
        kernel, grid=grid,
        in_specs=in_specs,
        out_specs=row_spec,
        out_shape=jax.ShapeDtypeStruct((B, 1, nlp), jnp.float32),
        scratch_shapes=scratch,
        compiler_params=compiler_params,
        cost_estimate=cost,
    )(*inputs)
    return y_pad.reshape(B, nlp)[:, :nl], None


# ------------------------------ reference ---------------------------------- #

def _reference(feats_nchw, fc_w, fc_b, targets):
    pooled = jnp.mean(feats_nchw.astype(jnp.float32), axis=(2, 3))     # [B, 2048]
    logits = pooled @ fc_w.T + fc_b
    y_pred = jax.nn.sigmoid(logits)
    t = targets.astype(jnp.float32)
    bce = jnp.maximum(logits, 0.0) - logits * t + jnp.log1p(jnp.exp(-jnp.abs(logits)))
    return y_pred, jnp.mean(bce)


if __name__ == "__main__":
    key = jax.random.PRNGKey(0)
    k_f1, k_f2, k_f3, k_w, k_b, k_t = jax.random.split(key, 6)

    B = 2
    bound = 1.0 / (FEAT_C ** 0.5)
    fc_w = jax.random.uniform(k_w, (NUM_LABELS, FEAT_C), jnp.float32, -bound, bound)
    fc_b = jax.random.uniform(k_b, (NUM_LABELS,), jnp.float32, -bound, bound)
    targets = (jax.random.uniform(k_t, (B, NUM_LABELS)) > 0.5).astype(jnp.float32)

    # Case 1: f32 features (lane-dense VPU path), single HW tile, with BCE loss.
    feats1 = jax.random.normal(k_f1, (B, FEAT_C, 4, 4), jnp.float32)
    y1, l1 = efficientnet_head(feats1, fc_w, fc_b, targets)
    jax.block_until_ready((y1, l1))
    y1_ref, l1_ref = _reference(feats1, fc_w, fc_b, targets)
    assert jnp.allclose(y1, y1_ref, atol=1e-4, rtol=1e-4)
    assert jnp.allclose(l1, l1_ref, atol=1e-4, rtol=1e-4)

    # Case 2: bf16 features (MXU pooling path), HW forced into multiple pipelined
    # reduction tiles, inference path (no targets -> no BCE / no target DMA).
    feats2 = jax.random.normal(k_f2, (B, FEAT_C, 16, 16),
                               jnp.float32).astype(jnp.bfloat16)
    y2, l2 = efficientnet_head(feats2, fc_w, fc_b, None, max_tile_hw=128)
    jax.block_until_ready(y2)
    assert l2 is None
    y2_ref, _ = _reference(feats2, fc_w, fc_b, targets)
    assert jnp.allclose(y2, y2_ref, atol=1e-3, rtol=1e-3)

    # Case 3: bf16 features with realistic non-128-divisible HW (15x15, like an
    # EfficientNet-b5 feature map): wrapper zero-pads HW, multi-tile reduction,
    # with loss.
    feats3 = jax.random.normal(k_f3, (B, FEAT_C, 15, 15),
                               jnp.float32).astype(jnp.bfloat16)
    y3, l3 = efficientnet_head(feats3, fc_w, fc_b, targets, max_tile_hw=128)
    jax.block_until_ready((y3, l3))
    y3_ref, l3_ref = _reference(feats3, fc_w, fc_b, targets)
    assert jnp.allclose(y3, y3_ref, atol=1e-3, rtol=1e-3)
    assert jnp.allclose(l3, l3_ref, atol=1e-3, rtol=1e-3)

    print("KERNEL_OK")
</pallas_src>

<mosaic_0001>
module attributes {stable_mosaic.version = 11 : i64} {
  func.func @_head_kernel(%arg0: i32, %arg1: i32, %arg2: memref<1x2048x128xf32, #tpu.memory_space<vmem>>, %arg3: memref<2048x128xf32, #tpu.memory_space<vmem>>, %arg4: memref<1x128xf32, #tpu.memory_space<vmem>>, %arg5: memref<1x1x128xf32, #tpu.memory_space<vmem>>, %arg6: memref<1x1x128xf32, #tpu.memory_space<vmem>>, %arg7: memref<1x1x128xf32, #tpu.memory_space<vmem>>, %arg8: memref<2048x128xf32, #tpu.memory_space<vmem>>) attributes {dimension_semantics = [#tpu.dimension_semantics<parallel>, #tpu.dimension_semantics<arbitrary>], iteration_bounds = array<i64: 2, 1>, scalar_prefetch = 0 : i64, scratch_operands = 1 : i64, tpu.core_type = #tpu.core_type<tc>, window_params = [{transform_indices = @transform_0, window_bounds = array<i64: 1, 2048, 128>}, {pipeline_mode = #tpu.pipeline_mode<synchronous>, transform_indices = @transform_1, window_bounds = array<i64: 2048, 128>}, {pipeline_mode = #tpu.pipeline_mode<synchronous>, transform_indices = @transform_2, window_bounds = array<i64: 1, 128>}, {transform_indices = @transform_3, window_bounds = array<i64: 1, 1, 128>}, {transform_indices = @transform_4, window_bounds = array<i64: 1, 1, 128>}, {transform_indices = @transform_5, window_bounds = array<i64: 1, 1, 128>}]} {
    %c0_i32 = arith.constant 0 : i32
    %0 = arith.cmpi eq, %arg1, %c0_i32 : i32
    %1 = arith.extui %0 : i1 to i32
    %c0_i32_0 = arith.constant 0 : i32
    %2 = arith.cmpi ne, %1, %c0_i32_0 : i32
    scf.if %2 {
      %cst = arith.constant 0.000000e+00 : f32
      %86 = vector.broadcast %cst : f32 to vector<2048x128xf32>
      %c0_99 = arith.constant 0 : index
      %c0_100 = arith.constant 0 : index
      %87 = vector.load %arg8[%c0_99, %c0_100] : memref<2048x128xf32, #tpu.memory_space<vmem>>, vector<2048x128xf32>
      tpu.vector_store %arg8[%c0_99, %c0_100], %86 {strides = array<i32>} : memref<2048x128xf32, #tpu.memory_space<vmem>>, vector<2048x128xf32>,
    } else {
    }
    %c0 = arith.constant 0 : index
    %c0_1 = arith.constant 0 : index
    %c0_2 = arith.constant 0 : index
    %3 = vector.load %arg2[%c0, %c0_1, %c0_2] : memref<1x2048x128xf32, #tpu.memory_space<vmem>>, vector<1x128x128xf32>
    %4 = vector.shape_cast %3 : vector<1x128x128xf32> to vector<128x128xf32>
    %c0_3 = arith.constant 0 : index
    %c0_4 = arith.constant 0 : index
    %5 = vector.load %arg8[%c0_3, %c0_4] : memref<2048x128xf32, #tpu.memory_space<vmem>>, vector<128x128xf32>
    %6 = arith.addf %5, %4 : vector<128x128xf32>
    %c0_5 = arith.constant 0 : index
    %c0_6 = arith.constant 0 : index
    %7 = vector.load %arg8[%c0_5, %c0_6] : memref<2048x128xf32, #tpu.memory_space<vmem>>, vector<128x128xf32>
    tpu.vector_store %arg8[%c0_5, %c0_6], %6 {strides = array<i32>} : memref<2048x128xf32, #tpu.memory_space<vmem>>, vector<128x128xf32>,
    %c0_7 = arith.constant 0 : index
    %c128 = arith.constant 128 : index
    %c0_8 = arith.constant 0 : index
    %8 = vector.load %arg2[%c0_7, %c128, %c0_8] : memref<1x2048x128xf32, #tpu.memory_space<vmem>>, vector<1x128x128xf32>
    %9 = vector.shape_cast %8 : vector<1x128x128xf32> to vector<128x128xf32>
    %c128_9 = arith.constant 128 : index
    %c0_10 = arith.constant 0 : index
    %10 = vector.load %arg8[%c128_9, %c0_10] : memref<2048x128xf32, #tpu.memory_space<vmem>>, vector<128x128xf32>
    %11 = arith.addf %10, %9 : vector<128x128xf32>
    %c128_11 = arith.constant 128 : index
    %c0_12 = arith.constant 0 : index
    %12 = vector.load %arg8[%c128_11, %c0_12] : memref<2048x128xf32, #tpu.memory_space<vmem>>, vector<128x128xf32>
    tpu.vector_store %arg8[%c128_11, %c0_12], %11 {strides = array<i32>} : memref<2048x128xf32, #tpu.memory_space<vmem>>, vector<128x128xf32>,
    %c0_13 = arith.constant 0 : index
    %c256 = arith.constant 256 : index
    %c0_14 = arith.constant 0 : index
    %13 = vector.load %arg2[%c0_13, %c256, %c0_14] : memref<1x2048x128xf32, #tpu.memory_space<vmem>>, vector<1x128x128xf32>
    %14 = vector.shape_cast %13 : vector<1x128x128xf32> to vector<128x128xf32>
    %c256_15 = arith.constant 256 : index
    %c0_16 = arith.constant 0 : index
    %15 = vector.load %arg8[%c256_15, %c0_16] : memref<2048x128xf32, #tpu.memory_space<vmem>>, vector<128x128xf32>
    %16 = arith.addf %15, %14 : vector<128x128xf32>
    %c256_17 = arith.constant 256 : index
    %c0_18 = arith.constant 0 : index
    %17 = vector.load %arg8[%c256_17, %c0_18] : memref<2048x128xf32, #tpu.memory_space<vmem>>, vector<128x128xf32>
    tpu.vector_store %arg8[%c256_17, %c0_18], %16 {strides = array<i32>} : memref<2048x128xf32, #tpu.memory_space<vmem>>, vector<128x128xf32>,
    %c0_19 = arith.constant 0 : index
    %c384 = arith.constant 384 : index
    %c0_20 = arith.constant 0 : index
    %18 = vector.load %arg2[%c0_19, %c384, %c0_20] : memref<1x2048x128xf32, #tpu.memory_space<vmem>>, vector<1x128x128xf32>
    %19 = vector.shape_cast %18 : vector<1x128x128xf32> to vector<128x128xf32>
    %c384_21 = arith.constant 384 : index
    %c0_22 = arith.constant 0 : index
    %20 = vector.load %arg8[%c384_21, %c0_22] : memref<2048x128xf32, #tpu.memory_space<vmem>>, vector<128x128xf32>
    %21 = arith.addf %20, %19 : vector<128x128xf32>
    %c384_23 = arith.constant 384 : index
    %c0_24 = arith.constant 0 : index
    %22 = vector.load %arg8[%c384_23, %c0_24] : memref<2048x128xf32, #tpu.memory_space<vmem>>, vector<128x128xf32>
    tpu.vector_store %arg8[%c384_23, %c0_24], %21 {strides = array<i32>} : memref<2048x128xf32, #tpu.memory_space<vmem>>, vector<128x128xf32>,
    %c0_25 = arith.constant 0 : index
    %c512 = arith.constant 512 : index
    %c0_26 = arith.constant 0 : index
    %23 = vector.load %arg2[%c0_25, %c512, %c0_26] : memref<1x2048x128xf32, #tpu.memory_space<vmem>>, vector<1x128x128xf32>
    %24 = vector.shape_cast %23 : vector<1x128x128xf32> to vector<128x128xf32>
    %c512_27 = arith.constant 512 : index
    %c0_28 = arith.constant 0 : index
    %25 = vector.load %arg8[%c512_27, %c0_28] : memref<2048x128xf32, #tpu.memory_space<vmem>>, vector<128x128xf32>
    %26 = arith.addf %25, %24 : vector<128x128xf32>
    %c512_29 = arith.constant 512 : index
    %c0_30 = arith.constant 0 : index
    %27 = vector.load %arg8[%c512_29, %c0_30] : memref<2048x128xf32, #tpu.memory_space<vmem>>, vector<128x128xf32>
    tpu.vector_store %arg8[%c512_29, %c0_30], %26 {strides = array<i32>} : memref<2048x128xf32, #tpu.memory_space<vmem>>, vector<128x128xf32>,
    %c0_31 = arith.constant 0 : index
    %c640 = arith.constant 640 : index
    %c0_32 = arith.constant 0 : index
    %28 = vector.load %arg2[%c0_31, %c640, %c0_32] : memref<1x2048x128xf32, #tpu.memory_space<vmem>>, vector<1x128x128xf32>
    %29 = vector.shape_cast %28 : vector<1x128x128xf32> to vector<128x128xf32>
    %c640_33 = arith.constant 640 : index
    %c0_34 = arith.constant 0 : index
    %30 = vector.load %arg8[%c640_33, %c0_34] : memref<2048x128xf32, #tpu.memory_space<vmem>>, vector<128x128xf32>
    %31 = arith.addf %30, %29 : vector<128x128xf32>
    %c640_35 = arith.constant 640 : index
    %c0_36 = arith.constant 0 : index
    %32 = vector.load %arg8[%c640_35, %c0_36] : memref<2048x128xf32, #tpu.memory_space<vmem>>, vector<128x128xf32>
    tpu.vector_store %arg8[%c640_35, %c0_36], %31 {strides = array<i32>} : memref<2048x128xf32, #tpu.memory_space<vmem>>, vector<128x128xf32>,
    %c0_37 = arith.constant 0 : index
    %c768 = arith.constant 768 : index
    %c0_38 = arith.constant 0 : index
    %33 = vector.load %arg2[%c0_37, %c768, %c0_38] : memref<1x2048x128xf32, #tpu.memory_space<vmem>>, vector<1x128x128xf32>
    %34 = vector.shape_cast %33 : vector<1x128x128xf32> to vector<128x128xf32>
    %c768_39 = arith.constant 768 : index
    %c0_40 = arith.constant 0 : index
    %35 = vector.load %arg8[%c768_39, %c0_40] : memref<2048x128xf32, #tpu.memory_space<vmem>>, vector<128x128xf32>
    %36 = arith.addf %35, %34 : vector<128x128xf32>
    %c768_41 = arith.constant 768 : index
    %c0_42 = arith.constant 0 : index
    %37 = vector.load %arg8[%c768_41, %c0_42] : memref<2048x128xf32, #tpu.memory_space<vmem>>, vector<128x128xf32>
    tpu.vector_store %arg8[%c768_41, %c0_42], %36 {strides = array<i32>} : memref<2048x128xf32, #tpu.memory_space<vmem>>, vector<128x128xf32>,
    %c0_43 = arith.constant 0 : index
    %c896 = arith.constant 896 : index
    %c0_44 = arith.constant 0 : index
    %38 = vector.load %arg2[%c0_43, %c896, %c0_44] : memref<1x2048x128xf32, #tpu.memory_space<vmem>>, vector<1x128x128xf32>
    %39 = vector.shape_cast %38 : vector<1x128x128xf32> to vector<128x128xf32>
    %c896_45 = arith.constant 896 : index
    %c0_46 = arith.constant 0 : index
    %40 = vector.load %arg8[%c896_45, %c0_46] : memref<2048x128xf32, #tpu.memory_space<vmem>>, vector<128x128xf32>
    %41 = arith.addf %40, %39 : vector<128x128xf32>
    %c896_47 = arith.constant 896 : index
    %c0_48 = arith.constant 0 : index
    %42 = vector.load %arg8[%c896_47, %c0_48] : memref<2048x128xf32, #tpu.memory_space<vmem>>, vector<128x128xf32>
    tpu.vector_store %arg8[%c896_47, %c0_48], %41 {strides = array<i32>} : memref<2048x128xf32, #tpu.memory_space<vmem>>, vector<128x128xf32>,
    %c0_49 = arith.constant 0 : index
    %c1024 = arith.constant 1024 : index
    %c0_50 = arith.constant 0 : index
    %43 = vector.load %arg2[%c0_49, %c1024, %c0_50] : memref<1x2048x128xf32, #tpu.memory_space<vmem>>, vector<1x128x128xf32>
    %44 = vector.shape_cast %43 : vector<1x128x128xf32> to vector<128x128xf32>
    %c1024_51 = arith.constant 1024 : index
    %c0_52 = arith.constant 0 : index
    %45 = vector.load %arg8[%c1024_51, %c0_52] : memref<2048x128xf32, #tpu.memory_space<vmem>>, vector<128x128xf32>
    %46 = arith.addf %45, %44 : vector<128x128xf32>
    %c1024_53 = arith.constant 1024 : index
    %c0_54 = arith.constant 0 : index
    %47 = vector.load %arg8[%c1024_53, %c0_54] : memref<2048x128xf32, #tpu.memory_space<vmem>>, vector<128x128xf32>
    tpu.vector_store %arg8[%c1024_53, %c0_54], %46 {strides = array<i32>} : memref<2048x128xf32, #tpu.memory_space<vmem>>, vector<128x128xf32>,
    %c0_55 = arith.constant 0 : index
    %c1152 = arith.constant 1152 : index
    %c0_56 = arith.constant 0 : index
    %48 = vector.load %arg2[%c0_55, %c1152, %c0_56] : memref<1x2048x128xf32, #tpu.memory_space<vmem>>, vector<1x128x128xf32>
    %49 = vector.shape_cast %48 : vector<1x128x128xf32> to vector<128x128xf32>
    %c1152_57 = arith.constant 1152 : index
    %c0_58 = arith.constant 0 : index
    %50 = vector.load %arg8[%c1152_57, %c0_58] : memref<2048x128xf32, #tpu.memory_space<vmem>>, vector<128x128xf32>
    %51 = arith.addf %50, %49 : vector<128x128xf32>
    %c1152_59 = arith.constant 1152 : index
    %c0_60 = arith.constant 0 : index
    %52 = vector.load %arg8[%c1152_59, %c0_60] : memref<2048x128xf32, #tpu.memory_space<vmem>>, vector<128x128xf32>
    tpu.vector_store %arg8[%c1152_59, %c0_60], %51 {strides = array<i32>} : memref<2048x128xf32, #tpu.memory_space<vmem>>, vector<128x128xf32>,
    %c0_61 = arith.constant 0 : index
    %c1280 = arith.constant 1280 : index
    %c0_62 = arith.constant 0 : index
    %53 = vector.load %arg2[%c0_61, %c1280, %c0_62] : memref<1x2048x128xf32, #tpu.memory_space<vmem>>, vector<1x128x128xf32>
    %54 = vector.shape_cast %53 : vector<1x128x128xf32> to vector<128x128xf32>
    %c1280_63 = arith.constant 1280 : index
    %c0_64 = arith.constant 0 : index
    %55 = vector.load %arg8[%c1280_63, %c0_64] : memref<2048x128xf32, #tpu.memory_space<vmem>>, vector<128x128xf32>
    %56 = arith.addf %55, %54 : vector<128x128xf32>
    %c1280_65 = arith.constant 1280 : index
    %c0_66 = arith.constant 0 : index
    %57 = vector.load %arg8[%c1280_65, %c0_66] : memref<2048x128xf32, #tpu.memory_space<vmem>>, vector<128x128xf32>
    tpu.vector_store %arg8[%c1280_65, %c0_66], %56 {strides = array<i32>} : memref<2048x128xf32, #tpu.memory_space<vmem>>, vector<128x128xf32>,
    %c0_67 = arith.constant 0 : index
    %c1408 = arith.constant 1408 : index
    %c0_68 = arith.constant 0 : index
    %58 = vector.load %arg2[%c0_67, %c1408, %c0_68] : memref<1x2048x128xf32, #tpu.memory_space<vmem>>, vector<1x128x128xf32>
    %59 = vector.shape_cast %58 : vector<1x128x128xf32> to vector<128x128xf32>
    %c1408_69 = arith.constant 1408 : index
    %c0_70 = arith.constant 0 : index
    %60 = vector.load %arg8[%c1408_69, %c0_70] : memref<2048x128xf32, #tpu.memory_space<vmem>>, vector<128x128xf32>
    %61 = arith.addf %60, %59 : vector<128x128xf32>
    %c1408_71 = arith.constant 1408 : index
    %c0_72 = arith.constant 0 : index
    %62 = vector.load %arg8[%c1408_71, %c0_72] : memref<2048x128xf32, #tpu.memory_space<vmem>>, vector<128x128xf32>
    tpu.vector_store %arg8[%c1408_71, %c0_72], %61 {strides = array<i32>} : memref<2048x128xf32, #tpu.memory_space<vmem>>, vector<128x128xf32>,
    %c0_73 = arith.constant 0 : index
    %c1536 = arith.constant 1536 : index
    %c0_74 = arith.constant 0 : index
    %63 = vector.load %arg2[%c0_73, %c1536, %c0_74] : memref<1x2048x128xf32, #tpu.memory_space<vmem>>, vector<1x128x128xf32>
    %64 = vector.shape_cast %63 : vector<1x128x128xf32> to vector<128x128xf32>
    %c1536_75 = arith.constant 1536 : index
    %c0_76 = arith.constant 0 : index
    %65 = vector.load %arg8[%c1536_75, %c0_76] : memref<2048x128xf32, #tpu.memory_space<vmem>>, vector<128x128xf32>
    %66 = arith.addf %65, %64 : vector<128x128xf32>
    %c1536_77 = arith.constant 1536 : index
    %c0_78 = arith.constant 0 : index
    %67 = vector.load %arg8[%c1536_77, %c0_78] : memref<2048x128xf32, #tpu.memory_space<vmem>>, vector<128x128xf32>
    tpu.vector_store %arg8[%c1536_77, %c0_78], %66 {strides = array<i32>} : memref<2048x128xf32, #tpu.memory_space<vmem>>, vector<128x128xf32>,
    %c0_79 = arith.constant 0 : index
    %c1664 = arith.constant 1664 : index
    %c0_80 = arith.constant 0 : index
    %68 = vector.load %arg2[%c0_79, %c1664, %c0_80] : memref<1x2048x128xf32, #tpu.memory_space<vmem>>, vector<1x128x128xf32>
    %69 = vector.shape_cast %68 : vector<1x128x128xf32> to vector<128x128xf32>
    %c1664_81 = arith.constant 1664 : index
    %c0_82 = arith.constant 0 : index
    %70 = vector.load %arg8[%c1664_81, %c0_82] : memref<2048x128xf32, #tpu.memory_space<vmem>>, vector<128x128xf32>
    %71 = arith.addf %70, %69 : vector<128x128xf32>
    %c1664_83 = arith.constant 1664 : index
    %c0_84 = arith.constant 0 : index
    %72 = vector.load %arg8[%c1664_83, %c0_84] : memref<2048x128xf32, #tpu.memory_space<vmem>>, vector<128x128xf32>
    tpu.vector_store %arg8[%c1664_83, %c0_84], %71 {strides = array<i32>} : memref<2048x128xf32, #tpu.memory_space<vmem>>, vector<128x128xf32>,
    %c0_85 = arith.constant 0 : index
    %c1792 = arith.constant 1792 : index
    %c0_86 = arith.constant 0 : index
    %73 = vector.load %arg2[%c0_85, %c1792, %c0_86] : memref<1x2048x128xf32, #tpu.memory_space<vmem>>, vector<1x128x128xf32>
    %74 = vector.shape_cast %73 : vector<1x128x128xf32> to vector<128x128xf32>
    %c1792_87 = arith.constant 1792 : index
    %c0_88 = arith.constant 0 : index
    %75 = vector.load %arg8[%c1792_87, %c0_88] : memref<2048x128xf32, #tpu.memory_space<vmem>>, vector<128x128xf32>
    %76 = arith.addf %75, %74 : vector<128x128xf32>
    %c1792_89 = arith.constant 1792 : index
    %c0_90 = arith.constant 0 : index
    %77 = vector.load %arg8[%c1792_89, %c0_90] : memref<2048x128xf32, #tpu.memory_space<vmem>>, vector<128x128xf32>
    tpu.vector_store %arg8[%c1792_89, %c0_90], %76 {strides = array<i32>} : memref<2048x128xf32, #tpu.memory_space<vmem>>, vector<128x128xf32>,
    %c0_91 = arith.constant 0 : index
    %c1920 = arith.constant 1920 : index
    %c0_92 = arith.constant 0 : index
    %78 = vector.load %arg2[%c0_91, %c1920, %c0_92] : memref<1x2048x128xf32, #tpu.memory_space<vmem>>, vector<1x128x128xf32>
    %79 = vector.shape_cast %78 : vector<1x128x128xf32> to vector<128x128xf32>
    %c1920_93 = arith.constant 1920 : index
    %c0_94 = arith.constant 0 : index
    %80 = vector.load %arg8[%c1920_93, %c0_94] : memref<2048x128xf32, #tpu.memory_space<vmem>>, vector<128x128xf32>
    %81 = arith.addf %80, %79 : vector<128x128xf32>
    %c1920_95 = arith.constant 1920 : index
    %c0_96 = arith.constant 0 : index
    %82 = vector.load %arg8[%c1920_95, %c0_96] : memref<2048x128xf32, #tpu.memory_space<vmem>>, vector<128x128xf32>
    tpu.vector_store %arg8[%c1920_95, %c0_96], %81 {strides = array<i32>} : memref<2048x128xf32, #tpu.memory_space<vmem>>, vector<128x128xf32>,
    %c0_i32_97 = arith.constant 0 : i32
    %83 = arith.cmpi eq, %arg1, %c0_i32_97 : i32
    %84 = arith.extui %83 : i1 to i32
    %c0_i32_98 = arith.constant 0 : i32
    %85 = arith.cmpi ne, %84, %c0_i32_98 : i32
    scf.if %85 {
      %c0_99 = arith.constant 0 : index
      %c0_100 = arith.constant 0 : index
      %86 = vector.load %arg8[%c0_99, %c0_100] : memref<2048x128xf32, #tpu.memory_space<vmem>>, vector<2048x128xf32>
      %cst = arith.constant dense<0.000000e+00> : vector<2048xf32>
      %87 = vector.multi_reduction <add>, %86, %cst [1] : vector<2048x128xf32> to vector<2048xf32>
      %88 = vector.shape_cast %87 : vector<2048xf32> to vector<2048x1xf32>
      %cst_101 = arith.constant 6.250000e-02 : f32
      %89 = vector.broadcast %cst_101 : f32 to vector<2048x1xf32>
      %90 = arith.mulf %88, %89 : vector<2048x1xf32>
      %c0_102 = arith.constant 0 : index
      %c0_103 = arith.constant 0 : index
      %91 = vector.load %arg3[%c0_102, %c0_103] : memref<2048x128xf32, #tpu.memory_space<vmem>>, vector<2048x128xf32>
      %92 = vector.broadcast %90 : vector<2048x1xf32> to vector<2048x128xf32>
      %93 = arith.mulf %92, %91 : vector<2048x128xf32>
      %cst_104 = arith.constant dense<0.000000e+00> : vector<128xf32>
      %94 = vector.multi_reduction <add>, %93, %cst_104 [0] : vector<2048x128xf32> to vector<128xf32>
      %95 = vector.shape_cast %94 : vector<128xf32> to vector<1x128xf32>
      %c0_105 = arith.constant 0 : index
      %c0_106 = arith.constant 0 : index
      %96 = vector.load %arg4[%c0_105, %c0_106] : memref<1x128xf32, #tpu.memory_space<vmem>>, vector<1x128xf32>
      %97 = arith.addf %95, %96 : vector<1x128xf32>
      %cst_107 = arith.constant 0.000000e+00 : f32
      %98 = vector.broadcast %cst_107 : f32 to vector<1x128xf32>
      %99 = arith.subf %98, %97 : vector<1x128xf32>
      %100 = math.exp %99 : vector<1x128xf32>
      %cst_108 = arith.constant 1.000000e+00 : f32
      %101 = vector.broadcast %cst_108 : f32 to vector<1x128xf32>
      %102 = arith.addf %101, %100 : vector<1x128xf32>
      %cst_109 = arith.constant 1.000000e+00 : f32
      %103 = vector.broadcast %cst_109 : f32 to vector<1x128xf32>
      %104 = arith.divf %103, %102 : vector<1x128xf32>
      %c0_110 = arith.constant 0 : index
      %c0_111 = arith.constant 0 : index
      %c0_112 = arith.constant 0 : index
      %105 = vector.load %arg6[%c0_110, %c0_111, %c0_112] : memref<1x1x128xf32, #tpu.memory_space<vmem>>, vector<1x1x128xf32>
      %106 = vector.shape_cast %105 : vector<1x1x128xf32> to vector<1x128xf32>
      %107 = vector.shape_cast %104 : vector<1x128xf32> to vector<1x1x128xf32>
      tpu.vector_store %arg6[%c0_110, %c0_111, %c0_112], %107 {strides = array<i32>} : memref<1x1x128xf32, #tpu.memory_space<vmem>>, vector<1x1x128xf32>,
      %c0_113 = arith.constant 0 : index
      %c0_114 = arith.constant 0 : index
      %c0_115 = arith.constant 0 : index
      %108 = vector.load %arg5[%c0_113, %c0_114, %c0_115] : memref<1x1x128xf32, #tpu.memory_space<vmem>>, vector<1x1x128xf32>
      %109 = vector.shape_cast %108 : vector<1x1x128xf32> to vector<1x128xf32>
      %cst_116 = arith.constant 0.000000e+00 : f32
      %110 = vector.broadcast %cst_116 : f32 to vector<1x128xf32>
      %111 = arith.maximumf %97, %110 : vector<1x128xf32>
      %112 = arith.mulf %97, %109 : vector<1x128xf32>
      %113 = arith.subf %111, %112 : vector<1x128xf32>
      %114 = math.absf %97 : vector<1x128xf32>
      %cst_117 = arith.constant 0.000000e+00 : f32
      %115 = vector.broadcast %cst_117 : f32 to vector<1x128xf32>
      %116 = arith.subf %115, %114 : vector<1x128xf32>
      %117 = math.exp %116 : vector<1x128xf32>
      %cst_118 = arith.constant 1.000000e+00 : f32
      %118 = vector.broadcast %cst_118 : f32 to vector<1x128xf32>
      %119 = arith.addf %118, %117 : vector<1x128xf32>
      %120 = math.log %119 : vector<1x128xf32>
      %121 = arith.addf %113, %120 : vector<1x128xf32>
      %122 = tpu.iota {dimensions = array<i32: 1>} : vector<1x128xi32>
      %c11_i32 = arith.constant 11 : i32
      %123 = vector.broadcast %c11_i32 : i32 to vector<1x128xi32>
      %124 = arith.cmpi slt, %122, %123 : vector<1x128xi32>
      %cst_119 = arith.constant 0.000000e+00 : f32
      %125 = vector.broadcast %cst_119 : f32 to vector<1x128xf32>
      %126 = arith.select %124, %121, %125 : vector<1x128xi1>, vector<1x128xf32>
      %c0_120 = arith.constant 0 : index
      %c0_121 = arith.constant 0 : index
      %c0_122 = arith.constant 0 : index
      %127 = vector.load %arg7[%c0_120, %c0_121, %c0_122] : memref<1x1x128xf32, #tpu.memory_space<vmem>>, vector<1x1x128xf32>
      %128 = vector.shape_cast %127 : vector<1x1x128xf32> to vector<1x128xf32>
      %129 = vector.shape_cast %126 : vector<1x128xf32> to vector<1x1x128xf32>
      tpu.vector_store %arg7[%c0_120, %c0_121, %c0_122], %129 {strides = array<i32>} : memref<1x1x128xf32, #tpu.memory_space<vmem>>, vector<1x1x128xf32>,
    } else {
    }
    return
  }
  func.func @transform_0(%arg0: i32, %arg1: i32) -> (i32, i32, i32) {
    %c0_i32 = arith.constant 0 : i32
    %c0_i32_0 = arith.constant 0 : i32
    return %arg0, %c0_i32, %arg1 : i32, i32, i32
  }
  func.func @transform_1(%arg0: i32, %arg1: i32) -> (i32, i32) {
    %c0_i32 = arith.constant 0 : i32
    %c0_i32_0 = arith.constant 0 : i32
    %c0_i32_1 = arith.constant 0 : i32
    return %c0_i32, %c0_i32_0 : i32, i32
  }
  func.func @transform_2(%arg0: i32, %arg1: i32) -> (i32, i32) {
    %c0_i32 = arith.constant 0 : i32
    %c0_i32_0 = arith.constant 0 : i32
    %c0_i32_1 = arith.constant 0 : i32
    return %c0_i32, %c0_i32_0 : i32, i32
  }
  func.func @transform_3(%arg0: i32, %arg1: i32) -> (i32, i32, i32) {
    %c0_i32 = arith.constant 0 : i32
    %c0_i32_0 = arith.constant 0 : i32
    %c0_i32_1 = arith.constant 0 : i32
    return %arg0, %c0_i32, %c0_i32_0 : i32, i32, i32
  }
  func.func @transform_4(%arg0: i32, %arg1: i32) -> (i32, i32, i32) {
    %c0_i32 = arith.constant 0 : i32
    %c0_i32_0 = arith.constant 0 : i32
    %c0_i32_1 = arith.constant 0 : i32
    return %arg0, %c0_i32, %c0_i32_0 : i32, i32, i32
  }
  func.func @transform_5(%arg0: i32, %arg1: i32) -> (i32, i32, i32) {
    %c0_i32 = arith.constant 0 : i32
    %c0_i32_0 = arith.constant 0 : i32
    %c0_i32_1 = arith.constant 0 : i32
    return %arg0, %c0_i32, %c0_i32_0 : i32, i32, i32
  }
}

</mosaic_0001>

<bundles_post_ra>
// kernel: tpu_custom_call.1
= control target key start
LH: loop header
LB: loop body
LE: loop exit
PB: predicated region body
PF: predicated region fallthrough
CT: control target
= control target key end

     0   :  { %s4606_s0 = inlined_call_operand.hbm [shape: f32[2,2048,128], index: 0, kind: input, shape index: {}]   ;;  %s4607_s1 = inlined_call_operand.hbm [shape: f32[2048,128], index: 1, kind: input, shape index: {}]   ;;  %s4608_s2 = inlined_call_operand.hbm [shape: f32[1,128], index: 2, kind: input, shape index: {}]   ;;  %s4609_s3 = inlined_call_operand.hbm [shape: f32[2,1,128], index: 3, kind: input, shape index: {}]   ;;  %s4610_s4 = inlined_call_operand.hbm [shape: f32[2,1,128], index: 4, kind: output, shape index: {0}]   ;;  %s4611_s5 = inlined_call_operand.hbm [shape: f32[2,1,128], index: 5, kind: output, shape index: {1}]  }
   0x1   :  { %4619 = sst [smem:[#allocation20_spill]] %s4606_s0 }
   0x2   :  { %4620 = sst [smem:[#allocation21_spill]] %s4607_s1 }
   0x3   :  { %11 = vsyncpa [#allocation4], 0 }
   0x4   :  { %13 = vsyncpa [#allocation4 + $0x1], 0 }
   0x5   :  { %14 = vsyncpa [#allocation7], 0 }
   0x6   :  { %15 = vsyncpa [#allocation10], 0 }
   0x7   :  { %17 = vsyncpa [#allocation10 + $0x1], 0 }
   0x8   :  { %18 = vsyncpa [#allocation5], 0 }
   0x9   :  { %20 = vsyncpa [#allocation5 + $0x1], 0 }
   0xa   :  { %21 = vsyncpa [#allocation13], 0 }
   0xb   :  { %23 = vsyncpa [#allocation13 + $0x1], 0  ;;  %s4011_s18 = smov 0   ;;  %s4013_s19 = smov 0  }
   0xc   :  { %s4015_s20 = smov 0   ;;  %s4017_s21 = smov 0  }
   0xd   :  { %s4019_s22 = smov 0   ;;  %s4021_s23 = smov 0  }
   0xe LB: > { %s3611_s24 = sadd.s32 4294967295, %s3971_s23   ;;  %s3612_s25 = sadd.s32 4294967294, %s3971_s23   ;;  %s3971_s23 = sphi %s4021_s23, %s29_s23   ;;  %s3967_s22 = sphi %s4019_s22, %s4647_s22   ;;  %s3963_s21 = sphi %s4017_s21, %s4646_s21   ;;  %s3959_s20 = sphi %s4015_s20, %s4645_s20   ;;  %s3955_s19 = sphi %s4013_s19, %s4644_s19   ;;  %s3951_s18 = sphi %s4011_s18, %s4643_s18  }
   0xf   : > { %p57_p0 = scmp.ne.s32.totalorder %s3959_s20, %s3955_s19  ;;  %p58_p1 = scmp.eq.s32.totalorder %s3971_s23, 0 }
  0x10   : > { %p63_p2 = scmp.ne.s32.totalorder %s3955_s19, %s3951_s18  ;;  %p4049_p3 = scmp.eq.s32.totalorder %s3611_s24, 0 }
  0x11   : > { %p155_p4 = scmp.eq.s32.totalorder %s3611_s24, 1  ;;  %p4053_p5 = por %p58_p1, %p57_p0 }
  0x12   : > { %s4621_s27 = scalar_select %p4049_p3, 1, 0 }
  0x13   : > { %p161_p6 = scmp.eq.s32.totalorder %s3612_s25, 1  ;;  %p4059_p7 = por %p4049_p3, %p63_p2 }
  0x14   : > { %p4063_p8 = por %p155_p4, %p57_p0  ;;  %p3613_p10 = scmp.ge.s32.totalorder %s3971_s23, 1 }
  0x15   : > { %s4623_s29 = scalar_select %p4059_p7, 1, 0 }
  0x16   : > { %s4624_s30 = scalar_select %p4063_p8, 1, 0 }
  0x17   : > { %p4067_p9 = por %p161_p6, %p63_p2  ;;  %p194_p11 = scmp.lt.s32.totalorder %s3971_s23, 3 }
  0x18   : > { %s3973_s8 = smov [#allocation6]   ;;  %s3974_s11 = smov [#allocation8]  }
  0x19   : > { %s4625_s6 = scalar_select %p4067_p9, 1, 0 }
  0x1a   : > { %p4073_p12 = pnand %p3613_p10, %p194_p11  ;;  %s206_s9 = sshll.u32 %s3973_s8, 4  ;;  %s4077_s9 = int_to_ptr.vmem [resolvable:$true] %s206_s9 }
  0x1b   : > { %4626 = sst [smem:[#allocation19_spill]] %s4625_s6  ;;  %s220_s12 = sshll.u32 %s3974_s11, 4  ;;  %s4088_s12 = int_to_ptr.vmem [resolvable:$true] %s220_s12 }
  0x1c   : > { %s4627_s7 = scalar_select %p4073_p12, 1, 0 }
  0x1d   : > { %p3646_p13 = pneg %p4073_p12  ;;  %s4629_s1 = sld [smem:[#allocation21_spill]] }
  0x1f   : > { %p4084_p1 = pnand %p3646_p13, %p4049_p3 }
  0x21   : > { %p3735_p4 = pneg %p4084_p1 }
  0x23   : > { %s3733_s16 = scalar_lea.hbm %s4629_s1, 32768 }
  0x24   : > { %p3734_p2 = scmp.ne.s32.totalorder %s4629_s1, %s3733_s16  ;;  %p3740_p11 = scmp.lt.u32.totalorder %s3733_s16, %s4629_s1 }
  0x26   : > { %p3736_p6 = pnand %p3735_p4, %p3734_p2 }
  0x28   : > { %p3737_p10 = pneg %p3736_p6 }
  0x2a   : > { %p3742_p13 = pnand %p3740_p11, %p3737_p10 }
  0x2c   : > { %3745 = shalt.err (!%p3742_p13)
}
  0x2d   : > { %s3746_s11 = scalar_lea.vmem %s4077_s9, 32768  ;;  %p3754_p3 = scmp.lt.s32.totalorder %s4077_s9, %s4077_s9 }
  0x2e   : > { %p3747_p0 = scmp.ne.s32.totalorder %s4077_s9, %s3746_s11  ;;  %p3755_p2 = scmp.lt.s32.totalorder %s3746_s11, %s3746_s11 }
  0x30   : > { %p3749_p9 = pnand %p3747_p0, %p3735_p4  ;;  %p3756_p6 = por %p3755_p2, %p3754_p3 }
  0x32   : > { %p3750_p8 = pneg %p3749_p9 }
  0x34   : > { %p3757_p7 = pnand %p3756_p6, %p3750_p8 }
  0x36   : > { %3760 = shalt.err (!%p3757_p7)
}
  0x37   : > { %s4617_s14 = smov 128   ;;  %s3976_s15 = smov 8  }
  0x38   : > { %3649 = dma.hbm_to_vmem [thread:$0]  (!%p4084_p1), %s4629_s1, 32768, %s4077_s9, [#allocation7], %s4617_s14, %s4617_s14, %s3976_s15  }
  0x39   : > { %s3761_s8 = scalar_lea.hbm %s4608_s2, 16 }
  0x3a   : > { %p3762_p3 = scmp.ne.s32.totalorder %s4608_s2, %s3761_s8  ;;  %p3768_p9 = scmp.lt.u32.totalorder %s3761_s8, %s4608_s2 }
  0x3c   : > { %p3764_p7 = pnand %p3762_p3, %p3735_p4 }
  0x3e   : > { %p3765_p8 = pneg %p3764_p7 }
  0x40   : > { %p3770_p0 = pnand %p3768_p9, %p3765_p8 }
  0x42   : > { %3773 = shalt.err (!%p3770_p0)
}
  0x43   : > { %s3774_s9 = scalar_lea.vmem %s4088_s12, 16  ;;  %s3781_s26 = scalar_lea.vmem %s4088_s12, 32 }
  0x44   : > { %p3775_p10 = scmp.ne.s32.totalorder %s4088_s12, %s3774_s9  ;;  %p3782_p2 = scmp.lt.s32.totalorder %s4088_s12, %s4088_s12 }
  0x45   : > { %p3783_p6 = scmp.lt.s32.totalorder %s3781_s26, %s3774_s9 }
  0x46   : > { %p3777_p11 = pnand %p3775_p10, %p3735_p4 }
  0x47   : > { %p3784_p3 = por %p3783_p6, %p3782_p2 }
  0x48   : > { %p3778_p13 = pneg %p3777_p11 }
  0x4a   : > { %p3785_p7 = pnand %p3784_p3, %p3778_p13 }
  0x4c   : > { %3788 = shalt.err (!%p3785_p7)
}
  0x4d   : > { %3652 = dma.hbm_to_vmem [thread:$0]  (!%p4084_p1), %s4608_s2, 16, %s4088_s12, [#allocation7]  }
  0x4e   : > { %s4630_s16 = sadd.s32 1, %s3967_s22  ;;  %p3669_p8 = scmp.lt.s32.totalorder %s3971_s23, 2 }
  0x4f   : > { %p43_p4 = scmp.ge.s32.totalorder %s4630_s16, 2  ;;  %s4151_s17 = sand.u32 1, %s3959_s20  }
  0x50   : > { %s3629_s10 = sshll.u32 %s3967_s22, 15  ;;  %s4631_s24 = smov %s4630_s16 }
  0x51   : > { %s4649_s24 = smov (%p43_p4, %s4631_s24), 0  ;;  %s3617_s25 = sshll.u32 %s4151_s17, 11 }
  0x52   : > { %s45_s8 = ssub.s32 %s3967_s22, %s4649_s24  ;;  %s4632_s0 = sld [smem:[#allocation20_spill]] }
  0x53   : > { %p48_p9 = scmp.eq.s32.totalorder %s45_s8, 0  ;;  %s235_s12 = scalar_lea.vmem [#allocation3], %s3617_s25 }
  0x54   : > { %s243_s6 = sshll.u32 %s235_s12, 4  ;;  %p4168_p1 = pnand %p3669_p8, %p4053_p5  ;;  %s4177_s6 = int_to_ptr.vmem [resolvable:$true] %s243_s6 }
  0x55   : > { %s4634_s16 = sadd.s32 1, %s3959_s20 }
  0x56   : > { %s4175_s8 = scalar_select %p48_p9, %s3959_s20, %s4634_s16  }
  0x57   : > { %p3791_p10 = pneg %p4168_p1 }
  0x58   : > { %s4164_s26 = scalar_lea.hbm %s4632_s0, %s3629_s10  ;;  %s232_s10 = scalar_lea.sflag [#allocation4], %s4151_s17 }
  0x59   : > { %s3789_s11 = scalar_lea.hbm %s4164_s26, 32768  ;;  %s3794_s9 = scalar_lea.hbm %s4632_s0, 65536 }
  0x5a   : > { %p3790_p0 = scmp.ne.s32.totalorder %s4164_s26, %s3789_s11  ;;  %p3795_p5 = scmp.lt.u32.totalorder %s4164_s26, %s4632_s0 }
  0x5b   : > { %p3796_p2 = scmp.lt.u32.totalorder %s3794_s9, %s3789_s11  ;;  %p3798_p3 = scmp.lt.u32.totalorder %s3789_s11, %s4164_s26 }
  0x5c   : > { %p3792_p11 = pnand %p3791_p10, %p3790_p0 }
  0x5d   : > { %p3797_p6 = por %p3796_p2, %p3795_p5 }
  0x5e   : > { %p3793_p13 = pneg %p3792_p11 }
  0x5f   : > { %p3799_p7 = por %p3798_p3, %p3797_p6 }
  0x61   : > { %p3800_p4 = pnand %p3799_p7, %p3793_p13 }
  0x63   : > { %3803 = shalt.err (!%p3800_p4)
}
  0x64   : > { %s3804_s16 = scalar_lea.vmem %s4177_s6, 32768  ;;  %s3977_s28 = smov [#allocation3]  }
  0x65   : > { %p3805_p8 = scmp.ne.s32.totalorder %s4177_s6, %s3804_s16  ;;  %s3809_s25 = sshll.u32 %s3977_s28, 4  ;;  %s3810_s25 = int_to_ptr.vmem [resolvable:$false] %s3809_s25 }
  0x66   : > { %s3811_s14 = scalar_lea.vmem %s3810_s25, 65536  ;;  %p3812_p11 = scmp.lt.s32.totalorder %s4177_s6, %s3810_s25 }
  0x67   : > { %p3807_p9 = pnand %p3805_p8, %p3791_p10  ;;  %p3813_p5 = scmp.lt.s32.totalorder %s3811_s14, %s3804_s16 }
  0x69   : > { %p3808_p0 = pneg %p3807_p9  ;;  %p3814_p2 = por %p3813_p5, %p3812_p11 }
  0x6b   : > { %p3815_p6 = pnand %p3814_p2, %p3808_p0 }
  0x6d   : > { %3818 = shalt.err (!%p3815_p6)
}
  0x6e   : > { %s4635_s11 = smov 128   ;;  %s3620_s9 = sshll.u32 %s3967_s22, 4 }
  0x6f   : > { %3656 = dma.hbm_to_vmem [thread:$0]  (!%p4168_p1), %s4164_s26, 32768, %s4177_s6, %s232_s10, %s4635_s11, %s4635_s11, %s3976_s15  }
  0x70   : > { %s256_s12 = scalar_lea.vmem [#allocation9], %s4151_s17  ;;  %s4215_s14 = scalar_lea.hbm %s4609_s3, %s3620_s9 }
  0x71   : > { %s263_s16 = sshll.u32 %s256_s12, 4  ;;  %s254_s0 = scalar_lea.sflag [#allocation10], %s4151_s17  ;;  %s264_s16 = int_to_ptr.vmem [resolvable:$true] %s263_s16 }
  0x72   : > { %s3819_s1 = scalar_lea.hbm %s4215_s14, 16  ;;  %s3824_s6 = scalar_lea.hbm %s4609_s3, 32 }
  0x73   : > { %p3820_p13 = scmp.ne.s32.totalorder %s4215_s14, %s3819_s1  ;;  %p3825_p4 = scmp.lt.u32.totalorder %s4215_s14, %s4609_s3 }
  0x74   : > { %p3826_p8 = scmp.lt.u32.totalorder %s3824_s6, %s3819_s1  ;;  %p3828_p0 = scmp.lt.u32.totalorder %s3819_s1, %s4215_s14 }
  0x75   : > { %p3822_p3 = pnand %p3820_p13, %p3791_p10 }
  0x76   : > { %p3827_p9 = por %p3826_p8, %p3825_p4 }
  0x77   : > { %p3823_p7 = pneg %p3822_p3 }
  0x78   : > { %p3829_p11 = por %p3828_p0, %p3827_p9 }
  0x7a   : > { %p3830_p5 = pnand %p3829_p11, %p3823_p7 }
  0x7c   : > { %3833 = shalt.err (!%p3830_p5)
}
  0x7d   : > { %s3834_s17 = scalar_lea.vmem %s264_s16, 16  ;;  %s3978_s9 = smov [#allocation9]  }
  0x7e   : > { %p3835_p2 = scmp.ne.s32.totalorder %s264_s16, %s3834_s17  ;;  %s3839_s12 = sshll.u32 %s3978_s9, 4  ;;  %s3840_s12 = int_to_ptr.vmem [resolvable:$false] %s3839_s12 }
  0x7f   : > { %s3841_s28 = scalar_lea.vmem %s3840_s12, 32  ;;  %p3842_p3 = scmp.lt.s32.totalorder %s264_s16, %s3840_s12 }
  0x80   : > { %p3837_p6 = pnand %p3835_p2, %p3791_p10  ;;  %p3843_p12 = scmp.lt.s32.totalorder %s3841_s28, %s3834_s17 }
  0x82   : > { %p3838_p13 = pneg %p3837_p6  ;;  %p3844_p4 = por %p3843_p12, %p3842_p3 }
  0x84   : > { %p3845_p8 = pnand %p3844_p4, %p3838_p13 }
  0x86   : > { %3848 = shalt.err (!%p3845_p8)
}
  0x87   : > { %3659 = dma.hbm_to_vmem [thread:$0]  (!%p4168_p1), %s4215_s14, 16, %s264_s16, %s254_s0  }
  0x88   : > { %p4636_p7 = scmp.ne.s32.totalorder %s4627_s7, 0 }
  0x89   : > { %s4240_s1 = sand.u32 (!%p4636_p7), 1, %s3955_s19   ;;  %p4637_p12 = scmp.ne.s32.totalorder (!%p4636_p7), %s4623_s29, 0 }
  0x8a   : > { %272 = sbr.rel (%p4636_p7) target bundleno = 893 (0x37d), region = 36  ;;  %s3622_s25 = sshll.u32 (!%p4636_p7), %s4240_s1, 11 }
  0x8b   : > { %s275_s15 = scalar_lea.sflag (!%p4636_p7), [#allocation4], %s4240_s1  ;;  %s4244_s26 = scalar_lea.vmem (!%p4636_p7), [#allocation3], %s3622_s25 }
  0x91   : > { %3930 = dma.done.wait (%p4637_p12), %s275_s15, 32768  }
  0x92   : > { %3932 = vsyncadd (%p4637_p12), %s275_s15, 4294934528  ;;  %p4638_p1 = scmp.ne.s32.totalorder %s4621_s27, 0 }
  0x94   : > { %3934 = dma.done.wait (%p4638_p1), [#allocation7], 32784  }
  0x95   : > { %3936 = vsyncadd (%p4638_p1), [#allocation7], 4294934512  ;;  %s292_s0 = scalar_lea.sflag [#allocation10], %s4240_s1  ;;  %s294_s7 = scalar_lea.vmem [#allocation9], %s4240_s1 }
  0x96   : > { %3938 = dma.done.wait (%p4637_p12), %s292_s0, 16  }
  0x97   : > { %3940 = vsyncadd (%p4637_p12), %s292_s0, 4294967280  ;;  %v588_v0 = vld [vmem:[%s4244_s26] sm:$0xff]  ;;  %v590_v1 = vld [vmem:[%s4244_s26 + $0x10] sm:$0xff]  ;;  %s3625_s27 = sshll.u32 %s3963_s21, 4  ;;  %s321_s29 = scalar_lea.vmem [#allocation11], %s4240_s1 }
  0x98   : > { %1871 = vadd.xlane.f32.xlu0 %v588_v0  ;;  %1875 = vadd.xlane.f32.xlu1 %v590_v1  ;;  %v589_v2 = vld [vmem:[%s4244_s26 + $0x8] sm:$0xff]  ;;  %v591_v3 = vld [vmem:[%s4244_s26 + $0x18] sm:$0xff]  ;;  %v592_v4 = vld [vmem:[%s4244_s26 + $0x20] sm:$0xff]  ;;  %s3455_s13 = sshll.u32 %s321_s29, 4  ;;  %s4525_s6 = scalar_lea.hbm %s4610_s4, %s3625_s27  ;;  %s4527_s13 = int_to_ptr.vmem [resolvable:$true] %s3455_s13 }
  0x99   : > { %v593_v5 = vld [vmem:[%s4244_s26 + $0x28] sm:$0xff]  ;;  %v594_v6 = vld [vmem:[%s4244_s26 + $0x30] sm:$0xff]  ;;  %v595_v7 = vld [vmem:[%s4244_s26 + $0x38] sm:$0xff]  ;;  %s3439_s10 = scalar_lea.sflag [#allocation5], %s4240_s1  ;;  %s3849_s11 = scalar_lea.vmem %s4527_s13, 16 }
  0x9a   : > { %v596_v8 = vld [vmem:[%s4244_s26 + $0x40] sm:$0xff]  ;;  %v597_v9 = vld [vmem:[%s4244_s26 + $0x48] sm:$0xff]  ;;  %v598_v10 = vld [vmem:[%s4244_s26 + $0x50] sm:$0xff]  ;;  %p3850_p10 = scmp.ne.s32.totalorder %s4527_s13, %s3849_s11  ;;  %p4639_p9 = scmp.ne.s32.totalorder %s4624_s30, 0 }
  0x9b   : > { %v599_v11 = vld [vmem:[%s4244_s26 + $0x58] sm:$0xff]  ;;  %v600_v12 = vld [vmem:[%s4244_s26 + $0x60] sm:$0xff]  ;;  %v601_v13 = vld [vmem:[%s4244_s26 + $0x68] sm:$0xff]  ;;  %s3979_s17 = smov [#allocation11]  }
  0x9c   : > { %1873 = vadd.xlane.f32.xlu0 %v589_v2  ;;  %1877 = vadd.xlane.f32.xlu1 %v591_v3  ;;  %v602_v14 = vld [vmem:[%s4244_s26 + $0x70] sm:$0xff]  ;;  %v603_v15 = vld [vmem:[%s4244_s26 + $0x78] sm:$0xff]  ;;  %v652_v16 = vld [vmem:[%s4244_s26 + $0x80] sm:$0xff]  ;;  %p3851_p0 = pnand %p3850_p10, %p4639_p9  ;;  %s3853_s9 = sshll.u32 %s3979_s17, 4  ;;  %s3854_s9 = int_to_ptr.vmem [resolvable:$false] %s3853_s9 }
  0x9d   : > { %v653_v17 = vld [vmem:[%s4244_s26 + $0x88] sm:$0xff]  ;;  %v654_v18 = vld [vmem:[%s4244_s26 + $0x90] sm:$0xff]  ;;  %v655_v19 = vld [vmem:[%s4244_s26 + $0x98] sm:$0xff]  ;;  %s3855_s12 = scalar_lea.vmem %s3854_s9, 32  ;;  %p3856_p5 = scmp.lt.s32.totalorder %s4527_s13, %s3854_s9 }
  0x9e   : > { %v656_v20 = vld [vmem:[%s4244_s26 + $0xa0] sm:$0xff]  ;;  %v657_v21 = vld [vmem:[%s4244_s26 + $0xa8] sm:$0xff]  ;;  %v658_v22 = vld [vmem:[%s4244_s26 + $0xb0] sm:$0xff]  ;;  %p3852_p11 = pneg %p3851_p0  ;;  %p3857_p2 = scmp.lt.s32.totalorder %s3855_s12, %s3849_s11 }
  0x9f   : > { %v659_v23 = vld [vmem:[%s4244_s26 + $0xb8] sm:$0xff]  ;;  %v660_v24 = vld [vmem:[%s4244_s26 + $0xc0] sm:$0xff]  ;;  %v661_v25 = vld [vmem:[%s4244_s26 + $0xc8] sm:$0xff] }
  0xa0   : > { %1879 = vadd.xlane.f32.xlu0 %v592_v4  ;;  %1881 = vadd.xlane.f32.xlu1 %v593_v5  ;;  %v662_v26 = vld [vmem:[%s4244_s26 + $0xd0] sm:$0xff]  ;;  %v663_v27 = vld [vmem:[%s4244_s26 + $0xd8] sm:$0xff]  ;;  %v664_v28 = vld [vmem:[%s4244_s26 + $0xe0] sm:$0xff]  ;;  %p3858_p6 = por %p3857_p2, %p3856_p5 }
  0xa1   : > { %v665_v29 = vld [vmem:[%s4244_s26 + $0xe8] sm:$0xff]  ;;  %v666_v30 = vld [vmem:[%s4244_s26 + $0xf0] sm:$0xff]  ;;  %v667_v31 = vld [vmem:[%s4244_s26 + $0xf8] sm:$0xff] }
  0xa2   : > { %v716_v32 = vld [vmem:[%s4244_s26 + $0x100] sm:$0xff]  ;;  %v717_v33 = vld [vmem:[%s4244_s26 + $0x108] sm:$0xff]  ;;  %v718_v34 = vld [vmem:[%s4244_s26 + $0x110] sm:$0xff]  ;;  %p3859_p13 = pnand %p3858_p6, %p3852_p11 }
  0xa3   : > { %v719_v35 = vld [vmem:[%s4244_s26 + $0x118] sm:$0xff]  ;;  %v720_v36 = vld [vmem:[%s4244_s26 + $0x120] sm:$0xff]  ;;  %v721_v37 = vld [vmem:[%s4244_s26 + $0x128] sm:$0xff] }
  0xa4   : > { %1883 = vadd.xlane.f32.xlu0 %v594_v6  ;;  %1885 = vadd.xlane.f32.xlu1 %v595_v7  ;;  %v722_v38 = vld [vmem:[%s4244_s26 + $0x130] sm:$0xff]  ;;  %v723_v39 = vld [vmem:[%s4244_s26 + $0x138] sm:$0xff]  ;;  %v724_v40 = vld [vmem:[%s4244_s26 + $0x140] sm:$0xff] }
  0xa5   : > { %v725_v41 = vld [vmem:[%s4244_s26 + $0x148] sm:$0xff]  ;;  %v726_v42 = vld [vmem:[%s4244_s26 + $0x150] sm:$0xff]  ;;  %v727_v43 = vld [vmem:[%s4244_s26 + $0x158] sm:$0xff] }
  0xa6   : > { %v728_v44 = vld [vmem:[%s4244_s26 + $0x160] sm:$0xff]  ;;  %v729_v45 = vld [vmem:[%s4244_s26 + $0x168] sm:$0xff]  ;;  %v730_v46 = vld [vmem:[%s4244_s26 + $0x170] sm:$0xff] }
  0xa7   : > { %v731_v47 = vld [vmem:[%s4244_s26 + $0x178] sm:$0xff]  ;;  %v780_v48 = vld [vmem:[%s4244_s26 + $0x180] sm:$0xff]  ;;  %v781_v49 = vld [vmem:[%s4244_s26 + $0x188] sm:$0xff] }
  0xa8   : > { %1887 = vadd.xlane.f32.xlu0 %v596_v8  ;;  %1889 = vadd.xlane.f32.xlu1 %v597_v9  ;;  %v782_v50 = vld [vmem:[%s4244_s26 + $0x190] sm:$0xff]  ;;  %v783_v51 = vld [vmem:[%s4244_s26 + $0x198] sm:$0xff]  ;;  %v784_v52 = vld [vmem:[%s4244_s26 + $0x1a0] sm:$0xff] }
  0xa9   : > { %v785_v53 = vld [vmem:[%s4244_s26 + $0x1a8] sm:$0xff]  ;;  %v786_v54 = vld [vmem:[%s4244_s26 + $0x1b0] sm:$0xff]  ;;  %v787_v55 = vld [vmem:[%s4244_s26 + $0x1b8] sm:$0xff] }
  0xaa   : > { %v788_v56 = vld [vmem:[%s4244_s26 + $0x1c0] sm:$0xff]  ;;  %v789_v57 = vld [vmem:[%s4244_s26 + $0x1c8] sm:$0xff]  ;;  %v790_v58 = vld [vmem:[%s4244_s26 + $0x1d0] sm:$0xff] }
  0xab   : > { %v791_v59 = vld [vmem:[%s4244_s26 + $0x1d8] sm:$0xff]  ;;  %v792_v60 = vld [vmem:[%s4244_s26 + $0x1e0] sm:$0xff]  ;;  %v793_v61 = vld [vmem:[%s4244_s26 + $0x1e8] sm:$0xff] }
  0xac   : > { %1891 = vadd.xlane.f32.xlu0 %v598_v10  ;;  %1893 = vadd.xlane.f32.xlu1 %v599_v11  ;;  %v794_v62 = vld [vmem:[%s4244_s26 + $0x1f0] sm:$0xff]  ;;  %v795_v63 = vld [vmem:[%s4244_s26 + $0x1f8] sm:$0xff]  ;;  %v844_v0 = vld [vmem:[%s4244_s26 + $0x200] sm:$0xff] }
  0xad   : > { %v845_v1 = vld [vmem:[%s4244_s26 + $0x208] sm:$0xff]  ;;  %v846_v2 = vld [vmem:[%s4244_s26 + $0x210] sm:$0xff]  ;;  %v847_v3 = vld [vmem:[%s4244_s26 + $0x218] sm:$0xff] }
  0xae   : > { %v848_v4 = vld [vmem:[%s4244_s26 + $0x220] sm:$0xff]  ;;  %v849_v5 = vld [vmem:[%s4244_s26 + $0x228] sm:$0xff]  ;;  %v850_v6 = vld [vmem:[%s4244_s26 + $0x230] sm:$0xff] }
  0xaf   : > { %v851_v7 = vld [vmem:[%s4244_s26 + $0x238] sm:$0xff]  ;;  %v852_v10 = vld [vmem:[%s4244_s26 + $0x240] sm:$0xff]  ;;  %v853_v11 = vld [vmem:[%s4244_s26 + $0x248] sm:$0xff] }
  0xb0   : > { %1895 = vadd.xlane.f32.xlu0 %v600_v12  ;;  %1897 = vadd.xlane.f32.xlu1 %v601_v13  ;;  %v2639_v12 = vld [vmem:[#allocation6] sm:$0xff] }
  0xb4   : > { %1899 = vadd.xlane.f32.xlu0 %v602_v14  ;;  %1901 = vadd.xlane.f32.xlu1 %v603_v15  ;;  %v2640_v15 = vld [vmem:[#allocation6 + $0x8] sm:$0xff] }
  0xb8   : > { %1903 = vadd.xlane.f32.xlu0 %v652_v16  ;;  %1905 = vadd.xlane.f32.xlu1 %v653_v17 }
  0xbc   : > { %1907 = vadd.xlane.f32.xlu0 %v654_v18  ;;  %1909 = vadd.xlane.f32.xlu1 %v655_v19  ;;  %v854_v18 = vld [vmem:[%s4244_s26 + $0x250] sm:$0xff]  ;;  %v855_v19 = vld [vmem:[%s4244_s26 + $0x258] sm:$0xff] }
  0xc0   : > { %1911 = vadd.xlane.f32.xlu0 %v656_v20  ;;  %1913 = vadd.xlane.f32.xlu1 %v657_v21  ;;  %v2641_v20 = vld [vmem:[#allocation6 + $0x10] sm:$0xff] }
  0xc4   : > { %1915 = vadd.xlane.f32.xlu0 %v658_v22  ;;  %1917 = vadd.xlane.f32.xlu1 %v659_v23  ;;  %v2642_v23 = vld [vmem:[#allocation6 + $0x18] sm:$0xff] }
  0xc8   : > { %1919 = vadd.xlane.f32.xlu0 %v660_v24  ;;  %1921 = vadd.xlane.f32.xlu1 %v661_v25 }
  0xcc   : > { %1923 = vadd.xlane.f32.xlu0 %v662_v26  ;;  %1925 = vadd.xlane.f32.xlu1 %v663_v27  ;;  %v2643_v27 = vld [vmem:[#allocation6 + $0x20] sm:$0xff] }
  0xd0   : > { %1927 = vadd.xlane.f32.xlu0 %v664_v28  ;;  %1929 = vadd.xlane.f32.xlu1 %v665_v29 }
  0xd4   : > { %1931 = vadd.xlane.f32.xlu0 %v666_v30  ;;  %1933 = vadd.xlane.f32.xlu1 %v667_v31  ;;  %v856_v30 = vld [vmem:[%s4244_s26 + $0x260] sm:$0xff]  ;;  %v857_v31 = vld [vmem:[%s4244_s26 + $0x268] sm:$0xff] }
  0xd8   : > { %1935 = vadd.xlane.f32.xlu0 %v716_v32  ;;  %1937 = vadd.xlane.f32.xlu1 %v717_v33 }
  0xdc   : > { %1939 = vadd.xlane.f32.xlu0 %v718_v34  ;;  %1941 = vadd.xlane.f32.xlu1 %v719_v35 }
  0xe0   : > { %1943 = vadd.xlane.f32.xlu0 %v720_v36  ;;  %1945 = vadd.xlane.f32.xlu1 %v721_v37  ;;  %v2644_v36 = vld [vmem:[#allocation6 + $0x28] sm:$0xff] }
  0xe4   : > { %1947 = vadd.xlane.f32.xlu0 %v722_v38  ;;  %1949 = vadd.xlane.f32.xlu1 %v723_v39  ;;  %v2645_v39 = vld [vmem:[#allocation6 + $0x30] sm:$0xff] }
  0xe8   : > { %1951 = vadd.xlane.f32.xlu0 %v724_v40  ;;  %1953 = vadd.xlane.f32.xlu1 %v725_v41 }
  0xec   : > { %1955 = vadd.xlane.f32.xlu0 %v726_v42  ;;  %1957 = vadd.xlane.f32.xlu1 %v727_v43  ;;  %v858_v42 = vld [vmem:[%s4244_s26 + $0x270] sm:$0xff]  ;;  %v859_v43 = vld [vmem:[%s4244_s26 + $0x278] sm:$0xff] }
  0xf0   : > { %1959 = vadd.xlane.f32.xlu0 %v728_v44  ;;  %1961 = vadd.xlane.f32.xlu1 %v729_v45 }
  0xf4   : > { %1963 = vadd.xlane.f32.xlu0 %v730_v46  ;;  %1965 = vadd.xlane.f32.xlu1 %v731_v47 }
  0xf8   : > { %1967 = vadd.xlane.f32.xlu0 %v780_v48  ;;  %1969 = vadd.xlane.f32.xlu1 %v781_v49  ;;  %v2646_v48 = vld [vmem:[#allocation6 + $0x38] sm:$0xff] }
  0xfc   : > { %1971 = vadd.xlane.f32.xlu0 %v782_v50  ;;  %1973 = vadd.xlane.f32.xlu1 %v783_v51  ;;  %v2647_v51 = vld [vmem:[#allocation6 + $0x40] sm:$0xff] }
 0x100   : > { %1975 = vadd.xlane.f32.xlu0 %v784_v52  ;;  %1977 = vadd.xlane.f32.xlu1 %v785_v53 }
 0x104   : > { %1979 = vadd.xlane.f32.xlu0 %v786_v54  ;;  %1981 = vadd.xlane.f32.xlu1 %v787_v55  ;;  %v908_v54 = vld [vmem:[%s4244_s26 + $0x280] sm:$0xff]  ;;  %v909_v55 = vld [vmem:[%s4244_s26 + $0x288] sm:$0xff] }
 0x108   : > { %1983 = vadd.xlane.f32.xlu0 %v788_v56  ;;  %1985 = vadd.xlane.f32.xlu1 %v789_v57 }
 0x10c   : > { %1987 = vadd.xlane.f32.xlu0 %v790_v58  ;;  %1989 = vadd.xlane.f32.xlu1 %v791_v59 }
 0x110   : > { %1991 = vadd.xlane.f32.xlu0 %v792_v60  ;;  %1993 = vadd.xlane.f32.xlu1 %v793_v61  ;;  %v2648_v60 = vld [vmem:[#allocation6 + $0x48] sm:$0xff] }
 0x114   : > { %1995 = vadd.xlane.f32.xlu0 %v794_v62  ;;  %1997 = vadd.xlane.f32.xlu1 %v795_v63  ;;  %v2649_v63 = vld [vmem:[#allocation6 + $0x50] sm:$0xff] }
 0x118   : > { %1999 = vadd.xlane.f32.xlu0 %v844_v0  ;;  %2001 = vadd.xlane.f32.xlu1 %v845_v1 }
 0x11c   : > { %2003 = vadd.xlane.f32.xlu0 %v846_v2  ;;  %2005 = vadd.xlane.f32.xlu1 %v847_v3  ;;  %v910_v2 = vld [vmem:[%s4244_s26 + $0x290] sm:$0xff]  ;;  %v911_v3 = vld [vmem:[%s4244_s26 + $0x298] sm:$0xff] }
 0x120   : > { %2007 = vadd.xlane.f32.xlu0 %v848_v4  ;;  %2009 = vadd.xlane.f32.xlu1 %v849_v5 }
 0x124   : > { %2011 = vadd.xlane.f32.xlu0 %v850_v6  ;;  %2013 = vadd.xlane.f32.xlu1 %v851_v7 }
 0x125   : > { %v1872_v8 = vpop.xlane.xlu0 %1871  ;;  %v1876_v9 = vpop.xlane.xlu1 %1875 }
 0x126   : > { %v2383_v13 = vmul.f32 0.0625, %v1872_v8  ;;  %v2385_v14 = vmul.f32 0.0625, %v1876_v9  ;;  %v2650_v8 = vld [vmem:[#allocation6 + $0x58] sm:$0xff] }
 0x128   : > { %2015 = vadd.xlane.f32.xlu0 %v852_v10  ;;  %2017 = vadd.xlane.f32.xlu1 %v853_v11  ;;  %v2895_v24 = vmul.f32 %v2639_v12, %v2383_v13  ;;  %v2897_v26 = vmul.f32 %v2641_v20, %v2385_v14  ;;  %v2651_v11 = vld [vmem:[#allocation6 + $0x60] sm:$0xff]  ;;  %v2652_v20 = vld [vmem:[#allocation6 + $0x68] sm:$0xff] }
 0x129   : > { %v1874_v16 = vpop.xlane.xlu0 %1873  ;;  %v1878_v17 = vpop.xlane.xlu1 %1877  ;;  %v912_v14 = vld [vmem:[%s4244_s26 + $0x2a0] sm:$0xff] }
 0x12a   : > { %v2384_v21 = vmul.f32 0.0625, %v1874_v16  ;;  %v2386_v22 = vmul.f32 0.0625, %v1878_v17 }
 0x12c   : > { %v2896_v25 = vmul.f32 %v2640_v15, %v2384_v21  ;;  %2019 = vadd.xlane.f32.xlu0 %v854_v18  ;;  %2021 = vadd.xlane.f32.xlu1 %v855_v19  ;;  %v2898_v33 = vmul.f32 %v2642_v23, %v2386_v22  ;;  %v913_v15 = vld [vmem:[%s4244_s26 + $0x2a8] sm:$0xff]  ;;  %v2653_v23 = vld [vmem:[#allocation6 + $0x70] sm:$0xff] }
 0x12d   : > { %v1880_v28 = vpop.xlane.xlu0 %1879  ;;  %v1882_v29 = vpop.xlane.xlu1 %1881 }
 0x12e   : > { %v3151_v32 = vadd.f32 %v2896_v25, %v2895_v24  ;;  %v2387_v34 = vmul.f32 0.0625, %v1880_v28  ;;  %v2388_v35 = vmul.f32 0.0625, %v1882_v29 }
 0x130   : > { %v3152_v37 = vadd.f32 %v3151_v32, %v2897_v26  ;;  %v2899_v38 = vmul.f32 %v2643_v27, %v2387_v34  ;;  %2023 = vadd.xlane.f32.xlu0 %v856_v30  ;;  %2025 = vadd.xlane.f32.xlu1 %v857_v31  ;;  %v2900_v45 = vmul.f32 %v2644_v36, %v2388_v35  ;;  %v914_v26 = vld [vmem:[%s4244_s26 + $0x2b0] sm:$0xff]  ;;  %v915_v27 = vld [vmem:[%s4244_s26 + $0x2b8] sm:$0xff]  ;;  %v2655_v35 = vld [vmem:[#allocation6 + $0x80] sm:$0xff] }
 0x131   : > { %v1884_v40 = vpop.xlane.xlu0 %1883  ;;  %v1886_v41 = vpop.xlane.xlu1 %1885  ;;  %v2654_v32 = vld [vmem:[#allocation6 + $0x78] sm:$0xff] }
 0x132   : > { %v3153_v44 = vadd.f32 %v3152_v37, %v2898_v33  ;;  %v2389_v46 = vmul.f32 0.0625, %v1884_v40  ;;  %v2390_v47 = vmul.f32 0.0625, %v1886_v41 }
 0x134   : > { %v3154_v49 = vadd.f32 %v3153_v44, %v2899_v38  ;;  %v2901_v50 = vmul.f32 %v2645_v39, %v2389_v46  ;;  %2027 = vadd.xlane.f32.xlu0 %v858_v42  ;;  %2029 = vadd.xlane.f32.xlu1 %v859_v43  ;;  %v2902_v57 = vmul.f32 %v2646_v48, %v2390_v47  ;;  %v916_v38 = vld [vmem:[%s4244_s26 + $0x2c0] sm:$0xff]  ;;  %v917_v39 = vld [vmem:[%s4244_s26 + $0x2c8] sm:$0xff]  ;;  %v2657_v47 = vld [vmem:[#allocation6 + $0x90] sm:$0xff] }
 0x135   : > { %v1888_v52 = vpop.xlane.xlu0 %1887  ;;  %v1890_v53 = vpop.xlane.xlu1 %1889  ;;  %v2656_v44 = vld [vmem:[#allocation6 + $0x88] sm:$0xff] }
 0x136   : > { %v3155_v56 = vadd.f32 %v3154_v49, %v2900_v45  ;;  %v2391_v58 = vmul.f32 0.0625, %v1888_v52  ;;  %v2392_v59 = vmul.f32 0.0625, %v1890_v53 }
 0x138   : > { %v3156_v61 = vadd.f32 %v3155_v56, %v2901_v50  ;;  %v2903_v62 = vmul.f32 %v2647_v51, %v2391_v58  ;;  %2031 = vadd.xlane.f32.xlu0 %v908_v54  ;;  %2033 = vadd.xlane.f32.xlu1 %v909_v55  ;;  %v2904_v5 = vmul.f32 %v2648_v60, %v2392_v59  ;;  %v918_v50 = vld [vmem:[%s4244_s26 + $0x2d0] sm:$0xff]  ;;  %v919_v51 = vld [vmem:[%s4244_s26 + $0x2d8] sm:$0xff]  ;;  %v2659_v59 = vld [vmem:[#allocation6 + $0xa0] sm:$0xff] }
 0x139   : > { %v1892_v0 = vpop.xlane.xlu0 %1891  ;;  %v1894_v1 = vpop.xlane.xlu1 %1893  ;;  %v2658_v56 = vld [vmem:[#allocation6 + $0x98] sm:$0xff] }
 0x13a   : > { %v3157_v4 = vadd.f32 %v3156_v61, %v2902_v57  ;;  %v2393_v6 = vmul.f32 0.0625, %v1892_v0  ;;  %v2394_v7 = vmul.f32 0.0625, %v1894_v1 }
 0x13c   : > { %v3158_v9 = vadd.f32 %v3157_v4, %v2903_v62  ;;  %v2905_v10 = vmul.f32 %v2649_v63, %v2393_v6  ;;  %2035 = vadd.xlane.f32.xlu0 %v910_v2  ;;  %2037 = vadd.xlane.f32.xlu1 %v911_v3  ;;  %v2906_v17 = vmul.f32 %v2650_v8, %v2394_v7  ;;  %v920_v62 = vld [vmem:[%s4244_s26 + $0x2e0] sm:$0xff]  ;;  %v921_v63 = vld [vmem:[%s4244_s26 + $0x2e8] sm:$0xff]  ;;  %v2661_v7 = vld [vmem:[#allocation6 + $0xb0] sm:$0xff] }
 0x13d   : > { %v1896_v12 = vpop.xlane.xlu0 %1895  ;;  %v1898_v13 = vpop.xlane.xlu1 %1897  ;;  %v2660_v4 = vld [vmem:[#allocation6 + $0xa8] sm:$0xff] }
 0x13e   : > { %v3159_v16 = vadd.f32 %v3158_v9, %v2904_v5  ;;  %v2395_v18 = vmul.f32 0.0625, %v1896_v12  ;;  %v2396_v19 = vmul.f32 0.0625, %v1898_v13 }
 0x140   : > { %v3160_v21 = vadd.f32 %v3159_v16, %v2905_v10  ;;  %v2907_v22 = vmul.f32 %v2651_v11, %v2395_v18  ;;  %2039 = vadd.xlane.f32.xlu0 %v912_v14  ;;  %2041 = vadd.xlane.f32.xlu1 %v913_v15  ;;  %v2908_v29 = vmul.f32 %v2652_v20, %v2396_v19  ;;  %v922_v10 = vld [vmem:[%s4244_s26 + $0x2f0] sm:$0xff]  ;;  %v923_v11 = vld [vmem:[%s4244_s26 + $0x2f8] sm:$0xff]  ;;  %v2663_v19 = vld [vmem:[#allocation6 + $0xc0] sm:$0xff] }
 0x141   : > { %v1900_v24 = vpop.xlane.xlu0 %1899  ;;  %v1902_v25 = vpop.xlane.xlu1 %1901  ;;  %v2662_v16 = vld [vmem:[#allocation6 + $0xb8] sm:$0xff] }
 0x142   : > { %v3161_v28 = vadd.f32 %v3160_v21, %v2906_v17  ;;  %v2397_v30 = vmul.f32 0.0625, %v1900_v24  ;;  %v2398_v31 = vmul.f32 0.0625, %v1902_v25 }
 0x144   : > { %v3162_v33 = vadd.f32 %v3161_v28, %v2907_v22  ;;  %v2909_v34 = vmul.f32 %v2653_v23, %v2397_v30  ;;  %2043 = vadd.xlane.f32.xlu0 %v914_v26  ;;  %2045 = vadd.xlane.f32.xlu1 %v915_v27  ;;  %v2910_v41 = vmul.f32 %v2654_v32, %v2398_v31  ;;  %v972_v22 = vld [vmem:[%s4244_s26 + $0x300] sm:$0xff]  ;;  %v973_v23 = vld [vmem:[%s4244_s26 + $0x308] sm:$0xff]  ;;  %v2665_v31 = vld [vmem:[#allocation6 + $0xd0] sm:$0xff] }
 0x145   : > { %v1904_v36 = vpop.xlane.xlu0 %1903  ;;  %v1906_v37 = vpop.xlane.xlu1 %1905  ;;  %v2664_v28 = vld [vmem:[#allocation6 + $0xc8] sm:$0xff] }
 0x146   : > { %v3163_v40 = vadd.f32 %v3162_v33, %v2908_v29  ;;  %v2399_v42 = vmul.f32 0.0625, %v1904_v36  ;;  %v2400_v43 = vmul.f32 0.0625, %v1906_v37 }
 0x148   : > { %v3164_v45 = vadd.f32 %v3163_v40, %v2909_v34  ;;  %v2911_v46 = vmul.f32 %v2655_v35, %v2399_v42  ;;  %2047 = vadd.xlane.f32.xlu0 %v916_v38  ;;  %2049 = vadd.xlane.f32.xlu1 %v917_v39  ;;  %v2912_v53 = vmul.f32 %v2656_v44, %v2400_v43  ;;  %v974_v34 = vld [vmem:[%s4244_s26 + $0x310] sm:$0xff]  ;;  %v975_v35 = vld [vmem:[%s4244_s26 + $0x318] sm:$0xff]  ;;  %v2667_v43 = vld [vmem:[#allocation6 + $0xe0] sm:$0xff] }
 0x149   : > { %v1908_v48 = vpop.xlane.xlu0 %1907  ;;  %v1910_v49 = vpop.xlane.xlu1 %1909  ;;  %v2666_v40 = vld [vmem:[#allocation6 + $0xd8] sm:$0xff] }
 0x14a   : > { %v3165_v52 = vadd.f32 %v3164_v45, %v2910_v41  ;;  %v2401_v54 = vmul.f32 0.0625, %v1908_v48  ;;  %v2402_v55 = vmul.f32 0.0625, %v1910_v49 }
 0x14c   : > { %v3166_v57 = vadd.f32 %v3165_v52, %v2911_v46  ;;  %v2913_v58 = vmul.f32 %v2657_v47, %v2401_v54  ;;  %2051 = vadd.xlane.f32.xlu0 %v918_v50  ;;  %2053 = vadd.xlane.f32.xlu1 %v919_v51  ;;  %v2914_v1 = vmul.f32 %v2658_v56, %v2402_v55  ;;  %v976_v46 = vld [vmem:[%s4244_s26 + $0x320] sm:$0xff]  ;;  %v977_v47 = vld [vmem:[%s4244_s26 + $0x328] sm:$0xff]  ;;  %v2669_v55 = vld [vmem:[#allocation6 + $0xf0] sm:$0xff] }
 0x14d   : > { %v1912_v60 = vpop.xlane.xlu0 %1911  ;;  %v1914_v61 = vpop.xlane.xlu1 %1913  ;;  %v2668_v52 = vld [vmem:[#allocation6 + $0xe8] sm:$0xff] }
 0x14e   : > { %v3167_v0 = vadd.f32 %v3166_v57, %v2912_v53  ;;  %v2403_v2 = vmul.f32 0.0625, %v1912_v60  ;;  %v2404_v3 = vmul.f32 0.0625, %v1914_v61 }
 0x150   : > { %v3168_v5 = vadd.f32 %v3167_v0, %v2913_v58  ;;  %v2915_v6 = vmul.f32 %v2659_v59, %v2403_v2  ;;  %2055 = vadd.xlane.f32.xlu0 %v920_v62  ;;  %2057 = vadd.xlane.f32.xlu1 %v921_v63  ;;  %v2916_v13 = vmul.f32 %v2660_v4, %v2404_v3  ;;  %v978_v58 = vld [vmem:[%s4244_s26 + $0x330] sm:$0xff]  ;;  %v979_v59 = vld [vmem:[%s4244_s26 + $0x338] sm:$0xff]  ;;  %v2671_v3 = vld [vmem:[#allocation6 + $0x100] sm:$0xff] }
 0x151   : > { %v1916_v8 = vpop.xlane.xlu0 %1915  ;;  %v1918_v9 = vpop.xlane.xlu1 %1917  ;;  %v2670_v0 = vld [vmem:[#allocation6 + $0xf8] sm:$0xff] }
 0x152   : > { %v3169_v12 = vadd.f32 %v3168_v5, %v2914_v1  ;;  %v2405_v14 = vmul.f32 0.0625, %v1916_v8  ;;  %v2406_v15 = vmul.f32 0.0625, %v1918_v9 }
 0x154   : > { %v3170_v17 = vadd.f32 %v3169_v12, %v2915_v6  ;;  %v2917_v18 = vmul.f32 %v2661_v7, %v2405_v14  ;;  %2059 = vadd.xlane.f32.xlu0 %v922_v10  ;;  %2061 = vadd.xlane.f32.xlu1 %v923_v11  ;;  %v2918_v25 = vmul.f32 %v2662_v16, %v2406_v15  ;;  %v980_v6 = vld [vmem:[%s4244_s26 + $0x340] sm:$0xff]  ;;  %v981_v7 = vld [vmem:[%s4244_s26 + $0x348] sm:$0xff]  ;;  %v2673_v15 = vld [vmem:[#allocation6 + $0x110] sm:$0xff] }
 0x155   : > { %v1920_v20 = vpop.xlane.xlu0 %1919  ;;  %v1922_v21 = vpop.xlane.xlu1 %1921  ;;  %v2672_v12 = vld [vmem:[#allocation6 + $0x108] sm:$0xff] }
 0x156   : > { %v3171_v24 = vadd.f32 %v3170_v17, %v2916_v13  ;;  %v2407_v26 = vmul.f32 0.0625, %v1920_v20  ;;  %v2408_v27 = vmul.f32 0.0625, %v1922_v21 }
 0x158   : > { %v3172_v29 = vadd.f32 %v3171_v24, %v2917_v18  ;;  %v2919_v30 = vmul.f32 %v2663_v19, %v2407_v26  ;;  %2063 = vadd.xlane.f32.xlu0 %v972_v22  ;;  %2065 = vadd.xlane.f32.xlu1 %v973_v23  ;;  %v2920_v37 = vmul.f32 %v2664_v28, %v2408_v27  ;;  %v982_v18 = vld [vmem:[%s4244_s26 + $0x350] sm:$0xff]  ;;  %v983_v19 = vld [vmem:[%s4244_s26 + $0x358] sm:$0xff]  ;;  %v2675_v27 = vld [vmem:[#allocation6 + $0x120] sm:$0xff] }
 0x159   : > { %v1924_v32 = vpop.xlane.xlu0 %1923  ;;  %v1926_v33 = vpop.xlane.xlu1 %1925  ;;  %v2674_v24 = vld [vmem:[#allocation6 + $0x118] sm:$0xff] }
 0x15a   : > { %v3173_v36 = vadd.f32 %v3172_v29, %v2918_v25  ;;  %v2409_v38 = vmul.f32 0.0625, %v1924_v32  ;;  %v2410_v39 = vmul.f32 0.0625, %v1926_v33 }
 0x15c   : > { %v3174_v41 = vadd.f32 %v3173_v36, %v2919_v30  ;;  %v2921_v42 = vmul.f32 %v2665_v31, %v2409_v38  ;;  %2067 = vadd.xlane.f32.xlu0 %v974_v34  ;;  %2069 = vadd.xlane.f32.xlu1 %v975_v35  ;;  %v2922_v49 = vmul.f32 %v2666_v40, %v2410_v39  ;;  %v984_v30 = vld [vmem:[%s4244_s26 + $0x360] sm:$0xff]  ;;  %v985_v31 = vld [vmem:[%s4244_s26 + $0x368] sm:$0xff]  ;;  %v2677_v39 = vld [vmem:[#allocation6 + $0x130] sm:$0xff] }
 0x15d   : > { %v1928_v44 = vpop.xlane.xlu0 %1927  ;;  %v1930_v45 = vpop.xlane.xlu1 %1929  ;;  %v2676_v36 = vld [vmem:[#allocation6 + $0x128] sm:$0xff] }
 0x15e   : > { %v3175_v48 = vadd.f32 %v3174_v41, %v2920_v37  ;;  %v2411_v50 = vmul.f32 0.0625, %v1928_v44  ;;  %v2412_v51 = vmul.f32 0.0625, %v1930_v45 }
 0x160   : > { %v3176_v53 = vadd.f32 %v3175_v48, %v2921_v42  ;;  %v2923_v54 = vmul.f32 %v2667_v43, %v2411_v50  ;;  %2071 = vadd.xlane.f32.xlu0 %v976_v46  ;;  %2073 = vadd.xlane.f32.xlu1 %v977_v47  ;;  %v2924_v61 = vmul.f32 %v2668_v52, %v2412_v51  ;;  %v986_v42 = vld [vmem:[%s4244_s26 + $0x370] sm:$0xff]  ;;  %v987_v43 = vld [vmem:[%s4244_s26 + $0x378] sm:$0xff]  ;;  %v2679_v51 = vld [vmem:[#allocation6 + $0x140] sm:$0xff] }
 0x161   : > { %v1932_v56 = vpop.xlane.xlu0 %1931  ;;  %v1934_v57 = vpop.xlane.xlu1 %1933  ;;  %v2678_v48 = vld [vmem:[#allocation6 + $0x138] sm:$0xff] }
 0x162   : > { %v3177_v60 = vadd.f32 %v3176_v53, %v2922_v49  ;;  %v2413_v62 = vmul.f32 0.0625, %v1932_v56  ;;  %v2414_v63 = vmul.f32 0.0625, %v1934_v57 }
 0x164   : > { %v3178_v1 = vadd.f32 %v3177_v60, %v2923_v54  ;;  %v2925_v2 = vmul.f32 %v2669_v55, %v2413_v62  ;;  %2075 = vadd.xlane.f32.xlu0 %v978_v58  ;;  %2077 = vadd.xlane.f32.xlu1 %v979_v59  ;;  %v2926_v9 = vmul.f32 %v2670_v0, %v2414_v63  ;;  %v1036_v54 = vld [vmem:[%s4244_s26 + $0x380] sm:$0xff]  ;;  %v1037_v55 = vld [vmem:[%s4244_s26 + $0x388] sm:$0xff]  ;;  %v2681_v63 = vld [vmem:[#allocation6 + $0x150] sm:$0xff] }
 0x165   : > { %v1936_v4 = vpop.xlane.xlu0 %1935  ;;  %v1938_v5 = vpop.xlane.xlu1 %1937  ;;  %v2680_v60 = vld [vmem:[#allocation6 + $0x148] sm:$0xff] }
 0x166   : > { %v3179_v8 = vadd.f32 %v3178_v1, %v2924_v61  ;;  %v2415_v10 = vmul.f32 0.0625, %v1936_v4  ;;  %v2416_v11 = vmul.f32 0.0625, %v1938_v5 }
 0x168   : > { %v3180_v13 = vadd.f32 %v3179_v8, %v2925_v2  ;;  %v2927_v14 = vmul.f32 %v2671_v3, %v2415_v10  ;;  %2079 = vadd.xlane.f32.xlu0 %v980_v6  ;;  %2081 = vadd.xlane.f32.xlu1 %v981_v7  ;;  %v2928_v21 = vmul.f32 %v2672_v12, %v2416_v11  ;;  %v1038_v2 = vld [vmem:[%s4244_s26 + $0x390] sm:$0xff]  ;;  %v1039_v3 = vld [vmem:[%s4244_s26 + $0x398] sm:$0xff]  ;;  %v2683_v11 = vld [vmem:[#allocation6 + $0x160] sm:$0xff] }
 0x169   : > { %v1940_v16 = vpop.xlane.xlu0 %1939  ;;  %v1942_v17 = vpop.xlane.xlu1 %1941  ;;  %v2682_v8 = vld [vmem:[#allocation6 + $0x158] sm:$0xff] }
 0x16a   : > { %v3181_v20 = vadd.f32 %v3180_v13, %v2926_v9  ;;  %v2417_v22 = vmul.f32 0.0625, %v1940_v16  ;;  %v2418_v23 = vmul.f32 0.0625, %v1942_v17 }
 0x16c   : > { %v3182_v25 = vadd.f32 %v3181_v20, %v2927_v14  ;;  %v2929_v26 = vmul.f32 %v2673_v15, %v2417_v22  ;;  %2083 = vadd.xlane.f32.xlu0 %v982_v18  ;;  %2085 = vadd.xlane.f32.xlu1 %v983_v19  ;;  %v2930_v33 = vmul.f32 %v2674_v24, %v2418_v23  ;;  %v1040_v14 = vld [vmem:[%s4244_s26 + $0x3a0] sm:$0xff]  ;;  %v1041_v15 = vld [vmem:[%s4244_s26 + $0x3a8] sm:$0xff]  ;;  %v2685_v23 = vld [vmem:[#allocation6 + $0x170] sm:$0xff] }
 0x16d   : > { %v1944_v28 = vpop.xlane.xlu0 %1943  ;;  %v1946_v29 = vpop.xlane.xlu1 %1945  ;;  %v2684_v20 = vld [vmem:[#allocation6 + $0x168] sm:$0xff] }
 0x16e   : > { %v3183_v32 = vadd.f32 %v3182_v25, %v2928_v21  ;;  %v2419_v34 = vmul.f32 0.0625, %v1944_v28  ;;  %v2420_v35 = vmul.f32 0.0625, %v1946_v29 }
 0x170   : > { %v3184_v37 = vadd.f32 %v3183_v32, %v2929_v26  ;;  %v2931_v38 = vmul.f32 %v2675_v27, %v2419_v34  ;;  %2087 = vadd.xlane.f32.xlu0 %v984_v30  ;;  %2089 = vadd.xlane.f32.xlu1 %v985_v31  ;;  %v2932_v45 = vmul.f32 %v2676_v36, %v2420_v35  ;;  %v1042_v26 = vld [vmem:[%s4244_s26 + $0x3b0] sm:$0xff]  ;;  %v1043_v27 = vld [vmem:[%s4244_s26 + $0x3b8] sm:$0xff]  ;;  %v2687_v35 = vld [vmem:[#allocation6 + $0x180] sm:$0xff] }
 0x171   : > { %v1948_v40 = vpop.xlane.xlu0 %1947  ;;  %v1950_v41 = vpop.xlane.xlu1 %1949  ;;  %v2686_v32 = vld [vmem:[#allocation6 + $0x178] sm:$0xff] }
 0x172   : > { %v3185_v44 = vadd.f32 %v3184_v37, %v2930_v33  ;;  %v2421_v46 = vmul.f32 0.0625, %v1948_v40  ;;  %v2422_v47 = vmul.f32 0.0625, %v1950_v41 }
 0x174   : > { %v3186_v49 = vadd.f32 %v3185_v44, %v2931_v38  ;;  %v2933_v50 = vmul.f32 %v2677_v39, %v2421_v46  ;;  %2091 = vadd.xlane.f32.xlu0 %v986_v42  ;;  %2093 = vadd.xlane.f32.xlu1 %v987_v43  ;;  %v2934_v57 = vmul.f32 %v2678_v48, %v2422_v47  ;;  %v1044_v38 = vld [vmem:[%s4244_s26 + $0x3c0] sm:$0xff]  ;;  %v1045_v39 = vld [vmem:[%s4244_s26 + $0x3c8] sm:$0xff]  ;;  %v2689_v47 = vld [vmem:[#allocation6 + $0x190] sm:$0xff] }
 0x175   : > { %v1952_v52 = vpop.xlane.xlu0 %1951  ;;  %v1954_v53 = vpop.xlane.xlu1 %1953  ;;  %v2688_v44 = vld [vmem:[#allocation6 + $0x188] sm:$0xff] }
 0x176   : > { %v3187_v56 = vadd.f32 %v3186_v49, %v2932_v45  ;;  %v2423_v58 = vmul.f32 0.0625, %v1952_v52  ;;  %v2424_v59 = vmul.f32 0.0625, %v1954_v53 }
 0x178   : > { %v3188_v61 = vadd.f32 %v3187_v56, %v2933_v50  ;;  %v2935_v62 = vmul.f32 %v2679_v51, %v2423_v58  ;;  %2095 = vadd.xlane.f32.xlu0 %v1036_v54  ;;  %2097 = vadd.xlane.f32.xlu1 %v1037_v55  ;;  %v2936_v5 = vmul.f32 %v2680_v60, %v2424_v59  ;;  %v1046_v50 = vld [vmem:[%s4244_s26 + $0x3d0] sm:$0xff]  ;;  %v1047_v51 = vld [vmem:[%s4244_s26 + $0x3d8] sm:$0xff]  ;;  %v2691_v59 = vld [vmem:[#allocation6 + $0x1a0] sm:$0xff] }
 0x179   : > { %v1956_v0 = vpop.xlane.xlu0 %1955  ;;  %v1958_v1 = vpop.xlane.xlu1 %1957  ;;  %v2690_v56 = vld [vmem:[#allocation6 + $0x198] sm:$0xff] }
 0x17a   : > { %v3189_v4 = vadd.f32 %v3188_v61, %v2934_v57  ;;  %v2425_v6 = vmul.f32 0.0625, %v1956_v0  ;;  %v2426_v7 = vmul.f32 0.0625, %v1958_v1 }
 0x17c   : > { %v3190_v9 = vadd.f32 %v3189_v4, %v2935_v62  ;;  %v2937_v10 = vmul.f32 %v2681_v63, %v2425_v6  ;;  %2099 = vadd.xlane.f32.xlu0 %v1038_v2  ;;  %2101 = vadd.xlane.f32.xlu1 %v1039_v3  ;;  %v2938_v17 = vmul.f32 %v2682_v8, %v2426_v7  ;;  %v1048_v62 = vld [vmem:[%s4244_s26 + $0x3e0] sm:$0xff]  ;;  %v1049_v63 = vld [vmem:[%s4244_s26 + $0x3e8] sm:$0xff]  ;;  %v2693_v7 = vld [vmem:[#allocation6 + $0x1b0] sm:$0xff] }
 0x17d   : > { %v1960_v12 = vpop.xlane.xlu0 %1959  ;;  %v1962_v13 = vpop.xlane.xlu1 %1961  ;;  %v2692_v4 = vld [vmem:[#allocation6 + $0x1a8] sm:$0xff] }
 0x17e   : > { %v3191_v16 = vadd.f32 %v3190_v9, %v2936_v5  ;;  %v2427_v18 = vmul.f32 0.0625, %v1960_v12  ;;  %v2428_v19 = vmul.f32 0.0625, %v1962_v13 }
 0x180   : > { %v3192_v21 = vadd.f32 %v3191_v16, %v2937_v10  ;;  %v2939_v22 = vmul.f32 %v2683_v11, %v2427_v18  ;;  %2103 = vadd.xlane.f32.xlu0 %v1040_v14  ;;  %2105 = vadd.xlane.f32.xlu1 %v1041_v15  ;;  %v2940_v29 = vmul.f32 %v2684_v20, %v2428_v19  ;;  %v1050_v10 = vld [vmem:[%s4244_s26 + $0x3f0] sm:$0xff]  ;;  %v1051_v11 = vld [vmem:[%s4244_s26 + $0x3f8] sm:$0xff]  ;;  %v2695_v19 = vld [vmem:[#allocation6 + $0x1c0] sm:$0xff] }
 0x181   : > { %v1964_v24 = vpop.xlane.xlu0 %1963  ;;  %v1966_v25 = vpop.xlane.xlu1 %1965  ;;  %v2694_v16 = vld [vmem:[#allocation6 + $0x1b8] sm:$0xff] }
 0x182   : > { %v3193_v28 = vadd.f32 %v3192_v21, %v2938_v17  ;;  %v2429_v30 = vmul.f32 0.0625, %v1964_v24  ;;  %v2430_v31 = vmul.f32 0.0625, %v1966_v25 }
 0x184   : > { %v3194_v33 = vadd.f32 %v3193_v28, %v2939_v22  ;;  %v2941_v34 = vmul.f32 %v2685_v23, %v2429_v30  ;;  %2107 = vadd.xlane.f32.xlu0 %v1042_v26  ;;  %2109 = vadd.xlane.f32.xlu1 %v1043_v27  ;;  %v2942_v41 = vmul.f32 %v2686_v32, %v2430_v31  ;;  %v1100_v22 = vld [vmem:[%s4244_s26 + $0x400] sm:$0xff]  ;;  %v1101_v23 = vld [vmem:[%s4244_s26 + $0x408] sm:$0xff]  ;;  %v2697_v31 = vld [vmem:[#allocation6 + $0x1d0] sm:$0xff] }
 0x185   : > { %v1968_v36 = vpop.xlane.xlu0 %1967  ;;  %v1970_v37 = vpop.xlane.xlu1 %1969  ;;  %v2696_v28 = vld [vmem:[#allocation6 + $0x1c8] sm:$0xff] }
 0x186   : > { %v3195_v40 = vadd.f32 %v3194_v33, %v2940_v29  ;;  %v2431_v42 = vmul.f32 0.0625, %v1968_v36  ;;  %v2432_v43 = vmul.f32 0.0625, %v1970_v37 }
 0x188   : > { %v3196_v45 = vadd.f32 %v3195_v40, %v2941_v34  ;;  %v2943_v46 = vmul.f32 %v2687_v35, %v2431_v42  ;;  %2111 = vadd.xlane.f32.xlu0 %v1044_v38  ;;  %2113 = vadd.xlane.f32.xlu1 %v1045_v39  ;;  %v2944_v53 = vmul.f32 %v2688_v44, %v2432_v43  ;;  %v1102_v34 = vld [vmem:[%s4244_s26 + $0x410] sm:$0xff]  ;;  %v1103_v35 = vld [vmem:[%s4244_s26 + $0x418] sm:$0xff]  ;;  %v2699_v43 = vld [vmem:[#allocation6 + $0x1e0] sm:$0xff] }
 0x189   : > { %v1972_v48 = vpop.xlane.xlu0 %1971  ;;  %v1974_v49 = vpop.xlane.xlu1 %1973  ;;  %v2698_v40 = vld [vmem:[#allocation6 + $0x1d8] sm:$0xff] }
 0x18a   : > { %v3197_v52 = vadd.f32 %v3196_v45, %v2942_v41  ;;  %v2433_v54 = vmul.f32 0.0625, %v1972_v48  ;;  %v2434_v55 = vmul.f32 0.0625, %v1974_v49 }
 0x18c   : > { %v3198_v57 = vadd.f32 %v3197_v52, %v2943_v46  ;;  %v2945_v58 = vmul.f32 %v2689_v47, %v2433_v54  ;;  %2115 = vadd.xlane.f32.xlu0 %v1046_v50  ;;  %2117 = vadd.xlane.f32.xlu1 %v1047_v51  ;;  %v2946_v1 = vmul.f32 %v2690_v56, %v2434_v55  ;;  %v1104_v46 = vld [vmem:[%s4244_s26 + $0x420] sm:$0xff]  ;;  %v1105_v47 = vld [vmem:[%s4244_s26 + $0x428] sm:$0xff]  ;;  %v2701_v55 = vld [vmem:[#allocation6 + $0x1f0] sm:$0xff] }
 0x18d   : > { %v1976_v60 = vpop.xlane.xlu0 %1975  ;;  %v1978_v61 = vpop.xlane.xlu1 %1977  ;;  %v2700_v52 = vld [vmem:[#allocation6 + $0x1e8] sm:$0xff] }
 0x18e   : > { %v3199_v0 = vadd.f32 %v3198_v57, %v2944_v53  ;;  %v2435_v2 = vmul.f32 0.0625, %v1976_v60  ;;  %v2436_v3 = vmul.f32 0.0625, %v1978_v61 }
 0x190   : > { %v3200_v5 = vadd.f32 %v3199_v0, %v2945_v58  ;;  %v2947_v6 = vmul.f32 %v2691_v59, %v2435_v2  ;;  %2119 = vadd.xlane.f32.xlu0 %v1048_v62  ;;  %2121 = vadd.xlane.f32.xlu1 %v1049_v63  ;;  %v2948_v13 = vmul.f32 %v2692_v4, %v2436_v3  ;;  %v1106_v58 = vld [vmem:[%s4244_s26 + $0x430] sm:$0xff]  ;;  %v1107_v59 = vld [vmem:[%s4244_s26 + $0x438] sm:$0xff]  ;;  %v2703_v3 = vld [vmem:[#allocation6 + $0x200] sm:$0xff] }
 0x191   : > { %v1980_v8 = vpop.xlane.xlu0 %1979  ;;  %v1982_v9 = vpop.xlane.xlu1 %1981  ;;  %v2702_v0 = vld [vmem:[#allocation6 + $0x1f8] sm:$0xff] }
 0x192   : > { %v3201_v12 = vadd.f32 %v3200_v5, %v2946_v1  ;;  %v2437_v14 = vmul.f32 0.0625, %v1980_v8  ;;  %v2438_v15 = vmul.f32 0.0625, %v1982_v9 }
 0x194   : > { %v3202_v17 = vadd.f32 %v3201_v12, %v2947_v6  ;;  %v2949_v18 = vmul.f32 %v2693_v7, %v2437_v14  ;;  %2123 = vadd.xlane.f32.xlu0 %v1050_v10  ;;  %2125 = vadd.xlane.f32.xlu1 %v1051_v11  ;;  %v2950_v25 = vmul.f32 %v2694_v16, %v2438_v15  ;;  %v1108_v6 = vld [vmem:[%s4244_s26 + $0x440] sm:$0xff]  ;;  %v1109_v7 = vld [vmem:[%s4244_s26 + $0x448] sm:$0xff]  ;;  %v2705_v15 = vld [vmem:[#allocation6 + $0x210] sm:$0xff] }
 0x195   : > { %v1984_v20 = vpop.xlane.xlu0 %1983  ;;  %v1986_v21 = vpop.xlane.xlu1 %1985  ;;  %v2704_v12 = vld [vmem:[#allocation6 + $0x208] sm:$0xff] }
 0x196   : > { %v3203_v24 = vadd.f32 %v3202_v17, %v2948_v13  ;;  %v2439_v26 = vmul.f32 0.0625, %v1984_v20  ;;  %v2440_v27 = vmul.f32 0.0625, %v1986_v21 }
 0x198   : > { %v3204_v29 = vadd.f32 %v3203_v24, %v2949_v18  ;;  %v2951_v30 = vmul.f32 %v2695_v19, %v2439_v26  ;;  %2127 = vadd.xlane.f32.xlu0 %v1100_v22  ;;  %2129 = vadd.xlane.f32.xlu1 %v1101_v23  ;;  %v2952_v37 = vmul.f32 %v2696_v28, %v2440_v27  ;;  %v1110_v18 = vld [vmem:[%s4244_s26 + $0x450] sm:$0xff]  ;;  %v1111_v19 = vld [vmem:[%s4244_s26 + $0x458] sm:$0xff]  ;;  %v2707_v27 = vld [vmem:[#allocation6 + $0x220] sm:$0xff] }
 0x199   : > { %v1988_v32 = vpop.xlane.xlu0 %1987  ;;  %v1990_v33 = vpop.xlane.xlu1 %1989  ;;  %v2706_v24 = vld [vmem:[#allocation6 + $0x218] sm:$0xff] }
 0x19a   : > { %v3205_v36 = vadd.f32 %v3204_v29, %v2950_v25  ;;  %v2441_v38 = vmul.f32 0.0625, %v1988_v32  ;;  %v2442_v39 = vmul.f32 0.0625, %v1990_v33 }
 0x19c   : > { %v3206_v41 = vadd.f32 %v3205_v36, %v2951_v30  ;;  %v2953_v42 = vmul.f32 %v2697_v31, %v2441_v38  ;;  %2131 = vadd.xlane.f32.xlu0 %v1102_v34  ;;  %2133 = vadd.xlane.f32.xlu1 %v1103_v35  ;;  %v2954_v49 = vmul.f32 %v2698_v40, %v2442_v39  ;;  %v1112_v30 = vld [vmem:[%s4244_s26 + $0x460] sm:$0xff]  ;;  %v1113_v31 = vld [vmem:[%s4244_s26 + $0x468] sm:$0xff]  ;;  %v2709_v39 = vld [vmem:[#allocation6 + $0x230] sm:$0xff] }
 0x19d   : > { %v1992_v44 = vpop.xlane.xlu0 %1991  ;;  %v1994_v45 = vpop.xlane.xlu1 %1993  ;;  %v2708_v36 = vld [vmem:[#allocation6 + $0x228] sm:$0xff] }
 0x19e   : > { %v3207_v48 = vadd.f32 %v3206_v41, %v2952_v37  ;;  %v2443_v50 = vmul.f32 0.0625, %v1992_v44  ;;  %v2444_v51 = vmul.f32 0.0625, %v1994_v45 }
 0x1a0   : > { %v3208_v53 = vadd.f32 %v3207_v48, %v2953_v42  ;;  %v2955_v54 = vmul.f32 %v2699_v43, %v2443_v50  ;;  %2135 = vadd.xlane.f32.xlu0 %v1104_v46  ;;  %2137 = vadd.xlane.f32.xlu1 %v1105_v47  ;;  %v2956_v61 = vmul.f32 %v2700_v52, %v2444_v51  ;;  %v1114_v42 = vld [vmem:[%s4244_s26 + $0x470] sm:$0xff]  ;;  %v1115_v43 = vld [vmem:[%s4244_s26 + $0x478] sm:$0xff]  ;;  %v2711_v51 = vld [vmem:[#allocation6 + $0x240] sm:$0xff] }
 0x1a1   : > { %v1996_v56 = vpop.xlane.xlu0 %1995  ;;  %v1998_v57 = vpop.xlane.xlu1 %1997  ;;  %v2710_v48 = vld [vmem:[#allocation6 + $0x238] sm:$0xff] }
 0x1a2   : > { %v3209_v60 = vadd.f32 %v3208_v53, %v2954_v49  ;;  %v2445_v62 = vmul.f32 0.0625, %v1996_v56  ;;  %v2446_v63 = vmul.f32 0.0625, %v1998_v57 }
 0x1a4   : > { %v3210_v1 = vadd.f32 %v3209_v60, %v2955_v54  ;;  %v2957_v2 = vmul.f32 %v2701_v55, %v2445_v62  ;;  %2139 = vadd.xlane.f32.xlu0 %v1106_v58  ;;  %2141 = vadd.xlane.f32.xlu1 %v1107_v59  ;;  %v2958_v9 = vmul.f32 %v2702_v0, %v2446_v63  ;;  %v1164_v54 = vld [vmem:[%s4244_s26 + $0x480] sm:$0xff]  ;;  %v1165_v55 = vld [vmem:[%s4244_s26 + $0x488] sm:$0xff]  ;;  %v2713_v63 = vld [vmem:[#allocation6 + $0x250] sm:$0xff] }
 0x1a5   : > { %v2000_v4 = vpop.xlane.xlu0 %1999  ;;  %v2002_v5 = vpop.xlane.xlu1 %2001  ;;  %v2712_v60 = vld [vmem:[#allocation6 + $0x248] sm:$0xff] }
 0x1a6   : > { %v3211_v8 = vadd.f32 %v3210_v1, %v2956_v61  ;;  %v2447_v10 = vmul.f32 0.0625, %v2000_v4  ;;  %v2448_v11 = vmul.f32 0.0625, %v2002_v5 }
 0x1a8   : > { %v3212_v13 = vadd.f32 %v3211_v8, %v2957_v2  ;;  %v2959_v14 = vmul.f32 %v2703_v3, %v2447_v10  ;;  %2143 = vadd.xlane.f32.xlu0 %v1108_v6  ;;  %2145 = vadd.xlane.f32.xlu1 %v1109_v7  ;;  %v2960_v21 = vmul.f32 %v2704_v12, %v2448_v11  ;;  %v1166_v2 = vld [vmem:[%s4244_s26 + $0x490] sm:$0xff]  ;;  %v1167_v3 = vld [vmem:[%s4244_s26 + $0x498] sm:$0xff]  ;;  %v2715_v11 = vld [vmem:[#allocation6 + $0x260] sm:$0xff] }
 0x1a9   : > { %v2004_v16 = vpop.xlane.xlu0 %2003  ;;  %v2006_v17 = vpop.xlane.xlu1 %2005  ;;  %v2714_v8 = vld [vmem:[#allocation6 + $0x258] sm:$0xff] }
 0x1aa   : > { %v3213_v20 = vadd.f32 %v3212_v13, %v2958_v9  ;;  %v2449_v22 = vmul.f32 0.0625, %v2004_v16  ;;  %v2450_v23 = vmul.f32 0.0625, %v2006_v17 }
 0x1ac   : > { %v3214_v25 = vadd.f32 %v3213_v20, %v2959_v14  ;;  %v2961_v26 = vmul.f32 %v2705_v15, %v2449_v22  ;;  %2147 = vadd.xlane.f32.xlu0 %v1110_v18  ;;  %2149 = vadd.xlane.f32.xlu1 %v1111_v19  ;;  %v2962_v33 = vmul.f32 %v2706_v24, %v2450_v23  ;;  %v1168_v14 = vld [vmem:[%s4244_s26 + $0x4a0] sm:$0xff]  ;;  %v1169_v15 = vld [vmem:[%s4244_s26 + $0x4a8] sm:$0xff]  ;;  %v2717_v23 = vld [vmem:[#allocation6 + $0x270] sm:$0xff] }
 0x1ad   : > { %v2008_v28 = vpop.xlane.xlu0 %2007  ;;  %v2010_v29 = vpop.xlane.xlu1 %2009  ;;  %v2716_v20 = vld [vmem:[#allocation6 + $0x268] sm:$0xff] }
 0x1ae   : > { %v3215_v32 = vadd.f32 %v3214_v25, %v2960_v21  ;;  %v2451_v34 = vmul.f32 0.0625, %v2008_v28  ;;  %v2452_v35 = vmul.f32 0.0625, %v2010_v29 }
 0x1b0   : > { %v3216_v37 = vadd.f32 %v3215_v32, %v2961_v26  ;;  %v2963_v38 = vmul.f32 %v2707_v27, %v2451_v34  ;;  %2151 = vadd.xlane.f32.xlu0 %v1112_v30  ;;  %2153 = vadd.xlane.f32.xlu1 %v1113_v31  ;;  %v2964_v45 = vmul.f32 %v2708_v36, %v2452_v35  ;;  %v1170_v26 = vld [vmem:[%s4244_s26 + $0x4b0] sm:$0xff]  ;;  %v1171_v27 = vld [vmem:[%s4244_s26 + $0x4b8] sm:$0xff]  ;;  %v2719_v35 = vld [vmem:[#allocation6 + $0x280] sm:$0xff] }
 0x1b1   : > { %v2012_v40 = vpop.xlane.xlu0 %2011  ;;  %v2014_v41 = vpop.xlane.xlu1 %2013  ;;  %v2718_v32 = vld [vmem:[#allocation6 + $0x278] sm:$0xff] }
 0x1b2   : > { %v3217_v44 = vadd.f32 %v3216_v37, %v2962_v33  ;;  %v2453_v46 = vmul.f32 0.0625, %v2012_v40  ;;  %v2454_v47 = vmul.f32 0.0625, %v2014_v41 }
 0x1b4   : > { %v3218_v49 = vadd.f32 %v3217_v44, %v2963_v38  ;;  %v2965_v50 = vmul.f32 %v2709_v39, %v2453_v46  ;;  %2155 = vadd.xlane.f32.xlu0 %v1114_v42  ;;  %2157 = vadd.xlane.f32.xlu1 %v1115_v43  ;;  %v2966_v57 = vmul.f32 %v2710_v48, %v2454_v47  ;;  %v1172_v38 = vld [vmem:[%s4244_s26 + $0x4c0] sm:$0xff]  ;;  %v1173_v39 = vld [vmem:[%s4244_s26 + $0x4c8] sm:$0xff]  ;;  %v2721_v47 = vld [vmem:[#allocation6 + $0x290] sm:$0xff] }
 0x1b5   : > { %v2016_v52 = vpop.xlane.xlu0 %2015  ;;  %v2018_v53 = vpop.xlane.xlu1 %2017  ;;  %v2720_v44 = vld [vmem:[#allocation6 + $0x288] sm:$0xff] }
 0x1b6   : > { %v3219_v56 = vadd.f32 %v3218_v49, %v2964_v45  ;;  %v2455_v58 = vmul.f32 0.0625, %v2016_v52  ;;  %v2456_v59 = vmul.f32 0.0625, %v2018_v53 }
 0x1b8   : > { %v3220_v61 = vadd.f32 %v3219_v56, %v2965_v50  ;;  %v2967_v62 = vmul.f32 %v2711_v51, %v2455_v58  ;;  %2159 = vadd.xlane.f32.xlu0 %v1164_v54  ;;  %2161 = vadd.xlane.f32.xlu1 %v1165_v55  ;;  %v2968_v5 = vmul.f32 %v2712_v60, %v2456_v59  ;;  %v1174_v50 = vld [vmem:[%s4244_s26 + $0x4d0] sm:$0xff]  ;;  %v1175_v51 = vld [vmem:[%s4244_s26 + $0x4d8] sm:$0xff]  ;;  %v2723_v59 = vld [vmem:[#allocation6 + $0x2a0] sm:$0xff] }
 0x1b9   : > { %v2020_v0 = vpop.xlane.xlu0 %2019  ;;  %v2022_v1 = vpop.xlane.xlu1 %2021  ;;  %v2722_v56 = vld [vmem:[#allocation6 + $0x298] sm:$0xff] }
 0x1ba   : > { %v3221_v4 = vadd.f32 %v3220_v61, %v2966_v57  ;;  %v2457_v6 = vmul.f32 0.0625, %v2020_v0  ;;  %v2458_v7 = vmul.f32 0.0625, %v2022_v1 }
 0x1bc   : > { %v3222_v9 = vadd.f32 %v3221_v4, %v2967_v62  ;;  %v2969_v10 = vmul.f32 %v2713_v63, %v2457_v6  ;;  %2163 = vadd.xlane.f32.xlu0 %v1166_v2  ;;  %2165 = vadd.xlane.f32.xlu1 %v1167_v3  ;;  %v2970_v17 = vmul.f32 %v2714_v8, %v2458_v7  ;;  %v1176_v62 = vld [vmem:[%s4244_s26 + $0x4e0] sm:$0xff]  ;;  %v1177_v63 = vld [vmem:[%s4244_s26 + $0x4e8] sm:$0xff]  ;;  %v2725_v7 = vld [vmem:[#allocation6 + $0x2b0] sm:$0xff] }
 0x1bd   : > { %v2024_v12 = vpop.xlane.xlu0 %2023  ;;  %v2026_v13 = vpop.xlane.xlu1 %2025  ;;  %v2724_v4 = vld [vmem:[#allocation6 + $0x2a8] sm:$0xff] }
 0x1be   : > { %v3223_v16 = vadd.f32 %v3222_v9, %v2968_v5  ;;  %v2459_v18 = vmul.f32 0.0625, %v2024_v12  ;;  %v2460_v19 = vmul.f32 0.0625, %v2026_v13 }
 0x1c0   : > { %v3224_v21 = vadd.f32 %v3223_v16, %v2969_v10  ;;  %v2971_v22 = vmul.f32 %v2715_v11, %v2459_v18  ;;  %2167 = vadd.xlane.f32.xlu0 %v1168_v14  ;;  %2169 = vadd.xlane.f32.xlu1 %v1169_v15  ;;  %v2972_v29 = vmul.f32 %v2716_v20, %v2460_v19  ;;  %v1178_v10 = vld [vmem:[%s4244_s26 + $0x4f0] sm:$0xff]  ;;  %v1179_v11 = vld [vmem:[%s4244_s26 + $0x4f8] sm:$0xff]  ;;  %v2727_v19 = vld [vmem:[#allocation6 + $0x2c0] sm:$0xff] }
 0x1c1   : > { %v2028_v24 = vpop.xlane.xlu0 %2027  ;;  %v2030_v25 = vpop.xlane.xlu1 %2029  ;;  %v2726_v16 = vld [vmem:[#allocation6 + $0x2b8] sm:$0xff] }
 0x1c2   : > { %v3225_v28 = vadd.f32 %v3224_v21, %v2970_v17  ;;  %v2461_v30 = vmul.f32 0.0625, %v2028_v24  ;;  %v2462_v31 = vmul.f32 0.0625, %v2030_v25 }
 0x1c4   : > { %v3226_v33 = vadd.f32 %v3225_v28, %v2971_v22  ;;  %v2973_v34 = vmul.f32 %v2717_v23, %v2461_v30  ;;  %2171 = vadd.xlane.f32.xlu0 %v1170_v26  ;;  %2173 = vadd.xlane.f32.xlu1 %v1171_v27  ;;  %v2974_v41 = vmul.f32 %v2718_v32, %v2462_v31  ;;  %v1228_v22 = vld [vmem:[%s4244_s26 + $0x500] sm:$0xff]  ;;  %v1229_v23 = vld [vmem:[%s4244_s26 + $0x508] sm:$0xff]  ;;  %v2729_v31 = vld [vmem:[#allocation6 + $0x2d0] sm:$0xff] }
 0x1c5   : > { %v2032_v36 = vpop.xlane.xlu0 %2031  ;;  %v2034_v37 = vpop.xlane.xlu1 %2033  ;;  %v2728_v28 = vld [vmem:[#allocation6 + $0x2c8] sm:$0xff] }
 0x1c6   : > { %v3227_v40 = vadd.f32 %v3226_v33, %v2972_v29  ;;  %v2463_v42 = vmul.f32 0.0625, %v2032_v36  ;;  %v2464_v43 = vmul.f32 0.0625, %v2034_v37 }
 0x1c8   : > { %v3228_v45 = vadd.f32 %v3227_v40, %v2973_v34  ;;  %v2975_v46 = vmul.f32 %v2719_v35, %v2463_v42  ;;  %2175 = vadd.xlane.f32.xlu0 %v1172_v38  ;;  %2177 = vadd.xlane.f32.xlu1 %v1173_v39  ;;  %v2976_v53 = vmul.f32 %v2720_v44, %v2464_v43  ;;  %v1230_v34 = vld [vmem:[%s4244_s26 + $0x510] sm:$0xff]  ;;  %v1231_v35 = vld [vmem:[%s4244_s26 + $0x518] sm:$0xff]  ;;  %v2731_v43 = vld [vmem:[#allocation6 + $0x2e0] sm:$0xff] }
 0x1c9   : > { %v2036_v48 = vpop.xlane.xlu0 %2035  ;;  %v2038_v49 = vpop.xlane.xlu1 %2037  ;;  %v2730_v40 = vld [vmem:[#allocation6 + $0x2d8] sm:$0xff] }
 0x1ca   : > { %v3229_v52 = vadd.f32 %v3228_v45, %v2974_v41  ;;  %v2465_v54 = vmul.f32 0.0625, %v2036_v48  ;;  %v2466_v55 = vmul.f32 0.0625, %v2038_v49 }
 0x1cc   : > { %v3230_v57 = vadd.f32 %v3229_v52, %v2975_v46  ;;  %v2977_v58 = vmul.f32 %v2721_v47, %v2465_v54  ;;  %2179 = vadd.xlane.f32.xlu0 %v1174_v50  ;;  %2181 = vadd.xlane.f32.xlu1 %v1175_v51  ;;  %v2978_v1 = vmul.f32 %v2722_v56, %v2466_v55  ;;  %v1232_v46 = vld [vmem:[%s4244_s26 + $0x520] sm:$0xff]  ;;  %v1233_v47 = vld [vmem:[%s4244_s26 + $0x528] sm:$0xff]  ;;  %v2733_v55 = vld [vmem:[#allocation6 + $0x2f0] sm:$0xff] }
 0x1cd   : > { %v2040_v60 = vpop.xlane.xlu0 %2039  ;;  %v2042_v61 = vpop.xlane.xlu1 %2041  ;;  %v2732_v52 = vld [vmem:[#allocation6 + $0x2e8] sm:$0xff] }
 0x1ce   : > { %v3231_v0 = vadd.f32 %v3230_v57, %v2976_v53  ;;  %v2467_v2 = vmul.f32 0.0625, %v2040_v60  ;;  %v2468_v3 = vmul.f32 0.0625, %v2042_v61 }
 0x1d0   : > { %v3232_v5 = vadd.f32 %v3231_v0, %v2977_v58  ;;  %v2979_v6 = vmul.f32 %v2723_v59, %v2467_v2  ;;  %2183 = vadd.xlane.f32.xlu0 %v1176_v62  ;;  %2185 = vadd.xlane.f32.xlu1 %v1177_v63  ;;  %v2980_v13 = vmul.f32 %v2724_v4, %v2468_v3  ;;  %v1234_v58 = vld [vmem:[%s4244_s26 + $0x530] sm:$0xff]  ;;  %v1235_v59 = vld [vmem:[%s4244_s26 + $0x538] sm:$0xff]  ;;  %v2735_v3 = vld [vmem:[#allocation6 + $0x300] sm:$0xff] }
 0x1d1   : > { %v2044_v8 = vpop.xlane.xlu0 %2043  ;;  %v2046_v9 = vpop.xlane.xlu1 %2045  ;;  %v2734_v0 = vld [vmem:[#allocation6 + $0x2f8] sm:$0xff] }
 0x1d2   : > { %v3233_v12 = vadd.f32 %v3232_v5, %v2978_v1  ;;  %v2469_v14 = vmul.f32 0.0625, %v2044_v8  ;;  %v2470_v15 = vmul.f32 0.0625, %v2046_v9 }
 0x1d4   : > { %v3234_v17 = vadd.f32 %v3233_v12, %v2979_v6  ;;  %v2981_v18 = vmul.f32 %v2725_v7, %v2469_v14  ;;  %2187 = vadd.xlane.f32.xlu0 %v1178_v10  ;;  %2189 = vadd.xlane.f32.xlu1 %v1179_v11  ;;  %v2982_v25 = vmul.f32 %v2726_v16, %v2470_v15  ;;  %v1236_v6 = vld [vmem:[%s4244_s26 + $0x540] sm:$0xff]  ;;  %v1237_v7 = vld [vmem:[%s4244_s26 + $0x548] sm:$0xff]  ;;  %v2737_v15 = vld [vmem:[#allocation6 + $0x310] sm:$0xff] }
 0x1d5   : > { %v2048_v20 = vpop.xlane.xlu0 %2047  ;;  %v2050_v21 = vpop.xlane.xlu1 %2049  ;;  %v2736_v12 = vld [vmem:[#allocation6 + $0x308] sm:$0xff] }
 0x1d6   : > { %v3235_v24 = vadd.f32 %v3234_v17, %v2980_v13  ;;  %v2471_v26 = vmul.f32 0.0625, %v2048_v20  ;;  %v2472_v27 = vmul.f32 0.0625, %v2050_v21 }
 0x1d8   : > { %v3236_v29 = vadd.f32 %v3235_v24, %v2981_v18  ;;  %v2983_v30 = vmul.f32 %v2727_v19, %v2471_v26  ;;  %2191 = vadd.xlane.f32.xlu0 %v1228_v22  ;;  %2193 = vadd.xlane.f32.xlu1 %v1229_v23  ;;  %v2984_v37 = vmul.f32 %v2728_v28, %v2472_v27  ;;  %v1238_v18 = vld [vmem:[%s4244_s26 + $0x550] sm:$0xff]  ;;  %v1239_v19 = vld [vmem:[%s4244_s26 + $0x558] sm:$0xff]  ;;  %v2739_v27 = vld [vmem:[#allocation6 + $0x320] sm:$0xff] }
 0x1d9   : > { %v2052_v32 = vpop.xlane.xlu0 %2051  ;;  %v2054_v33 = vpop.xlane.xlu1 %2053  ;;  %v2738_v24 = vld [vmem:[#allocation6 + $0x318] sm:$0xff] }
 0x1da   : > { %v3237_v36 = vadd.f32 %v3236_v29, %v2982_v25  ;;  %v2473_v38 = vmul.f32 0.0625, %v2052_v32  ;;  %v2474_v39 = vmul.f32 0.0625, %v2054_v33 }
 0x1dc   : > { %v3238_v41 = vadd.f32 %v3237_v36, %v2983_v30  ;;  %v2985_v42 = vmul.f32 %v2729_v31, %v2473_v38  ;;  %2195 = vadd.xlane.f32.xlu0 %v1230_v34  ;;  %2197 = vadd.xlane.f32.xlu1 %v1231_v35  ;;  %v2986_v49 = vmul.f32 %v2730_v40, %v2474_v39  ;;  %v1240_v30 = vld [vmem:[%s4244_s26 + $0x560] sm:$0xff]  ;;  %v1241_v31 = vld [vmem:[%s4244_s26 + $0x568] sm:$0xff]  ;;  %v2741_v39 = vld [vmem:[#allocation6 + $0x330] sm:$0xff] }
 0x1dd   : > { %v2056_v44 = vpop.xlane.xlu0 %2055  ;;  %v2058_v45 = vpop.xlane.xlu1 %2057  ;;  %v2740_v36 = vld [vmem:[#allocation6 + $0x328] sm:$0xff] }
 0x1de   : > { %v3239_v48 = vadd.f32 %v3238_v41, %v2984_v37  ;;  %v2475_v50 = vmul.f32 0.0625, %v2056_v44  ;;  %v2476_v51 = vmul.f32 0.0625, %v2058_v45 }
 0x1e0   : > { %v3240_v53 = vadd.f32 %v3239_v48, %v2985_v42  ;;  %v2987_v54 = vmul.f32 %v2731_v43, %v2475_v50  ;;  %2199 = vadd.xlane.f32.xlu0 %v1232_v46  ;;  %2201 = vadd.xlane.f32.xlu1 %v1233_v47  ;;  %v2988_v61 = vmul.f32 %v2732_v52, %v2476_v51  ;;  %v1242_v42 = vld [vmem:[%s4244_s26 + $0x570] sm:$0xff]  ;;  %v1243_v43 = vld [vmem:[%s4244_s26 + $0x578] sm:$0xff]  ;;  %v2743_v51 = vld [vmem:[#allocation6 + $0x340] sm:$0xff] }
 0x1e1   : > { %v2060_v56 = vpop.xlane.xlu0 %2059  ;;  %v2062_v57 = vpop.xlane.xlu1 %2061  ;;  %v2742_v48 = vld [vmem:[#allocation6 + $0x338] sm:$0xff] }
 0x1e2   : > { %v3241_v60 = vadd.f32 %v3240_v53, %v2986_v49  ;;  %v2477_v62 = vmul.f32 0.0625, %v2060_v56  ;;  %v2478_v63 = vmul.f32 0.0625, %v2062_v57 }
 0x1e4   : > { %v3242_v1 = vadd.f32 %v3241_v60, %v2987_v54  ;;  %v2989_v2 = vmul.f32 %v2733_v55, %v2477_v62  ;;  %2203 = vadd.xlane.f32.xlu0 %v1234_v58  ;;  %2205 = vadd.xlane.f32.xlu1 %v1235_v59  ;;  %v2990_v9 = vmul.f32 %v2734_v0, %v2478_v63  ;;  %v1292_v54 = vld [vmem:[%s4244_s26 + $0x580] sm:$0xff]  ;;  %v1293_v55 = vld [vmem:[%s4244_s26 + $0x588] sm:$0xff]  ;;  %v2745_v63 = vld [vmem:[#allocation6 + $0x350] sm:$0xff] }
 0x1e5   : > { %v2064_v4 = vpop.xlane.xlu0 %2063  ;;  %v2066_v5 = vpop.xlane.xlu1 %2065  ;;  %v2744_v60 = vld [vmem:[#allocation6 + $0x348] sm:$0xff] }
 0x1e6   : > { %v3243_v8 = vadd.f32 %v3242_v1, %v2988_v61  ;;  %v2479_v10 = vmul.f32 0.0625, %v2064_v4  ;;  %v2480_v11 = vmul.f32 0.0625, %v2066_v5 }
 0x1e8   : > { %v3244_v13 = vadd.f32 %v3243_v8, %v2989_v2  ;;  %v2991_v14 = vmul.f32 %v2735_v3, %v2479_v10  ;;  %2207 = vadd.xlane.f32.xlu0 %v1236_v6  ;;  %2209 = vadd.xlane.f32.xlu1 %v1237_v7  ;;  %v2992_v21 = vmul.f32 %v2736_v12, %v2480_v11  ;;  %v1294_v2 = vld [vmem:[%s4244_s26 + $0x590] sm:$0xff]  ;;  %v1295_v3 = vld [vmem:[%s4244_s26 + $0x598] sm:$0xff]  ;;  %v2747_v11 = vld [vmem:[#allocation6 + $0x360] sm:$0xff] }
 0x1e9   : > { %v2068_v16 = vpop.xlane.xlu0 %2067  ;;  %v2070_v17 = vpop.xlane.xlu1 %2069  ;;  %v2746_v8 = vld [vmem:[#allocation6 + $0x358] sm:$0xff] }
 0x1ea   : > { %v3245_v20 = vadd.f32 %v3244_v13, %v2990_v9  ;;  %v2481_v22 = vmul.f32 0.0625, %v2068_v16  ;;  %v2482_v23 = vmul.f32 0.0625, %v2070_v17 }
 0x1ec   : > { %v3246_v25 = vadd.f32 %v3245_v20, %v2991_v14  ;;  %v2993_v26 = vmul.f32 %v2737_v15, %v2481_v22  ;;  %2211 = vadd.xlane.f32.xlu0 %v1238_v18  ;;  %2213 = vadd.xlane.f32.xlu1 %v1239_v19  ;;  %v2994_v33 = vmul.f32 %v2738_v24, %v2482_v23  ;;  %v1296_v14 = vld [vmem:[%s4244_s26 + $0x5a0] sm:$0xff]  ;;  %v1297_v15 = vld [vmem:[%s4244_s26 + $0x5a8] sm:$0xff]  ;;  %v2749_v23 = vld [vmem:[#allocation6 + $0x370] sm:$0xff] }
 0x1ed   : > { %v2072_v28 = vpop.xlane.xlu0 %2071  ;;  %v2074_v29 = vpop.xlane.xlu1 %2073  ;;  %v2748_v20 = vld [vmem:[#allocation6 + $0x368] sm:$0xff] }
 0x1ee   : > { %v3247_v32 = vadd.f32 %v3246_v25, %v2992_v21  ;;  %v2483_v34 = vmul.f32 0.0625, %v2072_v28  ;;  %v2484_v35 = vmul.f32 0.0625, %v2074_v29 }
 0x1f0   : > { %v3248_v37 = vadd.f32 %v3247_v32, %v2993_v26  ;;  %v2995_v38 = vmul.f32 %v2739_v27, %v2483_v34  ;;  %2215 = vadd.xlane.f32.xlu0 %v1240_v30  ;;  %2217 = vadd.xlane.f32.xlu1 %v1241_v31  ;;  %v2996_v45 = vmul.f32 %v2740_v36, %v2484_v35  ;;  %v1298_v26 = vld [vmem:[%s4244_s26 + $0x5b0] sm:$0xff]  ;;  %v1299_v27 = vld [vmem:[%s4244_s26 + $0x5b8] sm:$0xff]  ;;  %v2751_v35 = vld [vmem:[#allocation6 + $0x380] sm:$0xff] }
 0x1f1   : > { %v2076_v40 = vpop.xlane.xlu0 %2075  ;;  %v2078_v41 = vpop.xlane.xlu1 %2077  ;;  %v2750_v32 = vld [vmem:[#allocation6 + $0x378] sm:$0xff] }
 0x1f2   : > { %v3249_v44 = vadd.f32 %v3248_v37, %v2994_v33  ;;  %v2485_v46 = vmul.f32 0.0625, %v2076_v40  ;;  %v2486_v47 = vmul.f32 0.0625, %v2078_v41 }
 0x1f4   : > { %v3250_v49 = vadd.f32 %v3249_v44, %v2995_v38  ;;  %v2997_v50 = vmul.f32 %v2741_v39, %v2485_v46  ;;  %2219 = vadd.xlane.f32.xlu0 %v1242_v42  ;;  %2221 = vadd.xlane.f32.xlu1 %v1243_v43  ;;  %v2998_v57 = vmul.f32 %v2742_v48, %v2486_v47  ;;  %v1300_v38 = vld [vmem:[%s4244_s26 + $0x5c0] sm:$0xff]  ;;  %v1301_v39 = vld [vmem:[%s4244_s26 + $0x5c8] sm:$0xff]  ;;  %v2753_v47 = vld [vmem:[#allocation6 + $0x390] sm:$0xff] }
 0x1f5   : > { %v2080_v52 = vpop.xlane.xlu0 %2079  ;;  %v2082_v53 = vpop.xlane.xlu1 %2081  ;;  %v2752_v44 = vld [vmem:[#allocation6 + $0x388] sm:$0xff] }
 0x1f6   : > { %v3251_v56 = vadd.f32 %v3250_v49, %v2996_v45  ;;  %v2487_v58 = vmul.f32 0.0625, %v2080_v52  ;;  %v2488_v59 = vmul.f32 0.0625, %v2082_v53 }
 0x1f8   : > { %v3252_v61 = vadd.f32 %v3251_v56, %v2997_v50  ;;  %v2999_v62 = vmul.f32 %v2743_v51, %v2487_v58  ;;  %2223 = vadd.xlane.f32.xlu0 %v1292_v54  ;;  %2225 = vadd.xlane.f32.xlu1 %v1293_v55  ;;  %v3000_v5 = vmul.f32 %v2744_v60, %v2488_v59  ;;  %v1302_v50 = vld [vmem:[%s4244_s26 + $0x5d0] sm:$0xff]  ;;  %v1303_v51 = vld [vmem:[%s4244_s26 + $0x5d8] sm:$0xff]  ;;  %v2755_v59 = vld [vmem:[#allocation6 + $0x3a0] sm:$0xff] }
 0x1f9   : > { %v2084_v0 = vpop.xlane.xlu0 %2083  ;;  %v2086_v1 = vpop.xlane.xlu1 %2085  ;;  %v2754_v56 = vld [vmem:[#allocation6 + $0x398] sm:$0xff] }
 0x1fa   : > { %v3253_v4 = vadd.f32 %v3252_v61, %v2998_v57  ;;  %v2489_v6 = vmul.f32 0.0625, %v2084_v0  ;;  %v2490_v7 = vmul.f32 0.0625, %v2086_v1 }
 0x1fc   : > { %v3254_v9 = vadd.f32 %v3253_v4, %v2999_v62  ;;  %v3001_v10 = vmul.f32 %v2745_v63, %v2489_v6  ;;  %2227 = vadd.xlane.f32.xlu0 %v1294_v2  ;;  %2229 = vadd.xlane.f32.xlu1 %v1295_v3  ;;  %v3002_v17 = vmul.f32 %v2746_v8, %v2490_v7  ;;  %v1304_v62 = vld [vmem:[%s4244_s26 + $0x5e0] sm:$0xff]  ;;  %v1305_v63 = vld [vmem:[%s4244_s26 + $0x5e8] sm:$0xff]  ;;  %v2757_v7 = vld [vmem:[#allocation6 + $0x3b0] sm:$0xff] }
 0x1fd   : > { %v2088_v12 = vpop.xlane.xlu0 %2087  ;;  %v2090_v13 = vpop.xlane.xlu1 %2089  ;;  %v2756_v4 = vld [vmem:[#allocation6 + $0x3a8] sm:$0xff] }
 0x1fe   : > { %v3255_v16 = vadd.f32 %v3254_v9, %v3000_v5  ;;  %v2491_v18 = vmul.f32 0.0625, %v2088_v12  ;;  %v2492_v19 = vmul.f32 0.0625, %v2090_v13 }
 0x200   : > { %v3256_v21 = vadd.f32 %v3255_v16, %v3001_v10  ;;  %v3003_v22 = vmul.f32 %v2747_v11, %v2491_v18  ;;  %2231 = vadd.xlane.f32.xlu0 %v1296_v14  ;;  %2233 = vadd.xlane.f32.xlu1 %v1297_v15  ;;  %v3004_v29 = vmul.f32 %v2748_v20, %v2492_v19  ;;  %v1306_v10 = vld [vmem:[%s4244_s26 + $0x5f0] sm:$0xff]  ;;  %v1307_v11 = vld [vmem:[%s4244_s26 + $0x5f8] sm:$0xff]  ;;  %v2759_v19 = vld [vmem:[#allocation6 + $0x3c0] sm:$0xff] }
 0x201   : > { %v2092_v24 = vpop.xlane.xlu0 %2091  ;;  %v2094_v25 = vpop.xlane.xlu1 %2093  ;;  %v2758_v16 = vld [vmem:[#allocation6 + $0x3b8] sm:$0xff] }
 0x202   : > { %v3257_v28 = vadd.f32 %v3256_v21, %v3002_v17  ;;  %v2493_v30 = vmul.f32 0.0625, %v2092_v24  ;;  %v2494_v31 = vmul.f32 0.0625, %v2094_v25 }
 0x204   : > { %v3258_v33 = vadd.f32 %v3257_v28, %v3003_v22  ;;  %v3005_v34 = vmul.f32 %v2749_v23, %v2493_v30  ;;  %2235 = vadd.xlane.f32.xlu0 %v1298_v26  ;;  %2237 = vadd.xlane.f32.xlu1 %v1299_v27  ;;  %v3006_v41 = vmul.f32 %v2750_v32, %v2494_v31  ;;  %v1356_v22 = vld [vmem:[%s4244_s26 + $0x600] sm:$0xff]  ;;  %v1357_v23 = vld [vmem:[%s4244_s26 + $0x608] sm:$0xff]  ;;  %v2761_v31 = vld [vmem:[#allocation6 + $0x3d0] sm:$0xff] }
 0x205   : > { %v2096_v36 = vpop.xlane.xlu0 %2095  ;;  %v2098_v37 = vpop.xlane.xlu1 %2097  ;;  %v2760_v28 = vld [vmem:[#allocation6 + $0x3c8] sm:$0xff] }
 0x206   : > { %v3259_v40 = vadd.f32 %v3258_v33, %v3004_v29  ;;  %v2495_v42 = vmul.f32 0.0625, %v2096_v36  ;;  %v2496_v43 = vmul.f32 0.0625, %v2098_v37 }
 0x208   : > { %v3260_v45 = vadd.f32 %v3259_v40, %v3005_v34  ;;  %v3007_v46 = vmul.f32 %v2751_v35, %v2495_v42  ;;  %2239 = vadd.xlane.f32.xlu0 %v1300_v38  ;;  %2241 = vadd.xlane.f32.xlu1 %v1301_v39  ;;  %v3008_v53 = vmul.f32 %v2752_v44, %v2496_v43  ;;  %v1358_v34 = vld [vmem:[%s4244_s26 + $0x610] sm:$0xff]  ;;  %v1359_v35 = vld [vmem:[%s4244_s26 + $0x618] sm:$0xff]  ;;  %v2763_v43 = vld [vmem:[#allocation6 + $0x3e0] sm:$0xff] }
 0x209   : > { %v2100_v48 = vpop.xlane.xlu0 %2099  ;;  %v2102_v49 = vpop.xlane.xlu1 %2101  ;;  %v2762_v40 = vld [vmem:[#allocation6 + $0x3d8] sm:$0xff] }
 0x20a   : > { %v3261_v52 = vadd.f32 %v3260_v45, %v3006_v41  ;;  %v2497_v54 = vmul.f32 0.0625, %v2100_v48  ;;  %v2498_v55 = vmul.f32 0.0625, %v2102_v49 }
 0x20c   : > { %v3262_v57 = vadd.f32 %v3261_v52, %v3007_v46  ;;  %v3009_v58 = vmul.f32 %v2753_v47, %v2497_v54  ;;  %2243 = vadd.xlane.f32.xlu0 %v1302_v50  ;;  %2245 = vadd.xlane.f32.xlu1 %v1303_v51  ;;  %v3010_v1 = vmul.f32 %v2754_v56, %v2498_v55  ;;  %v1360_v46 = vld [vmem:[%s4244_s26 + $0x620] sm:$0xff]  ;;  %v1361_v47 = vld [vmem:[%s4244_s26 + $0x628] sm:$0xff]  ;;  %v2765_v55 = vld [vmem:[#allocation6 + $0x3f0] sm:$0xff] }
 0x20d   : > { %v2104_v60 = vpop.xlane.xlu0 %2103  ;;  %v2106_v61 = vpop.xlane.xlu1 %2105  ;;  %v2764_v52 = vld [vmem:[#allocation6 + $0x3e8] sm:$0xff] }
 0x20e   : > { %v3263_v0 = vadd.f32 %v3262_v57, %v3008_v53  ;;  %v2499_v2 = vmul.f32 0.0625, %v2104_v60  ;;  %v2500_v3 = vmul.f32 0.0625, %v2106_v61 }
 0x210   : > { %v3264_v5 = vadd.f32 %v3263_v0, %v3009_v58  ;;  %v3011_v6 = vmul.f32 %v2755_v59, %v2499_v2  ;;  %2247 = vadd.xlane.f32.xlu0 %v1304_v62  ;;  %2249 = vadd.xlane.f32.xlu1 %v1305_v63  ;;  %v3012_v13 = vmul.f32 %v2756_v4, %v2500_v3  ;;  %v1362_v58 = vld [vmem:[%s4244_s26 + $0x630] sm:$0xff]  ;;  %v1363_v59 = vld [vmem:[%s4244_s26 + $0x638] sm:$0xff]  ;;  %v2767_v3 = vld [vmem:[#allocation6 + $0x400] sm:$0xff] }
 0x211   : > { %v2108_v8 = vpop.xlane.xlu0 %2107  ;;  %v2110_v9 = vpop.xlane.xlu1 %2109  ;;  %v2766_v0 = vld [vmem:[#allocation6 + $0x3f8] sm:$0xff] }
 0x212   : > { %v3265_v12 = vadd.f32 %v3264_v5, %v3010_v1  ;;  %v2501_v14 = vmul.f32 0.0625, %v2108_v8  ;;  %v2502_v15 = vmul.f32 0.0625, %v2110_v9 }
 0x214   : > { %v3266_v17 = vadd.f32 %v3265_v12, %v3011_v6  ;;  %v3013_v18 = vmul.f32 %v2757_v7, %v2501_v14  ;;  %2251 = vadd.xlane.f32.xlu0 %v1306_v10  ;;  %2253 = vadd.xlane.f32.xlu1 %v1307_v11  ;;  %v3014_v25 = vmul.f32 %v2758_v16, %v2502_v15  ;;  %v1364_v6 = vld [vmem:[%s4244_s26 + $0x640] sm:$0xff]  ;;  %v1365_v7 = vld [vmem:[%s4244_s26 + $0x648] sm:$0xff]  ;;  %v2769_v15 = vld [vmem:[#allocation6 + $0x410] sm:$0xff] }
 0x215   : > { %v2112_v20 = vpop.xlane.xlu0 %2111  ;;  %v2114_v21 = vpop.xlane.xlu1 %2113  ;;  %v2768_v12 = vld [vmem:[#allocation6 + $0x408] sm:$0xff] }
 0x216   : > { %v3267_v24 = vadd.f32 %v3266_v17, %v3012_v13  ;;  %v2503_v26 = vmul.f32 0.0625, %v2112_v20  ;;  %v2504_v27 = vmul.f32 0.0625, %v2114_v21 }
 0x218   : > { %v3268_v29 = vadd.f32 %v3267_v24, %v3013_v18  ;;  %v3015_v30 = vmul.f32 %v2759_v19, %v2503_v26  ;;  %2255 = vadd.xlane.f32.xlu0 %v1356_v22  ;;  %2257 = vadd.xlane.f32.xlu1 %v1357_v23  ;;  %v3016_v37 = vmul.f32 %v2760_v28, %v2504_v27  ;;  %v1366_v18 = vld [vmem:[%s4244_s26 + $0x650] sm:$0xff]  ;;  %v1367_v19 = vld [vmem:[%s4244_s26 + $0x658] sm:$0xff]  ;;  %v2771_v27 = vld [vmem:[#allocation6 + $0x420] sm:$0xff] }
 0x219   : > { %v2116_v32 = vpop.xlane.xlu0 %2115  ;;  %v2118_v33 = vpop.xlane.xlu1 %2117  ;;  %v2770_v24 = vld [vmem:[#allocation6 + $0x418] sm:$0xff] }
 0x21a   : > { %v3269_v36 = vadd.f32 %v3268_v29, %v3014_v25  ;;  %v2505_v38 = vmul.f32 0.0625, %v2116_v32  ;;  %v2506_v39 = vmul.f32 0.0625, %v2118_v33 }
 0x21c   : > { %v3270_v41 = vadd.f32 %v3269_v36, %v3015_v30  ;;  %v3017_v42 = vmul.f32 %v2761_v31, %v2505_v38  ;;  %2259 = vadd.xlane.f32.xlu0 %v1358_v34  ;;  %2261 = vadd.xlane.f32.xlu1 %v1359_v35  ;;  %v3018_v49 = vmul.f32 %v2762_v40, %v2506_v39  ;;  %v1368_v30 = vld [vmem:[%s4244_s26 + $0x660] sm:$0xff]  ;;  %v1369_v31 = vld [vmem:[%s4244_s26 + $0x668] sm:$0xff]  ;;  %v2773_v39 = vld [vmem:[#allocation6 + $0x430] sm:$0xff] }
 0x21d   : > { %v2120_v44 = vpop.xlane.xlu0 %2119  ;;  %v2122_v45 = vpop.xlane.xlu1 %2121  ;;  %v2772_v36 = vld [vmem:[#allocation6 + $0x428] sm:$0xff] }
 0x21e   : > { %v3271_v48 = vadd.f32 %v3270_v41, %v3016_v37  ;;  %v2507_v50 = vmul.f32 0.0625, %v2120_v44  ;;  %v2508_v51 = vmul.f32 0.0625, %v2122_v45 }
 0x220   : > { %v3272_v53 = vadd.f32 %v3271_v48, %v3017_v42  ;;  %v3019_v54 = vmul.f32 %v2763_v43, %v2507_v50  ;;  %2263 = vadd.xlane.f32.xlu0 %v1360_v46  ;;  %2265 = vadd.xlane.f32.xlu1 %v1361_v47  ;;  %v3020_v61 = vmul.f32 %v2764_v52, %v2508_v51  ;;  %v1370_v42 = vld [vmem:[%s4244_s26 + $0x670] sm:$0xff]  ;;  %v1371_v43 = vld [vmem:[%s4244_s26 + $0x678] sm:$0xff]  ;;  %v2775_v51 = vld [vmem:[#allocation6 + $0x440] sm:$0xff] }
 0x221   : > { %v2124_v56 = vpop.xlane.xlu0 %2123  ;;  %v2126_v57 = vpop.xlane.xlu1 %2125  ;;  %v2774_v48 = vld [vmem:[#allocation6 + $0x438] sm:$0xff] }
 0x222   : > { %v3273_v60 = vadd.f32 %v3272_v53, %v3018_v49  ;;  %v2509_v62 = vmul.f32 0.0625, %v2124_v56  ;;  %v2510_v63 = vmul.f32 0.0625, %v2126_v57 }
 0x224   : > { %v3274_v1 = vadd.f32 %v3273_v60, %v3019_v54  ;;  %v3021_v2 = vmul.f32 %v2765_v55, %v2509_v62  ;;  %2267 = vadd.xlane.f32.xlu0 %v1362_v58  ;;  %2269 = vadd.xlane.f32.xlu1 %v1363_v59  ;;  %v3022_v9 = vmul.f32 %v2766_v0, %v2510_v63  ;;  %v1420_v54 = vld [vmem:[%s4244_s26 + $0x680] sm:$0xff]  ;;  %v1421_v55 = vld [vmem:[%s4244_s26 + $0x688] sm:$0xff]  ;;  %v2777_v63 = vld [vmem:[#allocation6 + $0x450] sm:$0xff] }
 0x225   : > { %v2128_v4 = vpop.xlane.xlu0 %2127  ;;  %v2130_v5 = vpop.xlane.xlu1 %2129  ;;  %v2776_v60 = vld [vmem:[#allocation6 + $0x448] sm:$0xff] }
 0x226   : > { %v3275_v8 = vadd.f32 %v3274_v1, %v3020_v61  ;;  %v2511_v10 = vmul.f32 0.0625, %v2128_v4  ;;  %v2512_v11 = vmul.f32 0.0625, %v2130_v5 }
 0x228   : > { %v3276_v13 = vadd.f32 %v3275_v8, %v3021_v2  ;;  %v3023_v14 = vmul.f32 %v2767_v3, %v2511_v10  ;;  %2271 = vadd.xlane.f32.xlu0 %v1364_v6  ;;  %2273 = vadd.xlane.f32.xlu1 %v1365_v7  ;;  %v3024_v21 = vmul.f32 %v2768_v12, %v2512_v11  ;;  %v1422_v2 = vld [vmem:[%s4244_s26 + $0x690] sm:$0xff]  ;;  %v1423_v3 = vld [vmem:[%s4244_s26 + $0x698] sm:$0xff]  ;;  %v2779_v11 = vld [vmem:[#allocation6 + $0x460] sm:$0xff] }
 0x229   : > { %v2132_v16 = vpop.xlane.xlu0 %2131  ;;  %v2134_v17 = vpop.xlane.xlu1 %2133  ;;  %v2778_v8 = vld [vmem:[#allocation6 + $0x458] sm:$0xff] }
 0x22a   : > { %v3277_v20 = vadd.f32 %v3276_v13, %v3022_v9  ;;  %v2513_v22 = vmul.f32 0.0625, %v2132_v16  ;;  %v2514_v23 = vmul.f32 0.0625, %v2134_v17 }
 0x22c   : > { %v3278_v25 = vadd.f32 %v3277_v20, %v3023_v14  ;;  %v3025_v26 = vmul.f32 %v2769_v15, %v2513_v22  ;;  %2275 = vadd.xlane.f32.xlu0 %v1366_v18  ;;  %2277 = vadd.xlane.f32.xlu1 %v1367_v19  ;;  %v3026_v33 = vmul.f32 %v2770_v24, %v2514_v23  ;;  %v1424_v14 = vld [vmem:[%s4244_s26 + $0x6a0] sm:$0xff]  ;;  %v1425_v15 = vld [vmem:[%s4244_s26 + $0x6a8] sm:$0xff]  ;;  %v2781_v23 = vld [vmem:[#allocation6 + $0x470] sm:$0xff] }
 0x22d   : > { %v2136_v28 = vpop.xlane.xlu0 %2135  ;;  %v2138_v29 = vpop.xlane.xlu1 %2137  ;;  %v2780_v20 = vld [vmem:[#allocation6 + $0x468] sm:$0xff] }
 0x22e   : > { %v3279_v32 = vadd.f32 %v3278_v25, %v3024_v21  ;;  %v2515_v34 = vmul.f32 0.0625, %v2136_v28  ;;  %v2516_v35 = vmul.f32 0.0625, %v2138_v29 }
 0x230   : > { %v3280_v37 = vadd.f32 %v3279_v32, %v3025_v26  ;;  %v3027_v38 = vmul.f32 %v2771_v27, %v2515_v34  ;;  %2279 = vadd.xlane.f32.xlu0 %v1368_v30  ;;  %2281 = vadd.xlane.f32.xlu1 %v1369_v31  ;;  %v3028_v45 = vmul.f32 %v2772_v36, %v2516_v35  ;;  %v1426_v26 = vld [vmem:[%s4244_s26 + $0x6b0] sm:$0xff]  ;;  %v1427_v27 = vld [vmem:[%s4244_s26 + $0x6b8] sm:$0xff]  ;;  %v2783_v35 = vld [vmem:[#allocation6 + $0x480] sm:$0xff] }
 0x231   : > { %v2140_v40 = vpop.xlane.xlu0 %2139  ;;  %v2142_v41 = vpop.xlane.xlu1 %2141  ;;  %v2782_v32 = vld [vmem:[#allocation6 + $0x478] sm:$0xff] }
 0x232   : > { %v3281_v44 = vadd.f32 %v3280_v37, %v3026_v33  ;;  %v2517_v46 = vmul.f32 0.0625, %v2140_v40  ;;  %v2518_v47 = vmul.f32 0.0625, %v2142_v41 }
 0x234   : > { %v3282_v49 = vadd.f32 %v3281_v44, %v3027_v38  ;;  %v3029_v50 = vmul.f32 %v2773_v39, %v2517_v46  ;;  %2283 = vadd.xlane.f32.xlu0 %v1370_v42  ;;  %2285 = vadd.xlane.f32.xlu1 %v1371_v43  ;;  %v3030_v57 = vmul.f32 %v2774_v48, %v2518_v47  ;;  %v1428_v38 = vld [vmem:[%s4244_s26 + $0x6c0] sm:$0xff]  ;;  %v1429_v39 = vld [vmem:[%s4244_s26 + $0x6c8] sm:$0xff]  ;;  %v2785_v47 = vld [vmem:[#allocation6 + $0x490] sm:$0xff] }
 0x235   : > { %v2144_v52 = vpop.xlane.xlu0 %2143  ;;  %v2146_v53 = vpop.xlane.xlu1 %2145  ;;  %v2784_v44 = vld [vmem:[#allocation6 + $0x488] sm:$0xff] }
 0x236   : > { %v3283_v56 = vadd.f32 %v3282_v49, %v3028_v45  ;;  %v2519_v58 = vmul.f32 0.0625, %v2144_v52  ;;  %v2520_v59 = vmul.f32 0.0625, %v2146_v53 }
 0x238   : > { %v3284_v61 = vadd.f32 %v3283_v56, %v3029_v50  ;;  %v3031_v62 = vmul.f32 %v2775_v51, %v2519_v58  ;;  %2287 = vadd.xlane.f32.xlu0 %v1420_v54  ;;  %2289 = vadd.xlane.f32.xlu1 %v1421_v55  ;;  %v3032_v5 = vmul.f32 %v2776_v60, %v2520_v59  ;;  %v1430_v50 = vld [vmem:[%s4244_s26 + $0x6d0] sm:$0xff]  ;;  %v1431_v51 = vld [vmem:[%s4244_s26 + $0x6d8] sm:$0xff]  ;;  %v2787_v59 = vld [vmem:[#allocation6 + $0x4a0] sm:$0xff] }
 0x239   : > { %v2148_v0 = vpop.xlane.xlu0 %2147  ;;  %v2150_v1 = vpop.xlane.xlu1 %2149  ;;  %v2786_v56 = vld [vmem:[#allocation6 + $0x498] sm:$0xff] }
 0x23a   : > { %v3285_v4 = vadd.f32 %v3284_v61, %v3030_v57  ;;  %v2521_v6 = vmul.f32 0.0625, %v2148_v0  ;;  %v2522_v7 = vmul.f32 0.0625, %v2150_v1 }
 0x23c   : > { %v3286_v9 = vadd.f32 %v3285_v4, %v3031_v62  ;;  %v3033_v10 = vmul.f32 %v2777_v63, %v2521_v6  ;;  %2291 = vadd.xlane.f32.xlu0 %v1422_v2  ;;  %2293 = vadd.xlane.f32.xlu1 %v1423_v3  ;;  %v3034_v17 = vmul.f32 %v2778_v8, %v2522_v7  ;;  %v1432_v62 = vld [vmem:[%s4244_s26 + $0x6e0] sm:$0xff]  ;;  %v1433_v63 = vld [vmem:[%s4244_s26 + $0x6e8] sm:$0xff]  ;;  %v2789_v7 = vld [vmem:[#allocation6 + $0x4b0] sm:$0xff] }
 0x23d   : > { %v2152_v12 = vpop.xlane.xlu0 %2151  ;;  %v2154_v13 = vpop.xlane.xlu1 %2153  ;;  %v2788_v4 = vld [vmem:[#allocation6 + $0x4a8] sm:$0xff] }
 0x23e   : > { %v3287_v16 = vadd.f32 %v3286_v9, %v3032_v5  ;;  %v2523_v18 = vmul.f32 0.0625, %v2152_v12  ;;  %v2524_v19 = vmul.f32 0.0625, %v2154_v13 }
 0x240   : > { %v3288_v21 = vadd.f32 %v3287_v16, %v3033_v10  ;;  %v3035_v22 = vmul.f32 %v2779_v11, %v2523_v18  ;;  %2295 = vadd.xlane.f32.xlu0 %v1424_v14  ;;  %2297 = vadd.xlane.f32.xlu1 %v1425_v15  ;;  %v3036_v29 = vmul.f32 %v2780_v20, %v2524_v19  ;;  %v1434_v10 = vld [vmem:[%s4244_s26 + $0x6f0] sm:$0xff]  ;;  %v1435_v11 = vld [vmem:[%s4244_s26 + $0x6f8] sm:$0xff]  ;;  %v2791_v19 = vld [vmem:[#allocation6 + $0x4c0] sm:$0xff] }
 0x241   : > { %v2156_v24 = vpop.xlane.xlu0 %2155  ;;  %v2158_v25 = vpop.xlane.xlu1 %2157  ;;  %v2790_v16 = vld [vmem:[#allocation6 + $0x4b8] sm:$0xff] }
 0x242   : > { %v3289_v28 = vadd.f32 %v3288_v21, %v3034_v17  ;;  %v2525_v30 = vmul.f32 0.0625, %v2156_v24  ;;  %v2526_v31 = vmul.f32 0.0625, %v2158_v25 }
 0x244   : > { %v3290_v33 = vadd.f32 %v3289_v28, %v3035_v22  ;;  %v3037_v34 = vmul.f32 %v2781_v23, %v2525_v30  ;;  %2299 = vadd.xlane.f32.xlu0 %v1426_v26  ;;  %2301 = vadd.xlane.f32.xlu1 %v1427_v27  ;;  %v3038_v41 = vmul.f32 %v2782_v32, %v2526_v31  ;;  %v1484_v22 = vld [vmem:[%s4244_s26 + $0x700] sm:$0xff]  ;;  %v1485_v23 = vld [vmem:[%s4244_s26 + $0x708] sm:$0xff]  ;;  %v2793_v31 = vld [vmem:[#allocation6 + $0x4d0] sm:$0xff] }
 0x245   : > { %v2160_v36 = vpop.xlane.xlu0 %2159  ;;  %v2162_v37 = vpop.xlane.xlu1 %2161  ;;  %v2792_v28 = vld [vmem:[#allocation6 + $0x4c8] sm:$0xff] }
 0x246   : > { %v3291_v40 = vadd.f32 %v3290_v33, %v3036_v29  ;;  %v2527_v42 = vmul.f32 0.0625, %v2160_v36  ;;  %v2528_v43 = vmul.f32 0.0625, %v2162_v37 }
 0x248   : > { %v3292_v45 = vadd.f32 %v3291_v40, %v3037_v34  ;;  %v3039_v46 = vmul.f32 %v2783_v35, %v2527_v42  ;;  %2303 = vadd.xlane.f32.xlu0 %v1428_v38  ;;  %2305 = vadd.xlane.f32.xlu1 %v1429_v39  ;;  %v3040_v53 = vmul.f32 %v2784_v44, %v2528_v43  ;;  %v1486_v34 = vld [vmem:[%s4244_s26 + $0x710] sm:$0xff]  ;;  %v1487_v35 = vld [vmem:[%s4244_s26 + $0x718] sm:$0xff]  ;;  %v2795_v43 = vld [vmem:[#allocation6 + $0x4e0] sm:$0xff] }
 0x249   : > { %v2164_v48 = vpop.xlane.xlu0 %2163  ;;  %v2166_v49 = vpop.xlane.xlu1 %2165  ;;  %v2794_v40 = vld [vmem:[#allocation6 + $0x4d8] sm:$0xff] }
 0x24a   : > { %v3293_v52 = vadd.f32 %v3292_v45, %v3038_v41  ;;  %v2529_v54 = vmul.f32 0.0625, %v2164_v48  ;;  %v2530_v55 = vmul.f32 0.0625, %v2166_v49 }
 0x24c   : > { %v3294_v57 = vadd.f32 %v3293_v52, %v3039_v46  ;;  %v3041_v58 = vmul.f32 %v2785_v47, %v2529_v54  ;;  %2307 = vadd.xlane.f32.xlu0 %v1430_v50  ;;  %2309 = vadd.xlane.f32.xlu1 %v1431_v51  ;;  %v3042_v1 = vmul.f32 %v2786_v56, %v2530_v55  ;;  %v1488_v46 = vld [vmem:[%s4244_s26 + $0x720] sm:$0xff]  ;;  %v1489_v47 = vld [vmem:[%s4244_s26 + $0x728] sm:$0xff]  ;;  %v2797_v55 = vld [vmem:[#allocation6 + $0x4f0] sm:$0xff] }
 0x24d   : > { %v2168_v60 = vpop.xlane.xlu0 %2167  ;;  %v2170_v61 = vpop.xlane.xlu1 %2169  ;;  %v2796_v52 = vld [vmem:[#allocation6 + $0x4e8] sm:$0xff] }
 0x24e   : > { %v3295_v0 = vadd.f32 %v3294_v57, %v3040_v53  ;;  %v2531_v2 = vmul.f32 0.0625, %v2168_v60  ;;  %v2532_v3 = vmul.f32 0.0625, %v2170_v61 }
 0x250   : > { %v3296_v5 = vadd.f32 %v3295_v0, %v3041_v58  ;;  %v3043_v6 = vmul.f32 %v2787_v59, %v2531_v2  ;;  %2311 = vadd.xlane.f32.xlu0 %v1432_v62  ;;  %2313 = vadd.xlane.f32.xlu1 %v1433_v63  ;;  %v3044_v13 = vmul.f32 %v2788_v4, %v2532_v3  ;;  %v1490_v58 = vld [vmem:[%s4244_s26 + $0x730] sm:$0xff]  ;;  %v1491_v59 = vld [vmem:[%s4244_s26 + $0x738] sm:$0xff]  ;;  %v2799_v3 = vld [vmem:[#allocation6 + $0x500] sm:$0xff] }
 0x251   : > { %v2172_v8 = vpop.xlane.xlu0 %2171  ;;  %v2174_v9 = vpop.xlane.xlu1 %2173  ;;  %v2798_v0 = vld [vmem:[#allocation6 + $0x4f8] sm:$0xff] }
 0x252   : > { %v3297_v12 = vadd.f32 %v3296_v5, %v3042_v1  ;;  %v2533_v14 = vmul.f32 0.0625, %v2172_v8  ;;  %v2534_v15 = vmul.f32 0.0625, %v2174_v9 }
 0x254   : > { %v3298_v17 = vadd.f32 %v3297_v12, %v3043_v6  ;;  %v3045_v18 = vmul.f32 %v2789_v7, %v2533_v14  ;;  %2315 = vadd.xlane.f32.xlu0 %v1434_v10  ;;  %2317 = vadd.xlane.f32.xlu1 %v1435_v11  ;;  %v3046_v25 = vmul.f32 %v2790_v16, %v2534_v15  ;;  %v1492_v6 = vld [vmem:[%s4244_s26 + $0x740] sm:$0xff]  ;;  %v1493_v7 = vld [vmem:[%s4244_s26 + $0x748] sm:$0xff]  ;;  %v2801_v15 = vld [vmem:[#allocation6 + $0x510] sm:$0xff] }
 0x255   : > { %v2176_v20 = vpop.xlane.xlu0 %2175  ;;  %v2178_v21 = vpop.xlane.xlu1 %2177  ;;  %v2800_v12 = vld [vmem:[#allocation6 + $0x508] sm:$0xff] }
 0x256   : > { %v3299_v24 = vadd.f32 %v3298_v17, %v3044_v13  ;;  %v2535_v26 = vmul.f32 0.0625, %v2176_v20  ;;  %v2536_v27 = vmul.f32 0.0625, %v2178_v21 }
 0x258   : > { %v3300_v29 = vadd.f32 %v3299_v24, %v3045_v18  ;;  %v3047_v30 = vmul.f32 %v2791_v19, %v2535_v26  ;;  %2319 = vadd.xlane.f32.xlu0 %v1484_v22  ;;  %2321 = vadd.xlane.f32.xlu1 %v1485_v23  ;;  %v3048_v37 = vmul.f32 %v2792_v28, %v2536_v27  ;;  %v1494_v18 = vld [vmem:[%s4244_s26 + $0x750] sm:$0xff]  ;;  %v1495_v19 = vld [vmem:[%s4244_s26 + $0x758] sm:$0xff]  ;;  %v2803_v27 = vld [vmem:[#allocation6 + $0x520] sm:$0xff] }
 0x259   : > { %v2180_v32 = vpop.xlane.xlu0 %2179  ;;  %v2182_v33 = vpop.xlane.xlu1 %2181  ;;  %v2802_v24 = vld [vmem:[#allocation6 + $0x518] sm:$0xff] }
 0x25a   : > { %v3301_v36 = vadd.f32 %v3300_v29, %v3046_v25  ;;  %v2537_v38 = vmul.f32 0.0625, %v2180_v32  ;;  %v2538_v39 = vmul.f32 0.0625, %v2182_v33 }
 0x25c   : > { %v3302_v41 = vadd.f32 %v3301_v36, %v3047_v30  ;;  %v3049_v42 = vmul.f32 %v2793_v31, %v2537_v38  ;;  %2323 = vadd.xlane.f32.xlu0 %v1486_v34  ;;  %2325 = vadd.xlane.f32.xlu1 %v1487_v35  ;;  %v3050_v49 = vmul.f32 %v2794_v40, %v2538_v39  ;;  %v1496_v30 = vld [vmem:[%s4244_s26 + $0x760] sm:$0xff]  ;;  %v1497_v31 = vld [vmem:[%s4244_s26 + $0x768] sm:$0xff]  ;;  %v2805_v39 = vld [vmem:[#allocation6 + $0x530] sm:$0xff] }
 0x25d   : > { %v2184_v44 = vpop.xlane.xlu0 %2183  ;;  %v2186_v45 = vpop.xlane.xlu1 %2185  ;;  %v2804_v36 = vld [vmem:[#allocation6 + $0x528] sm:$0xff] }
 0x25e   : > { %v3303_v48 = vadd.f32 %v3302_v41, %v3048_v37  ;;  %v2539_v50 = vmul.f32 0.0625, %v2184_v44  ;;  %v2540_v51 = vmul.f32 0.0625, %v2186_v45 }
 0x260   : > { %v3304_v53 = vadd.f32 %v3303_v48, %v3049_v42  ;;  %v3051_v54 = vmul.f32 %v2795_v43, %v2539_v50  ;;  %2327 = vadd.xlane.f32.xlu0 %v1488_v46  ;;  %2329 = vadd.xlane.f32.xlu1 %v1489_v47  ;;  %v3052_v61 = vmul.f32 %v2796_v52, %v2540_v51  ;;  %v1498_v42 = vld [vmem:[%s4244_s26 + $0x770] sm:$0xff]  ;;  %v1499_v43 = vld [vmem:[%s4244_s26 + $0x778] sm:$0xff]  ;;  %v2807_v51 = vld [vmem:[#allocation6 + $0x540] sm:$0xff] }
 0x261   : > { %v2188_v56 = vpop.xlane.xlu0 %2187  ;;  %v2190_v57 = vpop.xlane.xlu1 %2189  ;;  %v2806_v48 = vld [vmem:[#allocation6 + $0x538] sm:$0xff] }
 0x262   : > { %v3305_v60 = vadd.f32 %v3304_v53, %v3050_v49  ;;  %v2541_v62 = vmul.f32 0.0625, %v2188_v56  ;;  %v2542_v63 = vmul.f32 0.0625, %v2190_v57 }
 0x264   : > { %v3306_v1 = vadd.f32 %v3305_v60, %v3051_v54  ;;  %v3053_v2 = vmul.f32 %v2797_v55, %v2541_v62  ;;  %2331 = vadd.xlane.f32.xlu0 %v1490_v58  ;;  %2333 = vadd.xlane.f32.xlu1 %v1491_v59  ;;  %v3054_v9 = vmul.f32 %v2798_v0, %v2542_v63  ;;  %v1548_v54 = vld [vmem:[%s4244_s26 + $0x780] sm:$0xff]  ;;  %v1549_v55 = vld [vmem:[%s4244_s26 + $0x788] sm:$0xff]  ;;  %v2809_v63 = vld [vmem:[#allocation6 + $0x550] sm:$0xff] }
 0x265   : > { %v2192_v4 = vpop.xlane.xlu0 %2191  ;;  %v2194_v5 = vpop.xlane.xlu1 %2193  ;;  %v2808_v60 = vld [vmem:[#allocation6 + $0x548] sm:$0xff] }
 0x266   : > { %v3307_v8 = vadd.f32 %v3306_v1, %v3052_v61  ;;  %v2543_v10 = vmul.f32 0.0625, %v2192_v4  ;;  %v2544_v11 = vmul.f32 0.0625, %v2194_v5 }
 0x268   : > { %v3308_v13 = vadd.f32 %v3307_v8, %v3053_v2  ;;  %v3055_v14 = vmul.f32 %v2799_v3, %v2543_v10  ;;  %2335 = vadd.xlane.f32.xlu0 %v1492_v6  ;;  %2337 = vadd.xlane.f32.xlu1 %v1493_v7  ;;  %v3056_v21 = vmul.f32 %v2800_v12, %v2544_v11  ;;  %v1550_v2 = vld [vmem:[%s4244_s26 + $0x790] sm:$0xff]  ;;  %v1551_v3 = vld [vmem:[%s4244_s26 + $0x798] sm:$0xff]  ;;  %v2811_v11 = vld [vmem:[#allocation6 + $0x560] sm:$0xff] }
 0x269   : > { %v2196_v16 = vpop.xlane.xlu0 %2195  ;;  %v2198_v17 = vpop.xlane.xlu1 %2197  ;;  %v2810_v8 = vld [vmem:[#allocation6 + $0x558] sm:$0xff] }
 0x26a   : > { %v3309_v20 = vadd.f32 %v3308_v13, %v3054_v9  ;;  %v2545_v22 = vmul.f32 0.0625, %v2196_v16  ;;  %v2546_v23 = vmul.f32 0.0625, %v2198_v17 }
 0x26c   : > { %v3310_v25 = vadd.f32 %v3309_v20, %v3055_v14  ;;  %v3057_v26 = vmul.f32 %v2801_v15, %v2545_v22  ;;  %2339 = vadd.xlane.f32.xlu0 %v1494_v18  ;;  %2341 = vadd.xlane.f32.xlu1 %v1495_v19  ;;  %v3058_v33 = vmul.f32 %v2802_v24, %v2546_v23  ;;  %v1552_v14 = vld [vmem:[%s4244_s26 + $0x7a0] sm:$0xff]  ;;  %v1553_v15 = vld [vmem:[%s4244_s26 + $0x7a8] sm:$0xff]  ;;  %v2813_v23 = vld [vmem:[#allocation6 + $0x570] sm:$0xff] }
 0x26d   : > { %v2200_v28 = vpop.xlane.xlu0 %2199  ;;  %v2202_v29 = vpop.xlane.xlu1 %2201  ;;  %v2812_v20 = vld [vmem:[#allocation6 + $0x568] sm:$0xff] }
 0x26e   : > { %v3311_v32 = vadd.f32 %v3310_v25, %v3056_v21  ;;  %v2547_v34 = vmul.f32 0.0625, %v2200_v28  ;;  %v2548_v35 = vmul.f32 0.0625, %v2202_v29 }
 0x270   : > { %v3312_v37 = vadd.f32 %v3311_v32, %v3057_v26  ;;  %v3059_v38 = vmul.f32 %v2803_v27, %v2547_v34  ;;  %2343 = vadd.xlane.f32.xlu0 %v1496_v30  ;;  %2345 = vadd.xlane.f32.xlu1 %v1497_v31  ;;  %v3060_v45 = vmul.f32 %v2804_v36, %v2548_v35  ;;  %v1554_v26 = vld [vmem:[%s4244_s26 + $0x7b0] sm:$0xff]  ;;  %v1555_v27 = vld [vmem:[%s4244_s26 + $0x7b8] sm:$0xff]  ;;  %v2815_v35 = vld [vmem:[#allocation6 + $0x580] sm:$0xff] }
 0x271   : > { %v2204_v40 = vpop.xlane.xlu0 %2203  ;;  %v2206_v41 = vpop.xlane.xlu1 %2205  ;;  %v2814_v32 = vld [vmem:[#allocation6 + $0x578] sm:$0xff] }
 0x272   : > { %v3313_v44 = vadd.f32 %v3312_v37, %v3058_v33  ;;  %v2549_v46 = vmul.f32 0.0625, %v2204_v40  ;;  %v2550_v47 = vmul.f32 0.0625, %v2206_v41 }
 0x274   : > { %v3314_v49 = vadd.f32 %v3313_v44, %v3059_v38  ;;  %v3061_v50 = vmul.f32 %v2805_v39, %v2549_v46  ;;  %2347 = vadd.xlane.f32.xlu0 %v1498_v42  ;;  %2349 = vadd.xlane.f32.xlu1 %v1499_v43  ;;  %v3062_v57 = vmul.f32 %v2806_v48, %v2550_v47  ;;  %v1556_v38 = vld [vmem:[%s4244_s26 + $0x7c0] sm:$0xff]  ;;  %v1557_v39 = vld [vmem:[%s4244_s26 + $0x7c8] sm:$0xff]  ;;  %v2817_v47 = vld [vmem:[#allocation6 + $0x590] sm:$0xff] }
 0x275   : > { %v2208_v52 = vpop.xlane.xlu0 %2207  ;;  %v2210_v53 = vpop.xlane.xlu1 %2209  ;;  %v2816_v44 = vld [vmem:[#allocation6 + $0x588] sm:$0xff] }
 0x276   : > { %v3315_v56 = vadd.f32 %v3314_v49, %v3060_v45  ;;  %v2551_v58 = vmul.f32 0.0625, %v2208_v52  ;;  %v2552_v59 = vmul.f32 0.0625, %v2210_v53 }
 0x278   : > { %v3316_v61 = vadd.f32 %v3315_v56, %v3061_v50  ;;  %v3063_v62 = vmul.f32 %v2807_v51, %v2551_v58  ;;  %2351 = vadd.xlane.f32.xlu0 %v1548_v54  ;;  %2353 = vadd.xlane.f32.xlu1 %v1549_v55  ;;  %v3064_v5 = vmul.f32 %v2808_v60, %v2552_v59  ;;  %v1558_v50 = vld [vmem:[%s4244_s26 + $0x7d0] sm:$0xff]  ;;  %v1559_v51 = vld [vmem:[%s4244_s26 + $0x7d8] sm:$0xff]  ;;  %v2819_v59 = vld [vmem:[#allocation6 + $0x5a0] sm:$0xff] }
 0x279   : > { %v2212_v0 = vpop.xlane.xlu0 %2211  ;;  %v2214_v1 = vpop.xlane.xlu1 %2213  ;;  %v2818_v56 = vld [vmem:[#allocation6 + $0x598] sm:$0xff] }
 0x27a   : > { %v3317_v4 = vadd.f32 %v3316_v61, %v3062_v57  ;;  %v2553_v6 = vmul.f32 0.0625, %v2212_v0  ;;  %v2554_v7 = vmul.f32 0.0625, %v2214_v1 }
 0x27c   : > { %v3318_v9 = vadd.f32 %v3317_v4, %v3063_v62  ;;  %v3065_v10 = vmul.f32 %v2809_v63, %v2553_v6  ;;  %2355 = vadd.xlane.f32.xlu0 %v1550_v2  ;;  %2357 = vadd.xlane.f32.xlu1 %v1551_v3  ;;  %v3066_v17 = vmul.f32 %v2810_v8, %v2554_v7  ;;  %v1560_v62 = vld [vmem:[%s4244_s26 + $0x7e0] sm:$0xff]  ;;  %v1561_v63 = vld [vmem:[%s4244_s26 + $0x7e8] sm:$0xff]  ;;  %v2821_v7 = vld [vmem:[#allocation6 + $0x5b0] sm:$0xff] }
 0x27d   : > { %v2216_v12 = vpop.xlane.xlu0 %2215  ;;  %v2218_v13 = vpop.xlane.xlu1 %2217  ;;  %v2820_v4 = vld [vmem:[#allocation6 + $0x5a8] sm:$0xff] }
 0x27e   : > { %v3319_v16 = vadd.f32 %v3318_v9, %v3064_v5  ;;  %v2555_v18 = vmul.f32 0.0625, %v2216_v12  ;;  %v2556_v19 = vmul.f32 0.0625, %v2218_v13 }
 0x280   : > { %v3320_v21 = vadd.f32 %v3319_v16, %v3065_v10  ;;  %v3067_v22 = vmul.f32 %v2811_v11, %v2555_v18  ;;  %2359 = vadd.xlane.f32.xlu0 %v1552_v14  ;;  %2361 = vadd.xlane.f32.xlu1 %v1553_v15  ;;  %v3068_v29 = vmul.f32 %v2812_v20, %v2556_v19  ;;  %v1562_v10 = vld [vmem:[%s4244_s26 + $0x7f0] sm:$0xff]  ;;  %v1563_v11 = vld [vmem:[%s4244_s26 + $0x7f8] sm:$0xff]  ;;  %v2823_v19 = vld [vmem:[#allocation6 + $0x5c0] sm:$0xff] }
 0x281   : > { %v2220_v24 = vpop.xlane.xlu0 %2219  ;;  %v2222_v25 = vpop.xlane.xlu1 %2221  ;;  %v2822_v16 = vld [vmem:[#allocation6 + $0x5b8] sm:$0xff] }
 0x282   : > { %v3321_v28 = vadd.f32 %v3320_v21, %v3066_v17  ;;  %v2557_v30 = vmul.f32 0.0625, %v2220_v24  ;;  %v2558_v31 = vmul.f32 0.0625, %v2222_v25 }
 0x284   : > { %v3322_v33 = vadd.f32 %v3321_v28, %v3067_v22  ;;  %v3069_v34 = vmul.f32 %v2813_v23, %v2557_v30  ;;  %2363 = vadd.xlane.f32.xlu0 %v1554_v26  ;;  %2365 = vadd.xlane.f32.xlu1 %v1555_v27  ;;  %v3070_v41 = vmul.f32 %v2814_v32, %v2558_v31  ;;  %v2824_v26 = vld [vmem:[#allocation6 + $0x5c8] sm:$0xff] }
 0x285   : > { %v2224_v36 = vpop.xlane.xlu0 %2223  ;;  %v2226_v37 = vpop.xlane.xlu1 %2225 }
 0x286   : > { %v3323_v40 = vadd.f32 %v3322_v33, %v3068_v29  ;;  %v2559_v42 = vmul.f32 0.0625, %v2224_v36  ;;  %v2560_v43 = vmul.f32 0.0625, %v2226_v37  ;;  %v2825_v29 = vld [vmem:[#allocation6 + $0x5d0] sm:$0xff]  ;;  %v2826_v36 = vld [vmem:[#allocation6 + $0x5d8] sm:$0xff] }
 0x288   : > { %v3324_v45 = vadd.f32 %v3323_v40, %v3069_v34  ;;  %v3071_v46 = vmul.f32 %v2815_v35, %v2559_v42  ;;  %2367 = vadd.xlane.f32.xlu0 %v1556_v38  ;;  %2369 = vadd.xlane.f32.xlu1 %v1557_v39  ;;  %v3072_v53 = vmul.f32 %v2816_v44, %v2560_v43  ;;  %v2827_v39 = vld [vmem:[#allocation6 + $0x5e0] sm:$0xff] }
 0x289   : > { %v2228_v48 = vpop.xlane.xlu0 %2227  ;;  %v2230_v49 = vpop.xlane.xlu1 %2229 }
 0x28a   : > { %v3325_v52 = vadd.f32 %v3324_v45, %v3070_v41  ;;  %v2561_v54 = vmul.f32 0.0625, %v2228_v48  ;;  %v2562_v55 = vmul.f32 0.0625, %v2230_v49  ;;  %v2829_v49 = vld [vmem:[#allocation6 + $0x5f0] sm:$0xff] }
 0x28c   : > { %v3326_v57 = vadd.f32 %v3325_v52, %v3071_v46  ;;  %v3073_v58 = vmul.f32 %v2817_v47, %v2561_v54  ;;  %2371 = vadd.xlane.f32.xlu0 %v1558_v50  ;;  %2373 = vadd.xlane.f32.xlu1 %v1559_v51  ;;  %v3074_v1 = vmul.f32 %v2818_v56, %v2562_v55  ;;  %v2828_v46 = vld [vmem:[#allocation6 + $0x5e8] sm:$0xff]  ;;  %v2830_v56 = vld [vmem:[#allocation6 + $0x5f8] sm:$0xff] }
 0x28d   : > { %v2232_v60 = vpop.xlane.xlu0 %2231  ;;  %v2234_v61 = vpop.xlane.xlu1 %2233 }
 0x28e   : > { %v3327_v0 = vadd.f32 %v3326_v57, %v3072_v53  ;;  %v2563_v2 = vmul.f32 0.0625, %v2232_v60  ;;  %v2564_v3 = vmul.f32 0.0625, %v2234_v61 }
 0x290   : > { %v3328_v5 = vadd.f32 %v3327_v0, %v3073_v58  ;;  %v3075_v6 = vmul.f32 %v2819_v59, %v2563_v2  ;;  %2375 = vadd.xlane.f32.xlu0 %v1560_v62  ;;  %2377 = vadd.xlane.f32.xlu1 %v1561_v63  ;;  %v3076_v13 = vmul.f32 %v2820_v4, %v2564_v3  ;;  %v2831_v59 = vld [vmem:[#allocation6 + $0x600] sm:$0xff]  ;;  %v2832_v2 = vld [vmem:[#allocation6 + $0x608] sm:$0xff] }
 0x291   : > { %v2236_v8 = vpop.xlane.xlu0 %2235  ;;  %v2238_v9 = vpop.xlane.xlu1 %2237 }
 0x292   : > { %v3329_v12 = vadd.f32 %v3328_v5, %v3074_v1  ;;  %v2565_v14 = vmul.f32 0.0625, %v2236_v8  ;;  %v2566_v15 = vmul.f32 0.0625, %v2238_v9  ;;  %v2833_v5 = vld [vmem:[#allocation6 + $0x610] sm:$0xff] }
 0x294   : > { %v3330_v17 = vadd.f32 %v3329_v12, %v3075_v6  ;;  %v3077_v18 = vmul.f32 %v2821_v7, %v2565_v14  ;;  %2379 = vadd.xlane.f32.xlu0 %v1562_v10  ;;  %2381 = vadd.xlane.f32.xlu1 %v1563_v11  ;;  %v3078_v23 = vmul.f32 %v2822_v16, %v2566_v15  ;;  %v2834_v12 = vld [vmem:[#allocation6 + $0x618] sm:$0xff]  ;;  %v2835_v15 = vld [vmem:[#allocation6 + $0x620] sm:$0xff] }
 0x295   : > { %v2240_v20 = vpop.xlane.xlu0 %2239  ;;  %v2242_v21 = vpop.xlane.xlu1 %2241 }
 0x296   : > { %v3331_v22 = vadd.f32 %v3330_v17, %v3076_v13  ;;  %v2567_v24 = vmul.f32 0.0625, %v2240_v20  ;;  %v2568_v25 = vmul.f32 0.0625, %v2242_v21 }
 0x298   : > { %v3332_v27 = vadd.f32 %v3331_v22, %v3077_v18  ;;  %v3079_v28 = vmul.f32 %v2823_v19, %v2567_v24  ;;  %v3080_v33 = vmul.f32 %v2824_v26, %v2568_v25  ;;  %v2836_v22 = vld [vmem:[#allocation6 + $0x628] sm:$0xff]  ;;  %v2837_v25 = vld [vmem:[#allocation6 + $0x630] sm:$0xff] }
 0x299   : > { %v2244_v30 = vpop.xlane.xlu0 %2243  ;;  %v2246_v31 = vpop.xlane.xlu1 %2245 }
 0x29a   : > { %v3333_v32 = vadd.f32 %v3332_v27, %v3078_v23  ;;  %v2569_v34 = vmul.f32 0.0625, %v2244_v30  ;;  %v2570_v35 = vmul.f32 0.0625, %v2246_v31 }
 0x29c   : > { %v3334_v37 = vadd.f32 %v3333_v32, %v3079_v28  ;;  %v3081_v38 = vmul.f32 %v2825_v29, %v2569_v34  ;;  %v3082_v43 = vmul.f32 %v2826_v36, %v2570_v35  ;;  %v2838_v32 = vld [vmem:[#allocation6 + $0x638] sm:$0xff]  ;;  %v2839_v35 = vld [vmem:[#allocation6 + $0x640] sm:$0xff] }
 0x29d   : > { %v2248_v40 = vpop.xlane.xlu0 %2247  ;;  %v2250_v41 = vpop.xlane.xlu1 %2249 }
 0x29e   : > { %v3335_v42 = vadd.f32 %v3334_v37, %v3080_v33  ;;  %v2571_v44 = vmul.f32 0.0625, %v2248_v40  ;;  %v2572_v45 = vmul.f32 0.0625, %v2250_v41 }
 0x2a0   : > { %v3336_v47 = vadd.f32 %v3335_v42, %v3081_v38  ;;  %v3083_v48 = vmul.f32 %v2827_v39, %v2571_v44  ;;  %v3084_v53 = vmul.f32 %v2828_v46, %v2572_v45  ;;  %v2840_v42 = vld [vmem:[#allocation6 + $0x648] sm:$0xff]  ;;  %v2841_v45 = vld [vmem:[#allocation6 + $0x650] sm:$0xff] }
 0x2a1   : > { %v2252_v50 = vpop.xlane.xlu0 %2251  ;;  %v2254_v51 = vpop.xlane.xlu1 %2253 }
 0x2a2   : > { %v3337_v52 = vadd.f32 %v3336_v47, %v3082_v43  ;;  %v2573_v54 = vmul.f32 0.0625, %v2252_v50  ;;  %v2574_v55 = vmul.f32 0.0625, %v2254_v51 }
 0x2a4   : > { %v3338_v57 = vadd.f32 %v3337_v52, %v3083_v48  ;;  %v3085_v58 = vmul.f32 %v2829_v49, %v2573_v54  ;;  %v3086_v63 = vmul.f32 %v2830_v56, %v2574_v55  ;;  %v2842_v52 = vld [vmem:[#allocation6 + $0x658] sm:$0xff]  ;;  %v2843_v55 = vld [vmem:[#allocation6 + $0x660] sm:$0xff] }
 0x2a5   : > { %v2256_v60 = vpop.xlane.xlu0 %2255  ;;  %v2258_v61 = vpop.xlane.xlu1 %2257 }
 0x2a6   : > { %v3339_v62 = vadd.f32 %v3338_v57, %v3084_v53  ;;  %v2575_v0 = vmul.f32 0.0625, %v2256_v60  ;;  %v2576_v1 = vmul.f32 0.0625, %v2258_v61 }
 0x2a8   : > { %v3340_v3 = vadd.f32 %v3339_v62, %v3085_v58  ;;  %v3087_v4 = vmul.f32 %v2831_v59, %v2575_v0  ;;  %v3088_v9 = vmul.f32 %v2832_v2, %v2576_v1  ;;  %v2844_v62 = vld [vmem:[#allocation6 + $0x668] sm:$0xff]  ;;  %v2845_v1 = vld [vmem:[#allocation6 + $0x670] sm:$0xff] }
 0x2a9   : > { %v2260_v6 = vpop.xlane.xlu0 %2259  ;;  %v2262_v7 = vpop.xlane.xlu1 %2261 }
 0x2aa   : > { %v3341_v8 = vadd.f32 %v3340_v3, %v3086_v63  ;;  %v2577_v10 = vmul.f32 0.0625, %v2260_v6  ;;  %v2578_v11 = vmul.f32 0.0625, %v2262_v7 }
 0x2ac   : > { %v3342_v13 = vadd.f32 %v3341_v8, %v3087_v4  ;;  %v3089_v14 = vmul.f32 %v2833_v5, %v2577_v10  ;;  %v3090_v19 = vmul.f32 %v2834_v12, %v2578_v11  ;;  %v2846_v8 = vld [vmem:[#allocation6 + $0x678] sm:$0xff]  ;;  %v2847_v11 = vld [vmem:[#allocation6 + $0x680] sm:$0xff] }
 0x2ad   : > { %v2264_v16 = vpop.xlane.xlu0 %2263  ;;  %v2266_v17 = vpop.xlane.xlu1 %2265 }
 0x2ae   : > { %v3343_v18 = vadd.f32 %v3342_v13, %v3088_v9  ;;  %v2579_v20 = vmul.f32 0.0625, %v2264_v16  ;;  %v2580_v21 = vmul.f32 0.0625, %v2266_v17 }
 0x2b0   : > { %v3344_v23 = vadd.f32 %v3343_v18, %v3089_v14  ;;  %v3091_v24 = vmul.f32 %v2835_v15, %v2579_v20  ;;  %v3092_v29 = vmul.f32 %v2836_v22, %v2580_v21  ;;  %v2848_v18 = vld [vmem:[#allocation6 + $0x688] sm:$0xff]  ;;  %v2849_v21 = vld [vmem:[#allocation6 + $0x690] sm:$0xff] }
 0x2b1   : > { %v2268_v26 = vpop.xlane.xlu0 %2267  ;;  %v2270_v27 = vpop.xlane.xlu1 %2269 }
 0x2b2   : > { %v3345_v28 = vadd.f32 %v3344_v23, %v3090_v19  ;;  %v2581_v30 = vmul.f32 0.0625, %v2268_v26  ;;  %v2582_v31 = vmul.f32 0.0625, %v2270_v27 }
 0x2b4   : > { %v3346_v33 = vadd.f32 %v3345_v28, %v3091_v24  ;;  %v3093_v34 = vmul.f32 %v2837_v25, %v2581_v30  ;;  %v3094_v39 = vmul.f32 %v2838_v32, %v2582_v31  ;;  %v2850_v28 = vld [vmem:[#allocation6 + $0x698] sm:$0xff]  ;;  %v2851_v31 = vld [vmem:[#allocation6 + $0x6a0] sm:$0xff] }
 0x2b5   : > { %v2272_v36 = vpop.xlane.xlu0 %2271  ;;  %v2274_v37 = vpop.xlane.xlu1 %2273 }
 0x2b6   : > { %v3347_v38 = vadd.f32 %v3346_v33, %v3092_v29  ;;  %v2583_v40 = vmul.f32 0.0625, %v2272_v36  ;;  %v2584_v41 = vmul.f32 0.0625, %v2274_v37 }
 0x2b8   : > { %v3348_v43 = vadd.f32 %v3347_v38, %v3093_v34  ;;  %v3095_v44 = vmul.f32 %v2839_v35, %v2583_v40  ;;  %v3096_v49 = vmul.f32 %v2840_v42, %v2584_v41  ;;  %v2852_v38 = vld [vmem:[#allocation6 + $0x6a8] sm:$0xff]  ;;  %v2853_v41 = vld [vmem:[#allocation6 + $0x6b0] sm:$0xff] }
 0x2b9   : > { %v2276_v46 = vpop.xlane.xlu0 %2275  ;;  %v2278_v47 = vpop.xlane.xlu1 %2277 }
 0x2ba   : > { %v3349_v48 = vadd.f32 %v3348_v43, %v3094_v39  ;;  %v2585_v50 = vmul.f32 0.0625, %v2276_v46  ;;  %v2586_v51 = vmul.f32 0.0625, %v2278_v47 }
 0x2bc   : > { %v3350_v53 = vadd.f32 %v3349_v48, %v3095_v44  ;;  %v3097_v54 = vmul.f32 %v2841_v45, %v2585_v50  ;;  %v3098_v59 = vmul.f32 %v2842_v52, %v2586_v51  ;;  %v2854_v48 = vld [vmem:[#allocation6 + $0x6b8] sm:$0xff]  ;;  %v2855_v51 = vld [vmem:[#allocation6 + $0x6c0] sm:$0xff] }
 0x2bd   : > { %v2280_v56 = vpop.xlane.xlu0 %2279  ;;  %v2282_v57 = vpop.xlane.xlu1 %2281 }
 0x2be   : > { %v3351_v58 = vadd.f32 %v3350_v53, %v3096_v49  ;;  %v2587_v60 = vmul.f32 0.0625, %v2280_v56  ;;  %v2588_v61 = vmul.f32 0.0625, %v2282_v57 }
 0x2c0   : > { %v3352_v63 = vadd.f32 %v3351_v58, %v3097_v54  ;;  %v3099_v0 = vmul.f32 %v2843_v55, %v2587_v60  ;;  %v3100_v5 = vmul.f32 %v2844_v62, %v2588_v61  ;;  %v2856_v58 = vld [vmem:[#allocation6 + $0x6c8] sm:$0xff]  ;;  %v2857_v61 = vld [vmem:[#allocation6 + $0x6d0] sm:$0xff] }
 0x2c1   : > { %v2284_v2 = vpop.xlane.xlu0 %2283  ;;  %v2286_v3 = vpop.xlane.xlu1 %2285 }
 0x2c2   : > { %v3353_v4 = vadd.f32 %v3352_v63, %v3098_v59  ;;  %v2589_v6 = vmul.f32 0.0625, %v2284_v2  ;;  %v2590_v7 = vmul.f32 0.0625, %v2286_v3 }
 0x2c4   : > { %v3354_v9 = vadd.f32 %v3353_v4, %v3099_v0  ;;  %v3101_v10 = vmul.f32 %v2845_v1, %v2589_v6  ;;  %v3102_v15 = vmul.f32 %v2846_v8, %v2590_v7  ;;  %v2858_v4 = vld [vmem:[#allocation6 + $0x6d8] sm:$0xff]  ;;  %v2859_v7 = vld [vmem:[#allocation6 + $0x6e0] sm:$0xff] }
 0x2c5   : > { %v2288_v12 = vpop.xlane.xlu0 %2287  ;;  %v2290_v13 = vpop.xlane.xlu1 %2289 }
 0x2c6   : > { %v3355_v14 = vadd.f32 %v3354_v9, %v3100_v5  ;;  %v2591_v16 = vmul.f32 0.0625, %v2288_v12  ;;  %v2592_v17 = vmul.f32 0.0625, %v2290_v13 }
 0x2c8   : > { %v3356_v19 = vadd.f32 %v3355_v14, %v3101_v10  ;;  %v3103_v20 = vmul.f32 %v2847_v11, %v2591_v16  ;;  %v3104_v25 = vmul.f32 %v2848_v18, %v2592_v17  ;;  %v2860_v14 = vld [vmem:[#allocation6 + $0x6e8] sm:$0xff]  ;;  %v2861_v17 = vld [vmem:[#allocation6 + $0x6f0] sm:$0xff] }
 0x2c9   : > { %v2292_v22 = vpop.xlane.xlu0 %2291  ;;  %v2294_v23 = vpop.xlane.xlu1 %2293 }
 0x2ca   : > { %v3357_v24 = vadd.f32 %v3356_v19, %v3102_v15  ;;  %v2593_v26 = vmul.f32 0.0625, %v2292_v22  ;;  %v2594_v27 = vmul.f32 0.0625, %v2294_v23 }
 0x2cc   : > { %v3358_v29 = vadd.f32 %v3357_v24, %v3103_v20  ;;  %v3105_v30 = vmul.f32 %v2849_v21, %v2593_v26  ;;  %v3106_v35 = vmul.f32 %v2850_v28, %v2594_v27  ;;  %v2862_v24 = vld [vmem:[#allocation6 + $0x6f8] sm:$0xff]  ;;  %v2863_v27 = vld [vmem:[#allocation6 + $0x700] sm:$0xff] }
 0x2cd   : > { %v2296_v32 = vpop.xlane.xlu0 %2295  ;;  %v2298_v33 = vpop.xlane.xlu1 %2297 }
 0x2ce   : > { %v3359_v34 = vadd.f32 %v3358_v29, %v3104_v25  ;;  %v2595_v36 = vmul.f32 0.0625, %v2296_v32  ;;  %v2596_v37 = vmul.f32 0.0625, %v2298_v33 }
 0x2d0   : > { %v3360_v39 = vadd.f32 %v3359_v34, %v3105_v30  ;;  %v3107_v40 = vmul.f32 %v2851_v31, %v2595_v36  ;;  %v3108_v45 = vmul.f32 %v2852_v38, %v2596_v37  ;;  %v2864_v34 = vld [vmem:[#allocation6 + $0x708] sm:$0xff]  ;;  %v2865_v37 = vld [vmem:[#allocation6 + $0x710] sm:$0xff] }
 0x2d1   : > { %v2300_v42 = vpop.xlane.xlu0 %2299  ;;  %v2302_v43 = vpop.xlane.xlu1 %2301 }
 0x2d2   : > { %v3361_v44 = vadd.f32 %v3360_v39, %v3106_v35  ;;  %v2597_v46 = vmul.f32 0.0625, %v2300_v42  ;;  %v2598_v47 = vmul.f32 0.0625, %v2302_v43 }
 0x2d4   : > { %v3362_v49 = vadd.f32 %v3361_v44, %v3107_v40  ;;  %v3109_v50 = vmul.f32 %v2853_v41, %v2597_v46  ;;  %v3110_v55 = vmul.f32 %v2854_v48, %v2598_v47  ;;  %v2866_v44 = vld [vmem:[#allocation6 + $0x718] sm:$0xff]  ;;  %v2867_v47 = vld [vmem:[#allocation6 + $0x720] sm:$0xff] }
 0x2d5   : > { %v2304_v52 = vpop.xlane.xlu0 %2303  ;;  %v2306_v53 = vpop.xlane.xlu1 %2305 }
 0x2d6   : > { %v3363_v54 = vadd.f32 %v3362_v49, %v3108_v45  ;;  %v2599_v56 = vmul.f32 0.0625, %v2304_v52  ;;  %v2600_v57 = vmul.f32 0.0625, %v2306_v53 }
 0x2d8   : > { %v3364_v59 = vadd.f32 %v3363_v54, %v3109_v50  ;;  %v3111_v60 = vmul.f32 %v2855_v51, %v2599_v56  ;;  %v3112_v1 = vmul.f32 %v2856_v58, %v2600_v57  ;;  %v2868_v54 = vld [vmem:[#allocation6 + $0x728] sm:$0xff]  ;;  %v2869_v57 = vld [vmem:[#allocation6 + $0x730] sm:$0xff] }
 0x2d9   : > { %v2308_v62 = vpop.xlane.xlu0 %2307  ;;  %v2310_v63 = vpop.xlane.xlu1 %2309 }
 0x2da   : > { %v3365_v0 = vadd.f32 %v3364_v59, %v3110_v55  ;;  %v2601_v2 = vmul.f32 0.0625, %v2308_v62  ;;  %v2602_v3 = vmul.f32 0.0625, %v2310_v63 }
 0x2dc   : > { %v3366_v5 = vadd.f32 %v3365_v0, %v3111_v60  ;;  %v3113_v6 = vmul.f32 %v2857_v61, %v2601_v2  ;;  %v3114_v11 = vmul.f32 %v2858_v4, %v2602_v3  ;;  %v2870_v0 = vld [vmem:[#allocation6 + $0x738] sm:$0xff]  ;;  %v2871_v3 = vld [vmem:[#allocation6 + $0x740] sm:$0xff] }
 0x2dd   : > { %v2312_v8 = vpop.xlane.xlu0 %2311  ;;  %v2314_v9 = vpop.xlane.xlu1 %2313 }
 0x2de   : > { %v3367_v10 = vadd.f32 %v3366_v5, %v3112_v1  ;;  %v2603_v12 = vmul.f32 0.0625, %v2312_v8  ;;  %v2604_v13 = vmul.f32 0.0625, %v2314_v9 }
 0x2e0   : > { %v3368_v15 = vadd.f32 %v3367_v10, %v3113_v6  ;;  %v3115_v16 = vmul.f32 %v2859_v7, %v2603_v12  ;;  %v3116_v21 = vmul.f32 %v2860_v14, %v2604_v13  ;;  %v2872_v10 = vld [vmem:[#allocation6 + $0x748] sm:$0xff]  ;;  %v2873_v13 = vld [vmem:[#allocation6 + $0x750] sm:$0xff] }
 0x2e1   : > { %v2316_v18 = vpop.xlane.xlu0 %2315  ;;  %v2318_v19 = vpop.xlane.xlu1 %2317 }
 0x2e2   : > { %v3369_v20 = vadd.f32 %v3368_v15, %v3114_v11  ;;  %v2605_v22 = vmul.f32 0.0625, %v2316_v18  ;;  %v2606_v23 = vmul.f32 0.0625, %v2318_v19 }
 0x2e4   : > { %v3370_v25 = vadd.f32 %v3369_v20, %v3115_v16  ;;  %v3117_v26 = vmul.f32 %v2861_v17, %v2605_v22  ;;  %v3118_v31 = vmul.f32 %v2862_v24, %v2606_v23  ;;  %v2874_v20 = vld [vmem:[#allocation6 + $0x758] sm:$0xff]  ;;  %v2875_v23 = vld [vmem:[#allocation6 + $0x760] sm:$0xff] }
 0x2e5   : > { %v2320_v28 = vpop.xlane.xlu0 %2319  ;;  %v2322_v29 = vpop.xlane.xlu1 %2321 }
 0x2e6   : > { %v3371_v30 = vadd.f32 %v3370_v25, %v3116_v21  ;;  %v2607_v32 = vmul.f32 0.0625, %v2320_v28  ;;  %v2608_v33 = vmul.f32 0.0625, %v2322_v29 }
 0x2e8   : > { %v3372_v35 = vadd.f32 %v3371_v30, %v3117_v26  ;;  %v3119_v36 = vmul.f32 %v2863_v27, %v2607_v32  ;;  %v3120_v41 = vmul.f32 %v2864_v34, %v2608_v33  ;;  %v2876_v30 = vld [vmem:[#allocation6 + $0x768] sm:$0xff]  ;;  %v2877_v33 = vld [vmem:[#allocation6 + $0x770] sm:$0xff] }
 0x2e9   : > { %v2324_v38 = vpop.xlane.xlu0 %2323  ;;  %v2326_v39 = vpop.xlane.xlu1 %2325 }
 0x2ea   : > { %v3373_v40 = vadd.f32 %v3372_v35, %v3118_v31  ;;  %v2609_v42 = vmul.f32 0.0625, %v2324_v38  ;;  %v2610_v43 = vmul.f32 0.0625, %v2326_v39 }
 0x2ec   : > { %v3374_v45 = vadd.f32 %v3373_v40, %v3119_v36  ;;  %v3121_v46 = vmul.f32 %v2865_v37, %v2609_v42  ;;  %v3122_v51 = vmul.f32 %v2866_v44, %v2610_v43  ;;  %v2878_v40 = vld [vmem:[#allocation6 + $0x778] sm:$0xff]  ;;  %v2879_v43 = vld [vmem:[#allocation6 + $0x780] sm:$0xff] }
 0x2ed   : > { %v2328_v48 = vpop.xlane.xlu0 %2327  ;;  %v2330_v49 = vpop.xlane.xlu1 %2329 }
 0x2ee   : > { %v3375_v50 = vadd.f32 %v3374_v45, %v3120_v41  ;;  %v2611_v52 = vmul.f32 0.0625, %v2328_v48  ;;  %v2612_v53 = vmul.f32 0.0625, %v2330_v49 }
 0x2f0   : > { %v3376_v55 = vadd.f32 %v3375_v50, %v3121_v46  ;;  %v3123_v56 = vmul.f32 %v2867_v47, %v2611_v52  ;;  %v3124_v61 = vmul.f32 %v2868_v54, %v2612_v53  ;;  %v2880_v50 = vld [vmem:[#allocation6 + $0x788] sm:$0xff]  ;;  %v2881_v53 = vld [vmem:[#allocation6 + $0x790] sm:$0xff] }
 0x2f1   : > { %v2332_v58 = vpop.xlane.xlu0 %2331  ;;  %v2334_v59 = vpop.xlane.xlu1 %2333 }
 0x2f2   : > { %v3377_v60 = vadd.f32 %v3376_v55, %v3122_v51  ;;  %v2613_v62 = vmul.f32 0.0625, %v2332_v58  ;;  %v2614_v63 = vmul.f32 0.0625, %v2334_v59 }
 0x2f4   : > { %v3378_v1 = vadd.f32 %v3377_v60, %v3123_v56  ;;  %v3125_v2 = vmul.f32 %v2869_v57, %v2613_v62  ;;  %v3126_v7 = vmul.f32 %v2870_v0, %v2614_v63  ;;  %v2882_v60 = vld [vmem:[#allocation6 + $0x798] sm:$0xff]  ;;  %v2883_v63 = vld [vmem:[#allocation6 + $0x7a0] sm:$0xff] }
 0x2f5   : > { %v2336_v4 = vpop.xlane.xlu0 %2335  ;;  %v2338_v5 = vpop.xlane.xlu1 %2337 }
 0x2f6   : > { %v3379_v6 = vadd.f32 %v3378_v1, %v3124_v61  ;;  %v2615_v8 = vmul.f32 0.0625, %v2336_v4  ;;  %v2616_v9 = vmul.f32 0.0625, %v2338_v5 }
 0x2f8   : > { %v3380_v11 = vadd.f32 %v3379_v6, %v3125_v2  ;;  %v3127_v12 = vmul.f32 %v2871_v3, %v2615_v8  ;;  %v3128_v17 = vmul.f32 %v2872_v10, %v2616_v9  ;;  %v2884_v6 = vld [vmem:[#allocation6 + $0x7a8] sm:$0xff]  ;;  %v2885_v9 = vld [vmem:[#allocation6 + $0x7b0] sm:$0xff] }
 0x2f9   : > { %v2340_v14 = vpop.xlane.xlu0 %2339  ;;  %v2342_v15 = vpop.xlane.xlu1 %2341 }
 0x2fa   : > { %v3381_v16 = vadd.f32 %v3380_v11, %v3126_v7  ;;  %v2617_v18 = vmul.f32 0.0625, %v2340_v14  ;;  %v2618_v19 = vmul.f32 0.0625, %v2342_v15 }
 0x2fc   : > { %v3382_v21 = vadd.f32 %v3381_v16, %v3127_v12  ;;  %v3129_v22 = vmul.f32 %v2873_v13, %v2617_v18  ;;  %v3130_v27 = vmul.f32 %v2874_v20, %v2618_v19  ;;  %v2886_v16 = vld [vmem:[#allocation6 + $0x7b8] sm:$0xff]  ;;  %v2887_v19 = vld [vmem:[#allocation6 + $0x7c0] sm:$0xff] }
 0x2fd   : > { %v2344_v24 = vpop.xlane.xlu0 %2343  ;;  %v2346_v25 = vpop.xlane.xlu1 %2345 }
 0x2fe   : > { %v3383_v26 = vadd.f32 %v3382_v21, %v3128_v17  ;;  %v2619_v28 = vmul.f32 0.0625, %v2344_v24  ;;  %v2620_v29 = vmul.f32 0.0625, %v2346_v25 }
 0x300   : > { %v3384_v31 = vadd.f32 %v3383_v26, %v3129_v22  ;;  %v3131_v32 = vmul.f32 %v2875_v23, %v2619_v28  ;;  %v3132_v37 = vmul.f32 %v2876_v30, %v2620_v29  ;;  %v2888_v26 = vld [vmem:[#allocation6 + $0x7c8] sm:$0xff]  ;;  %v2889_v29 = vld [vmem:[#allocation6 + $0x7d0] sm:$0xff] }
 0x301   : > { %v2348_v34 = vpop.xlane.xlu0 %2347  ;;  %v2350_v35 = vpop.xlane.xlu1 %2349 }
 0x302   : > { %v3385_v36 = vadd.f32 %v3384_v31, %v3130_v27  ;;  %v2621_v38 = vmul.f32 0.0625, %v2348_v34  ;;  %v2622_v39 = vmul.f32 0.0625, %v2350_v35 }
 0x304   : > { %v3386_v41 = vadd.f32 %v3385_v36, %v3131_v32  ;;  %v3133_v42 = vmul.f32 %v2877_v33, %v2621_v38  ;;  %v3134_v47 = vmul.f32 %v2878_v40, %v2622_v39  ;;  %v2890_v36 = vld [vmem:[#allocation6 + $0x7d8] sm:$0xff]  ;;  %v2891_v39 = vld [vmem:[#allocation6 + $0x7e0] sm:$0xff] }
 0x305   : > { %v2352_v44 = vpop.xlane.xlu0 %2351  ;;  %v2354_v45 = vpop.xlane.xlu1 %2353 }
 0x306   : > { %v3387_v46 = vadd.f32 %v3386_v41, %v3132_v37  ;;  %v2623_v48 = vmul.f32 0.0625, %v2352_v44  ;;  %v2624_v49 = vmul.f32 0.0625, %v2354_v45 }
 0x308   : > { %v3388_v51 = vadd.f32 %v3387_v46, %v3133_v42  ;;  %v3135_v52 = vmul.f32 %v2879_v43, %v2623_v48  ;;  %v3136_v57 = vmul.f32 %v2880_v50, %v2624_v49  ;;  %v2892_v46 = vld [vmem:[#allocation6 + $0x7e8] sm:$0xff]  ;;  %v2893_v49 = vld [vmem:[#allocation6 + $0x7f0] sm:$0xff] }
 0x309   : > { %v2356_v54 = vpop.xlane.xlu0 %2355  ;;  %v2358_v55 = vpop.xlane.xlu1 %2357 }
 0x30a   : > { %v3389_v56 = vadd.f32 %v3388_v51, %v3134_v47  ;;  %v2625_v58 = vmul.f32 0.0625, %v2356_v54  ;;  %v2626_v59 = vmul.f32 0.0625, %v2358_v55 }
 0x30c   : > { %v3390_v61 = vadd.f32 %v3389_v56, %v3135_v52  ;;  %v3137_v62 = vmul.f32 %v2881_v53, %v2625_v58  ;;  %v3138_v3 = vmul.f32 %v2882_v60, %v2626_v59  ;;  %v2894_v56 = vld [vmem:[#allocation6 + $0x7f8] sm:$0xff] }
 0x30d   : > { %v2360_v0 = vpop.xlane.xlu0 %2359  ;;  %v2362_v1 = vpop.xlane.xlu1 %2361 }
 0x30e   : > { %v3391_v2 = vadd.f32 %v3390_v61, %v3136_v57  ;;  %v2627_v4 = vmul.f32 0.0625, %v2360_v0  ;;  %v2628_v5 = vmul.f32 0.0625, %v2362_v1 }
 0x310   : > { %v3392_v7 = vadd.f32 %v3391_v2, %v3137_v62  ;;  %v3139_v8 = vmul.f32 %v2883_v63, %v2627_v4  ;;  %v3140_v13 = vmul.f32 %v2884_v6, %v2628_v5  ;;  %v3412_v4 = vld [vmem:[#allocation8] sm:$0x1] }
 0x311   : > { %v2364_v10 = vpop.xlane.xlu0 %2363  ;;  %v2366_v11 = vpop.xlane.xlu1 %2365 }
 0x312   : > { %v3393_v12 = vadd.f32 %v3392_v7, %v3138_v3  ;;  %v2629_v14 = vmul.f32 0.0625, %v2364_v10  ;;  %v2630_v15 = vmul.f32 0.0625, %v2366_v11 }
 0x314   : > { %v3394_v17 = vadd.f32 %v3393_v12, %v3139_v8  ;;  %v3141_v18 = vmul.f32 %v2885_v9, %v2629_v14  ;;  %v3142_v23 = vmul.f32 %v2886_v16, %v2630_v15  ;;  %v3421_v16 = vld [vmem:[%s294_s7] sm:$0x1] }
 0x315   : > { %v2368_v20 = vpop.xlane.xlu0 %2367  ;;  %v2370_v21 = vpop.xlane.xlu1 %2369 }
 0x316   : > { %v3395_v22 = vadd.f32 %v3394_v17, %v3140_v13  ;;  %v2631_v24 = vmul.f32 0.0625, %v2368_v20  ;;  %v2632_v25 = vmul.f32 0.0625, %v2370_v21  ;;  %v3433_v17 = vlaneseq }
 0x318   : > { %v3396_v27 = vadd.f32 %v3395_v22, %v3141_v18  ;;  %v3143_v28 = vmul.f32 %v2887_v19, %v2631_v24  ;;  %v3144_v33 = vmul.f32 %v2888_v26, %v2632_v25  ;;  %v3434_v21 = vand.u32 127, %v3433_v17 }
 0x319   : > { %v2372_v30 = vpop.xlane.xlu0 %2371  ;;  %v2374_v31 = vpop.xlane.xlu1 %2373 }
 0x31a   : > { %v3397_v32 = vadd.f32 %v3396_v27, %v3142_v23  ;;  %v2633_v34 = vmul.f32 0.0625, %v2372_v30  ;;  %v2634_v35 = vmul.f32 0.0625, %v2374_v31 }
 0x31c   : > { %v3398_v37 = vadd.f32 %v3397_v32, %v3143_v28  ;;  %v3145_v38 = vmul.f32 %v2889_v29, %v2633_v34  ;;  %v3146_v43 = vmul.f32 %v2890_v36, %v2634_v35 }
 0x31d   : > { %v2376_v40 = vpop.xlane.xlu0 %2375  ;;  %v2378_v41 = vpop.xlane.xlu1 %2377 }
 0x31e   : > { %v3399_v42 = vadd.f32 %v3398_v37, %v3144_v33  ;;  %v2635_v44 = vmul.f32 0.0625, %v2376_v40  ;;  %v2636_v45 = vmul.f32 0.0625, %v2378_v41 }
 0x320   : > { %v3400_v47 = vadd.f32 %v3399_v42, %v3145_v38  ;;  %v3147_v48 = vmul.f32 %v2891_v39, %v2635_v44  ;;  %v3148_v53 = vmul.f32 %v2892_v46, %v2636_v45 }
 0x321   : > { %v2380_v50 = vpop.xlane.xlu0 %2379  ;;  %v2382_v51 = vpop.xlane.xlu1 %2381 }
 0x322   : > { %v3401_v52 = vadd.f32 %v3400_v47, %v3146_v43  ;;  %v2637_v54 = vmul.f32 0.0625, %v2380_v50  ;;  %v2638_v55 = vmul.f32 0.0625, %v2382_v51 }
 0x324   : > { %v3402_v57 = vadd.f32 %v3401_v52, %v3147_v48  ;;  %v3149_v58 = vmul.f32 %v2893_v49, %v2637_v54  ;;  %v3150_v60 = vmul.f32 %v2894_v56, %v2638_v55 }
 0x326   : > { %v3403_v59 = vadd.f32 %v3402_v57, %v3148_v53 }
 0x328   : > { %v3404_v61 = vadd.f32 %v3403_v59, %v3149_v58 }
 0x32a   : > { %v3405_v62 = vadd.f32 %v3404_v61, %v3150_v60 }
 0x32c   : > { %v3406_v63 = vrot.slane %v3405_v62, 4 }
 0x32e   : > { %v3407_v0 = vadd.f32 %v3406_v63, %v3405_v62 }
 0x330   : > { %v3408_v1 = vrot.slane %v3407_v0, 2 }
 0x332   : > { %v3409_v2 = vadd.f32 %v3408_v1, %v3407_v0 }
 0x334   : > { %v3410_v3 = vrot.slane %v3409_v2, 1 }
 0x336   : > { %v3411_v5 = vadd.f32 %v3410_v3, %v3409_v2 }
 0x338   : > { %v3413_v6 = vadd.f32 %v3412_v4, %v3411_v5 }
 0x33a   : > { %v3414_v7 = vsub.f32 0.0, %v3413_v6  ;;  %v3425_v8 = vand.u32 2147483647, %v3413_v6  ;;  %v3422_v18 = vmax.f32 %v3413_v6, 0.0  ;;  %v3423_v19 = vmul.f32 %v3421_v16, %v3413_v6 }
 0x33c   : > { %v3415_v9 = vmul.f32 1.442695, %v3414_v7  ;;  %v3426_v10 = vsub.f32 0.0, %v3425_v8 }
 0x33e   : > { %3725 = vpow2.f32 %v3415_v9  ;;  %v3427_v11 = vmul.f32 1.442695, %v3426_v10 }
 0x340   : > { %3727 = vpow2.f32 %v3427_v11 }
 0x348   : > { %v3726_v12 = vpop.eup %3725 }
 0x349   : > { %v3417_v13 = vadd.f32 1.0, %v3726_v12 }
 0x34a   : > { %v3728_v14 = vpop.eup %3727 }
 0x34b   : > { %3729 = vrcp.f32 %v3417_v13  ;;  %v3429_v15 = vadd.f32 1.0, %v3728_v14 }
 0x34d   : > { %3731 = vlog2.f32 %v3429_v15 }
 0x355   : > { %v3730_v20 = vpop.eup %3729 }
 0x356   : > { %3420 = vst [vmem:[%s321_s29] sm:$0x1] %v3730_v20 }
 0x357   : > { %v3732_v22 = vpop.eup %3731 }
 0x358   : > { %3862 = shalt.err (!%p3859_p13)
}
 0x359   : > { %s3863_s28 = scalar_lea.hbm %s4525_s6, 16  ;;  %s3867_s26 = scalar_lea.hbm %s4610_s4, 32 }
 0x35a   : > { %p3864_p3 = scmp.ne.s32.totalorder %s4525_s6, %s3863_s28  ;;  %p3868_p7 = scmp.lt.u32.totalorder %s4525_s6, %s4610_s4 }
 0x35b   : > { %p3869_p12 = scmp.lt.u32.totalorder %s3867_s26, %s3863_s28  ;;  %p3871_p10 = scmp.lt.u32.totalorder %s3863_s28, %s4525_s6 }
 0x35c   : > { %p3865_p4 = pnand %p3864_p3, %p4639_p9 }
 0x35d   : > { %p3870_p1 = por %p3869_p12, %p3868_p7 }
 0x35e   : > { %p3866_p8 = pneg %p3865_p4 }
 0x35f   : > { %p3872_p0 = por %p3871_p10, %p3870_p1 }
 0x361   : > { %p3873_p11 = pnand %p3872_p0, %p3866_p8 }
 0x363   : > { %3876 = shalt.err (!%p3873_p11)
}
 0x364   : > { %3642 = dma.vmem_to_hbm [thread:$0]  (%p4639_p9), %s4527_s13, 16, %s4525_s6, %s3439_s10   ;;  %v3424_v23 = vsub.f32 %v3422_v18, %v3423_v19  ;;  %v3431_v24 = vmul.f32 0.6931472, %v3732_v22  ;;  %vm3435_vm0 = vcmp.lt.s32.totalorder %v3434_v21, 11 }
 0x365   : > { %s327_s29 = scalar_lea.vmem [#allocation12], %s4240_s1  ;;  %s4557_s17 = scalar_lea.hbm %s4611_s5, %s3625_s27 }
 0x366   : > { %s3468_s16 = sshll.u32 %s327_s29, 4  ;;  %v3432_v25 = vadd.f32 %v3431_v24, %v3424_v23  ;;  %s3443_s13 = scalar_lea.sflag [#allocation13], %s4240_s1  ;;  %s4559_s16 = int_to_ptr.vmem [resolvable:$true] %s3468_s16 }
 0x367   : > { %s3877_s6 = scalar_lea.vmem %s4559_s16, 16  ;;  %s3980_s10 = smov [#allocation12]  }
 0x368   : > { %v3436_v26 = vsel %vm3435_vm0, %v3432_v25, 0.0  ;;  %p3878_p5 = scmp.ne.s32.totalorder %s4559_s16, %s3877_s6  ;;  %s3881_s21 = sshll.u32 %s3980_s10, 4  ;;  %s3882_s21 = int_to_ptr.vmem [resolvable:$false] %s3881_s21 }
 0x369   : > { %3437 = vst [vmem:[%s327_s29] sm:$0x1] %v3436_v26  ;;  %s3883_s9 = scalar_lea.vmem %s3882_s21, 32  ;;  %p3884_p13 = scmp.lt.s32.totalorder %s4559_s16, %s3882_s21 }
 0x36a   : > { %p3879_p2 = pnand %p3878_p5, %p4639_p9  ;;  %p3885_p3 = scmp.lt.s32.totalorder %s3883_s9, %s3877_s6 }
 0x36c   : > { %p3880_p6 = pneg %p3879_p2  ;;  %p3886_p4 = por %p3885_p3, %p3884_p13 }
 0x36e   : > { %p3887_p8 = pnand %p3886_p4, %p3880_p6 }
 0x370   : > { %3890 = shalt.err (!%p3887_p8)
}
 0x371   : > { %s3891_s1 = scalar_lea.hbm %s4557_s17, 16  ;;  %s3895_s28 = scalar_lea.hbm %s4611_s5, 32 }
 0x372   : > { %p3892_p7 = scmp.ne.s32.totalorder %s4557_s17, %s3891_s1  ;;  %p3896_p10 = scmp.lt.u32.totalorder %s4557_s17, %s4611_s5 }
 0x373   : > { %p3897_p0 = scmp.lt.u32.totalorder %s3895_s28, %s3891_s1  ;;  %p3899_p5 = scmp.lt.u32.totalorder %s3891_s1, %s4557_s17 }
 0x374   : > { %p3893_p12 = pnand %p3892_p7, %p4639_p9 }
 0x375   : > { %p3898_p11 = por %p3897_p0, %p3896_p10 }
 0x376   : > { %p3894_p1 = pneg %p3893_p12 }
 0x377   : > { %p3900_p2 = por %p3899_p5, %p3898_p11 }
 0x379   : > { %p3901_p6 = pnand %p3900_p2, %p3894_p1 }
 0x37b   : > { %3904 = shalt.err (!%p3901_p6)
}
 0x37c   : > { %3643 = dma.vmem_to_hbm [thread:$0]  (%p4639_p9), %s4559_s16, 16, %s4557_s17, %s3443_s13  }
 0x37d PF: > { %s4640_s26 = sld [smem:[#allocation19_spill]]  ;;  %s3480_s0 = sand.u32 1, %s3951_s18  }
 0x37e   : > { %p4642_p3 = scmp.ge.s32.totalorder %s3971_s23, 2  ;;  %s3481_s7 = scalar_lea.sflag [#allocation5], %s3480_s0 }
 0x383   : > { %p4641_p13 = scmp.ne.s32.totalorder %s4640_s26, 0 }
 0x385   : > { %p3661_p4 = pnand %p4642_p3, %p4641_p13 }
 0x387   : > { %3942 = dma.done.wait (!%p3661_p4), %s3481_s7, 16  }
 0x388   : > { %3944 = vsyncadd (!%p3661_p4), %s3481_s7, 4294967280  ;;  %s3489_s29 = scalar_lea.sflag [#allocation13], %s3480_s0 }
 0x389   : > { %3946 = dma.done.wait (!%p3661_p4), %s3489_s29, 16  }
 0x38a   : > { %3948 = vsyncadd (!%p3661_p4), %s3489_s29, 4294967280  ;;  %s29_s23 = sadd.s32 1, %s3971_s23   ;;  %s4643_s18 = smov %s3955_s19 }
 0x38b   : > { %p26_p8 = scmp.ge.s32.totalorder %s29_s23, 4   ;;  %s4644_s19 = smov %s3959_s20 }
 0x38c   : > { %s4645_s20 = smov %s4175_s8  ;;  %s4646_s21 = smov %s3967_s22 }
 0x38d   : > { %s4647_s22 = smov %s4649_s24  ;;  %28 = sbr.rel (!%p26_p8) target bundleno = 14 (0xe), region = 127 }
 0x394   :  { %3493 = vsyncpa [#allocation4], 1 }
 0x395   :  { %3495 = vsyncpa [#allocation4 + $0x1], 1 }
 0x396   :  { %3496 = vsyncpa [#allocation7], 1 }
 0x397   :  { %3497 = vsyncpa [#allocation10], 1 }
 0x398   :  { %3499 = vsyncpa [#allocation10 + $0x1], 1 }
 0x399   :  { %3500 = vsyncpa [#allocation5], 1 }
 0x39a   :  { %3502 = vsyncpa [#allocation5 + $0x1], 1 }
 0x39b   :  { %3503 = vsyncpa [#allocation13], 1 }
 0x39c   :  { %3505 = vsyncpa [#allocation13 + $0x1], 1 }

</bundles_post_ra>
